<compile_context>
chip_gen: v7x
topology: tpu7x:2x2x1
jax: 0.10.0
libtpu: 0.0.40
codegen_flags: <defaults>
</compile_context>

<pallas_src>
import functools

import jax
import jax.numpy as jnp
from jax.experimental import pallas as pl
from jax.experimental.pallas import tpu as pltpu


# ----------------------------------------------------------------------------
# Fused forward kernel: merged 3-stream LSTM stack + MLP head, all in VMEM.
# ----------------------------------------------------------------------------
def _fused_forward_kernel(num_layers, x_ref, *refs):
    # refs layout: [W_ih_l, W_hh_l, b_l] * num_layers,
    #              hw1, hb1, hw2, hb2, hw3, hb3, out_ref
    lstm_refs = refs[:3 * num_layers]
    hw1_ref, hb1_ref, hw2_ref, hb2_ref, hw3_ref, hb3_ref = (
        refs[3 * num_layers:3 * num_layers + 6])
    out_ref = refs[-1]

    T = x_ref.shape[0]
    B = x_ref.shape[1]
    Hp = lstm_refs[1].shape[0]          # padded combined hidden width (3H -> 128)

    # Load all weights once; they live in VMEM/vregs for the whole kernel.
    weights = []
    for l in range(num_layers):
        weights.append((lstm_refs[3 * l][...],        # (D_in, 4*Hp)
                        lstm_refs[3 * l + 1][...],    # (Hp,   4*Hp)
                        lstm_refs[3 * l + 2][...]))   # (1,    4*Hp)

    def lstm_cell(x, h, c, w_ih, w_hh, b):
        gates = (jnp.dot(x, w_ih, preferred_element_type=jnp.float32)
                 + jnp.dot(h, w_hh, preferred_element_type=jnp.float32)
                 + b)                                   # (B, 4*Hp)
        # One full-width EUP pass; g-gate weights were pre-scaled by 2 so
        # tanh(pre) == 2*sigmoid(2*pre) - 1.
        s = jax.nn.sigmoid(gates)
        i_g = s[:, 0 * Hp:1 * Hp]
        f_g = s[:, 1 * Hp:2 * Hp]
        g_g = 2.0 * s[:, 2 * Hp:3 * Hp] - 1.0
        o_g = s[:, 3 * Hp:4 * Hp]
        c_new = f_g * c + i_g * g_g
        h_new = o_g * jnp.tanh(c_new)
        return h_new, c_new

    def step(t, carry):
        hs, cs = carry
        x = x_ref[t]                                    # (B, D_cat)
        new_hs, new_cs = [], []
        for l in range(num_layers):
            h_new, c_new = lstm_cell(x, hs[l], cs[l], *weights[l])
            new_hs.append(h_new)
            new_cs.append(c_new)
            x = h_new
        return tuple(new_hs), tuple(new_cs)

    zeros = jnp.zeros((B, Hp), jnp.float32)
    init = (tuple(zeros for _ in range(num_layers)),
            tuple(zeros for _ in range(num_layers)))
    hs, _ = jax.lax.fori_loop(0, T, step, init, unroll=True)
    h_last = hs[num_layers - 1]                         # (B, Hp), pad lanes == 0

    # MLP head: Linear -> ReLU -> Linear -> ReLU -> Linear (output padded to 128)
    a = jnp.maximum(
        jnp.dot(h_last, hw1_ref[...], preferred_element_type=jnp.float32)
        + hb1_ref[...], 0.0)
    a = jnp.maximum(
        jnp.dot(a, hw2_ref[...], preferred_element_type=jnp.float32)
        + hb2_ref[...], 0.0)
    out = (jnp.dot(a, hw3_ref[...], preferred_element_type=jnp.float32)
           + hb3_ref[...])
    out_ref[...] = out.astype(out_ref.dtype)


# ----------------------------------------------------------------------------
# One-time parameter preparation (transpose, fuse biases, block-diagonal merge,
# lane padding, tanh->sigmoid pre-scaling).  Called once, outside the forward.
# ----------------------------------------------------------------------------
def prepare_params(params, hidden_dim):
    H = hidden_dim
    streams = ("lstm_bert", "lstm_price", "lstm_sent")
    num_layers = len(params[streams[0]])
    Hp = ((3 * H + 127) // 128) * 128          # lane-aligned combined hidden width

    lstm_layers = []
    for l in range(num_layers):
        if l == 0:
            d_ins = [params[s][0][0].shape[1] for s in streams]
            D_in = sum(d_ins)
            row_offs = [0, d_ins[0], d_ins[0] + d_ins[1]]
        else:
            d_ins = [H, H, H]
            D_in = Hp
            row_offs = [0, H, 2 * H]

        W_ih = jnp.zeros((D_in, 4 * Hp), jnp.float32)
        W_hh = jnp.zeros((Hp, 4 * Hp), jnp.float32)
        b = jnp.zeros((4 * Hp,), jnp.float32)

        for s_idx, s in enumerate(streams):
            wih, whh, b_ih, b_hh = params[s][l]      # PyTorch shapes
            wih = jnp.asarray(wih, jnp.float32)      # (4H, d_in)
            whh = jnp.asarray(whh, jnp.float32)      # (4H, H)
            bias = jnp.asarray(b_ih + b_hh, jnp.float32)  # (4H,)
            d_in = d_ins[s_idx]
            r0 = row_offs[s_idx]
            for g_idx in range(4):                   # PyTorch gate order i, f, g, o
                col = g_idx * Hp + s_idx * H
                W_ih = W_ih.at[r0:r0 + d_in, col:col + H].set(
                    wih[g_idx * H:(g_idx + 1) * H, :].T)
                W_hh = W_hh.at[s_idx * H:(s_idx + 1) * H, col:col + H].set(
                    whh[g_idx * H:(g_idx + 1) * H, :].T)
                b = b.at[col:col + H].set(bias[g_idx * H:(g_idx + 1) * H])

        # Pre-scale the g-gate block by 2 so tanh(x) = 2*sigmoid(2x) - 1.
        W_ih = W_ih.at[:, 2 * Hp:3 * Hp].multiply(2.0)
        W_hh = W_hh.at[:, 2 * Hp:3 * Hp].multiply(2.0)
        b = b.at[2 * Hp:3 * Hp].multiply(2.0)

        lstm_layers.append((W_ih, W_hh, b[None, :]))

    # Head: w.T / b[None,:], first linear padded to Hp input rows, last linear
    # padded to 128 output lanes (lane-dense store).
    (w1, b1), (w2, b2), (w3, b3) = params["head"]
    hw1 = jnp.zeros((Hp, w1.shape[0]), jnp.float32).at[:3 * H, :].set(
        jnp.asarray(w1, jnp.float32).T)
    hb1 = jnp.asarray(b1, jnp.float32)[None, :]
    hw2 = jnp.asarray(w2, jnp.float32).T
    hb2 = jnp.asarray(b2, jnp.float32)[None, :]
    out_pad = 128
    hw3 = jnp.zeros((w3.shape[1], out_pad), jnp.float32).at[:, :w3.shape[0]].set(
        jnp.asarray(w3, jnp.float32).T)
    hb3 = jnp.zeros((1, out_pad), jnp.float32).at[:, :w3.shape[0]].set(
        jnp.asarray(b3, jnp.float32)[None, :])

    return {"lstm": lstm_layers, "head": (hw1, hb1, hw2, hb2, hw3, hb3)}


# ----------------------------------------------------------------------------
# Full forward (single pallas_call).
# ----------------------------------------------------------------------------
def stock_predictor_sent_forward(prepared, bert_x, price_x, sent_x):
    x_cat = jnp.concatenate(
        [bert_x.astype(jnp.float32),
         price_x.astype(jnp.float32),
         sent_x.astype(jnp.float32)], axis=-1)     # (B, T, D_cat)
    x_tm = jnp.swapaxes(x_cat, 0, 1)               # (T, B, D_cat) time-major
    B = x_tm.shape[1]

    lstm = prepared["lstm"]
    head = prepared["head"]
    num_layers = len(lstm)

    args = [x_tm]
    for (w_ih, w_hh, b) in lstm:
        args.extend((w_ih, w_hh, b))
    args.extend(head)

    vmem = pl.BlockSpec(memory_space=pltpu.MemorySpace.VMEM)
    out_pad = pl.pallas_call(
        functools.partial(_fused_forward_kernel, num_layers),
        out_shape=jax.ShapeDtypeStruct((B, head[-1].shape[-1]), jnp.float32),
        in_specs=[vmem] * len(args),
        out_specs=vmem,
    )(*args)
    # Original module's last Linear has out_features=1.
    return out_pad[:, :1]


forward_jit = jax.jit(stock_predictor_sent_forward)


# ----------------------------------------------------------------------------
# Deterministic parameter construction (PyTorch-shaped weights).
# ----------------------------------------------------------------------------
def init_lstm_params(key, input_dim, hidden_dim, num_layers):
    layers = []
    scale = 1.0 / jnp.sqrt(hidden_dim)
    for l in range(num_layers):
        d_in = input_dim if l == 0 else hidden_dim
        key, k1, k2, k3, k4 = jax.random.split(key, 5)
        wih = jax.random.uniform(k1, (4 * hidden_dim, d_in), jnp.float32,
                                 -scale, scale)
        whh = jax.random.uniform(k2, (4 * hidden_dim, hidden_dim), jnp.float32,
                                 -scale, scale)
        b_ih = jax.random.uniform(k3, (4 * hidden_dim,), jnp.float32, -scale, scale)
        b_hh = jax.random.uniform(k4, (4 * hidden_dim,), jnp.float32, -scale, scale)
        layers.append((wih, whh, b_ih, b_hh))
    return key, layers


def init_params(key, embedding_dim, price_dim, sent_dim, hidden_dim, num_layers):
    key, lstm_bert = init_lstm_params(key, embedding_dim, hidden_dim, num_layers)
    key, lstm_price = init_lstm_params(key, price_dim, hidden_dim, num_layers)
    key, lstm_sent = init_lstm_params(key, sent_dim, hidden_dim, num_layers)

    def linear(key, d_in, d_out):
        s = 1.0 / jnp.sqrt(d_in)
        key, kw, kb = jax.random.split(key, 3)
        w = jax.random.uniform(kw, (d_out, d_in), jnp.float32, -s, s)
        b = jax.random.uniform(kb, (d_out,), jnp.float32, -s, s)
        return key, (w, b)

    key, l1 = linear(key, hidden_dim * 3, 64)
    key, l2 = linear(key, 64, 32)
    key, l3 = linear(key, 32, 1)
    return {
        "lstm_bert": lstm_bert,
        "lstm_price": lstm_price,
        "lstm_sent": lstm_sent,
        "head": [l1, l2, l3],
    }


# ----------------------------------------------------------------------------
# Pure-JAX reference (correctness check against the fused Pallas kernel).
# ----------------------------------------------------------------------------
def ref_lstm(x_bt, layers):
    h_seq = x_bt
    for (wih, whh, b_ih, b_hh) in layers:
        H = whh.shape[1]
        B = h_seq.shape[0]

        def step(carry, xt, wih=wih, whh=whh, b_ih=b_ih, b_hh=b_hh, H=H):
            h, c = carry
            gates = xt @ wih.T + h @ whh.T + b_ih + b_hh
            i = jax.nn.sigmoid(gates[:, 0 * H:1 * H])
            f = jax.nn.sigmoid(gates[:, 1 * H:2 * H])
            g = jnp.tanh(gates[:, 2 * H:3 * H])
            o = jax.nn.sigmoid(gates[:, 3 * H:4 * H])
            c = f * c + i * g
            h = o * jnp.tanh(c)
            return (h, c), h

        init = (jnp.zeros((B, H), jnp.float32), jnp.zeros((B, H), jnp.float32))
        _, hs = jax.lax.scan(step, init, jnp.swapaxes(h_seq, 0, 1))
        h_seq = jnp.swapaxes(hs, 0, 1)
    return h_seq


def ref_forward(params, bert_x, price_x, sent_x):
    ob = ref_lstm(bert_x, params["lstm_bert"])[:, -1, :]
    op = ref_lstm(price_x, params["lstm_price"])[:, -1, :]
    os_ = ref_lstm(sent_x, params["lstm_sent"])[:, -1, :]
    x = jnp.concatenate([ob, op, os_], axis=1)
    (w1, b1), (w2, b2), (w3, b3) = params["head"]
    x = jnp.maximum(x @ w1.T + b1, 0.0)
    x = jnp.maximum(x @ w2.T + b2, 0.0)
    return x @ w3.T + b3


# ----------------------------------------------------------------------------
if __name__ == "__main__":
    B, T = 2, 8
    embedding_dim, price_dim, sent_dim = 16, 4, 2
    hidden_dim, num_layers = 32, 2

    key = jax.random.PRNGKey(0)
    key, kp, kb, kpr, ks = jax.random.split(key, 5)
    params = init_params(kp, embedding_dim, price_dim, sent_dim,
                         hidden_dim, num_layers)
    prepared = prepare_params(params, hidden_dim)

    bert_x = jax.random.normal(kb, (B, T, embedding_dim), jnp.float32)
    price_x = jax.random.normal(kpr, (B, T, price_dim), jnp.float32)
    sent_x = jax.random.normal(ks, (B, T, sent_dim), jnp.float32)

    out = forward_jit(prepared, bert_x, price_x, sent_x)
    out = jax.block_until_ready(out)

    ref = ref_forward(params, bert_x, price_x, sent_x)
    assert out.shape == (B, 1), out.shape
    assert jnp.allclose(out, ref, atol=1e-4, rtol=1e-4), (out, ref)

    print("KERNEL_OK")
</pallas_src>

<mosaic_0001>
module attributes {stable_mosaic.version = 11 : i64} {
  func.func @_fused_forward_kernel(%arg0: memref<8x2x22xf32, #tpu.memory_space<vmem>>, %arg1: memref<22x512xf32, #tpu.memory_space<vmem>>, %arg2: memref<128x512xf32, #tpu.memory_space<vmem>>, %arg3: memref<1x512xf32, #tpu.memory_space<vmem>>, %arg4: memref<128x512xf32, #tpu.memory_space<vmem>>, %arg5: memref<128x512xf32, #tpu.memory_space<vmem>>, %arg6: memref<1x512xf32, #tpu.memory_space<vmem>>, %arg7: memref<128x64xf32, #tpu.memory_space<vmem>>, %arg8: memref<1x64xf32, #tpu.memory_space<vmem>>, %arg9: memref<64x32xf32, #tpu.memory_space<vmem>>, %arg10: memref<1x32xf32, #tpu.memory_space<vmem>>, %arg11: memref<32x128xf32, #tpu.memory_space<vmem>>, %arg12: memref<1x128xf32, #tpu.memory_space<vmem>>, %arg13: memref<2x128xf32, #tpu.memory_space<vmem>>) attributes {dimension_semantics = [], scalar_prefetch = 0 : i64, scratch_operands = 0 : i64, tpu.core_type = #tpu.core_type<tc>} {
    %c0 = arith.constant 0 : index
    %c0_0 = arith.constant 0 : index
    %0 = vector.load %arg1[%c0, %c0_0] : memref<22x512xf32, #tpu.memory_space<vmem>>, vector<22x512xf32>
    %c0_1 = arith.constant 0 : index
    %c0_2 = arith.constant 0 : index
    %1 = vector.load %arg2[%c0_1, %c0_2] : memref<128x512xf32, #tpu.memory_space<vmem>>, vector<128x512xf32>
    %c0_3 = arith.constant 0 : index
    %c0_4 = arith.constant 0 : index
    %2 = vector.load %arg3[%c0_3, %c0_4] : memref<1x512xf32, #tpu.memory_space<vmem>>, vector<1x512xf32>
    %c0_5 = arith.constant 0 : index
    %c0_6 = arith.constant 0 : index
    %3 = vector.load %arg4[%c0_5, %c0_6] : memref<128x512xf32, #tpu.memory_space<vmem>>, vector<128x512xf32>
    %c0_7 = arith.constant 0 : index
    %c0_8 = arith.constant 0 : index
    %4 = vector.load %arg5[%c0_7, %c0_8] : memref<128x512xf32, #tpu.memory_space<vmem>>, vector<128x512xf32>
    %c0_9 = arith.constant 0 : index
    %c0_10 = arith.constant 0 : index
    %5 = vector.load %arg6[%c0_9, %c0_10] : memref<1x512xf32, #tpu.memory_space<vmem>>, vector<1x512xf32>
    %cst = arith.constant 0.000000e+00 : f32
    %6 = vector.broadcast %cst : f32 to vector<2x128xf32>
    %c0_i32 = arith.constant 0 : i32
    %7 = arith.index_cast %c0_i32 : i32 to index
    %c0_11 = arith.constant 0 : index
    %c0_12 = arith.constant 0 : index
    %8 = vector.load %arg0[%7, %c0_11, %c0_12] : memref<8x2x22xf32, #tpu.memory_space<vmem>>, vector<1x2x22xf32>
    %9 = vector.shape_cast %8 : vector<1x2x22xf32> to vector<2x22xf32>
    %cst_13 = arith.constant dense<0.000000e+00> : vector<2x512xf32>
    %10 = tpu.matmul %9, %0, %cst_13 {dimension_numbers = #tpu.dot_dimension_numbers<[1], [0], [0], [1], [0, 0, 1, 1], [], []>} : vector<2x22xf32>, vector<22x512xf32>, vector<2x512xf32> -> vector<2x512xf32>
    %cst_14 = arith.constant dense<0.000000e+00> : vector<2x512xf32>
    %11 = tpu.matmul %6, %1, %cst_14 {dimension_numbers = #tpu.dot_dimension_numbers<[1], [0], [0], [1], [0, 0, 1, 1], [], []>} : vector<2x128xf32>, vector<128x512xf32>, vector<2x512xf32> -> vector<2x512xf32>
    %12 = arith.addf %10, %11 : vector<2x512xf32>
    %13 = vector.broadcast %2 : vector<1x512xf32> to vector<2x512xf32>
    %14 = arith.addf %12, %13 : vector<2x512xf32>
    %15 = arith.negf %14 : vector<2x512xf32>
    %16 = math.exp %15 : vector<2x512xf32>
    %cst_15 = arith.constant 1.000000e+00 : f32
    %17 = vector.broadcast %cst_15 : f32 to vector<2x512xf32>
    %18 = arith.addf %17, %16 : vector<2x512xf32>
    %19 = arith.divf %17, %18 : vector<2x512xf32>
    %20 = vector.extract_strided_slice %19 {offsets = [0, 0], sizes = [2, 128], strides = [1, 1]} : vector<2x512xf32> to vector<2x128xf32>
    %21 = vector.extract_strided_slice %19 {offsets = [0, 128], sizes = [2, 128], strides = [1, 1]} : vector<2x512xf32> to vector<2x128xf32>
    %22 = vector.extract_strided_slice %19 {offsets = [0, 256], sizes = [2, 128], strides = [1, 1]} : vector<2x512xf32> to vector<2x128xf32>
    %cst_16 = arith.constant 2.000000e+00 : f32
    %23 = vector.broadcast %cst_16 : f32 to vector<2x128xf32>
    %24 = arith.mulf %23, %22 : vector<2x128xf32>
    %cst_17 = arith.constant 1.000000e+00 : f32
    %25 = vector.broadcast %cst_17 : f32 to vector<2x128xf32>
    %26 = arith.subf %24, %25 : vector<2x128xf32>
    %27 = vector.extract_strided_slice %19 {offsets = [0, 384], sizes = [2, 128], strides = [1, 1]} : vector<2x512xf32> to vector<2x128xf32>
    %28 = arith.mulf %21, %6 : vector<2x128xf32>
    %29 = arith.mulf %20, %26 : vector<2x128xf32>
    %30 = arith.addf %28, %29 : vector<2x128xf32>
    %31 = math.tanh %30 : vector<2x128xf32>
    %32 = arith.mulf %27, %31 : vector<2x128xf32>
    %cst_18 = arith.constant dense<0.000000e+00> : vector<2x512xf32>
    %33 = tpu.matmul %32, %3, %cst_18 {dimension_numbers = #tpu.dot_dimension_numbers<[1], [0], [0], [1], [0, 0, 1, 1], [], []>} : vector<2x128xf32>, vector<128x512xf32>, vector<2x512xf32> -> vector<2x512xf32>
    %cst_19 = arith.constant dense<0.000000e+00> : vector<2x512xf32>
    %34 = tpu.matmul %6, %4, %cst_19 {dimension_numbers = #tpu.dot_dimension_numbers<[1], [0], [0], [1], [0, 0, 1, 1], [], []>} : vector<2x128xf32>, vector<128x512xf32>, vector<2x512xf32> -> vector<2x512xf32>
    %35 = arith.addf %33, %34 : vector<2x512xf32>
    %36 = vector.broadcast %5 : vector<1x512xf32> to vector<2x512xf32>
    %37 = arith.addf %35, %36 : vector<2x512xf32>
    %38 = arith.negf %37 : vector<2x512xf32>
    %39 = math.exp %38 : vector<2x512xf32>
    %cst_20 = arith.constant 1.000000e+00 : f32
    %40 = vector.broadcast %cst_20 : f32 to vector<2x512xf32>
    %41 = arith.addf %40, %39 : vector<2x512xf32>
    %42 = arith.divf %40, %41 : vector<2x512xf32>
    %43 = vector.extract_strided_slice %42 {offsets = [0, 0], sizes = [2, 128], strides = [1, 1]} : vector<2x512xf32> to vector<2x128xf32>
    %44 = vector.extract_strided_slice %42 {offsets = [0, 128], sizes = [2, 128], strides = [1, 1]} : vector<2x512xf32> to vector<2x128xf32>
    %45 = vector.extract_strided_slice %42 {offsets = [0, 256], sizes = [2, 128], strides = [1, 1]} : vector<2x512xf32> to vector<2x128xf32>
    %cst_21 = arith.constant 2.000000e+00 : f32
    %46 = vector.broadcast %cst_21 : f32 to vector<2x128xf32>
    %47 = arith.mulf %46, %45 : vector<2x128xf32>
    %cst_22 = arith.constant 1.000000e+00 : f32
    %48 = vector.broadcast %cst_22 : f32 to vector<2x128xf32>
    %49 = arith.subf %47, %48 : vector<2x128xf32>
    %50 = vector.extract_strided_slice %42 {offsets = [0, 384], sizes = [2, 128], strides = [1, 1]} : vector<2x512xf32> to vector<2x128xf32>
    %51 = arith.mulf %44, %6 : vector<2x128xf32>
    %52 = arith.mulf %43, %49 : vector<2x128xf32>
    %53 = arith.addf %51, %52 : vector<2x128xf32>
    %54 = math.tanh %53 : vector<2x128xf32>
    %55 = arith.mulf %50, %54 : vector<2x128xf32>
    %c1_i32 = arith.constant 1 : i32
    %56 = arith.index_cast %c1_i32 : i32 to index
    %c0_23 = arith.constant 0 : index
    %c0_24 = arith.constant 0 : index
    %57 = vector.load %arg0[%56, %c0_23, %c0_24] : memref<8x2x22xf32, #tpu.memory_space<vmem>>, vector<1x2x22xf32>
    %58 = vector.shape_cast %57 : vector<1x2x22xf32> to vector<2x22xf32>
    %cst_25 = arith.constant dense<0.000000e+00> : vector<2x512xf32>
    %59 = tpu.matmul %58, %0, %cst_25 {dimension_numbers = #tpu.dot_dimension_numbers<[1], [0], [0], [1], [0, 0, 1, 1], [], []>} : vector<2x22xf32>, vector<22x512xf32>, vector<2x512xf32> -> vector<2x512xf32>
    %cst_26 = arith.constant dense<0.000000e+00> : vector<2x512xf32>
    %60 = tpu.matmul %32, %1, %cst_26 {dimension_numbers = #tpu.dot_dimension_numbers<[1], [0], [0], [1], [0, 0, 1, 1], [], []>} : vector<2x128xf32>, vector<128x512xf32>, vector<2x512xf32> -> vector<2x512xf32>
    %61 = arith.addf %59, %60 : vector<2x512xf32>
    %62 = vector.broadcast %2 : vector<1x512xf32> to vector<2x512xf32>
    %63 = arith.addf %61, %62 : vector<2x512xf32>
    %64 = arith.negf %63 : vector<2x512xf32>
    %65 = math.exp %64 : vector<2x512xf32>
    %cst_27 = arith.constant 1.000000e+00 : f32
    %66 = vector.broadcast %cst_27 : f32 to vector<2x512xf32>
    %67 = arith.addf %66, %65 : vector<2x512xf32>
    %68 = arith.divf %66, %67 : vector<2x512xf32>
    %69 = vector.extract_strided_slice %68 {offsets = [0, 0], sizes = [2, 128], strides = [1, 1]} : vector<2x512xf32> to vector<2x128xf32>
    %70 = vector.extract_strided_slice %68 {offsets = [0, 128], sizes = [2, 128], strides = [1, 1]} : vector<2x512xf32> to vector<2x128xf32>
    %71 = vector.extract_strided_slice %68 {offsets = [0, 256], sizes = [2, 128], strides = [1, 1]} : vector<2x512xf32> to vector<2x128xf32>
    %cst_28 = arith.constant 2.000000e+00 : f32
    %72 = vector.broadcast %cst_28 : f32 to vector<2x128xf32>
    %73 = arith.mulf %72, %71 : vector<2x128xf32>
    %cst_29 = arith.constant 1.000000e+00 : f32
    %74 = vector.broadcast %cst_29 : f32 to vector<2x128xf32>
    %75 = arith.subf %73, %74 : vector<2x128xf32>
    %76 = vector.extract_strided_slice %68 {offsets = [0, 384], sizes = [2, 128], strides = [1, 1]} : vector<2x512xf32> to vector<2x128xf32>
    %77 = arith.mulf %70, %30 : vector<2x128xf32>
    %78 = arith.mulf %69, %75 : vector<2x128xf32>
    %79 = arith.addf %77, %78 : vector<2x128xf32>
    %80 = math.tanh %79 : vector<2x128xf32>
    %81 = arith.mulf %76, %80 : vector<2x128xf32>
    %cst_30 = arith.constant dense<0.000000e+00> : vector<2x512xf32>
    %82 = tpu.matmul %81, %3, %cst_30 {dimension_numbers = #tpu.dot_dimension_numbers<[1], [0], [0], [1], [0, 0, 1, 1], [], []>} : vector<2x128xf32>, vector<128x512xf32>, vector<2x512xf32> -> vector<2x512xf32>
    %cst_31 = arith.constant dense<0.000000e+00> : vector<2x512xf32>
    %83 = tpu.matmul %55, %4, %cst_31 {dimension_numbers = #tpu.dot_dimension_numbers<[1], [0], [0], [1], [0, 0, 1, 1], [], []>} : vector<2x128xf32>, vector<128x512xf32>, vector<2x512xf32> -> vector<2x512xf32>
    %84 = arith.addf %82, %83 : vector<2x512xf32>
    %85 = vector.broadcast %5 : vector<1x512xf32> to vector<2x512xf32>
    %86 = arith.addf %84, %85 : vector<2x512xf32>
    %87 = arith.negf %86 : vector<2x512xf32>
    %88 = math.exp %87 : vector<2x512xf32>
    %cst_32 = arith.constant 1.000000e+00 : f32
    %89 = vector.broadcast %cst_32 : f32 to vector<2x512xf32>
    %90 = arith.addf %89, %88 : vector<2x512xf32>
    %91 = arith.divf %89, %90 : vector<2x512xf32>
    %92 = vector.extract_strided_slice %91 {offsets = [0, 0], sizes = [2, 128], strides = [1, 1]} : vector<2x512xf32> to vector<2x128xf32>
    %93 = vector.extract_strided_slice %91 {offsets = [0, 128], sizes = [2, 128], strides = [1, 1]} : vector<2x512xf32> to vector<2x128xf32>
    %94 = vector.extract_strided_slice %91 {offsets = [0, 256], sizes = [2, 128], strides = [1, 1]} : vector<2x512xf32> to vector<2x128xf32>
    %cst_33 = arith.constant 2.000000e+00 : f32
    %95 = vector.broadcast %cst_33 : f32 to vector<2x128xf32>
    %96 = arith.mulf %95, %94 : vector<2x128xf32>
    %cst_34 = arith.constant 1.000000e+00 : f32
    %97 = vector.broadcast %cst_34 : f32 to vector<2x128xf32>
    %98 = arith.subf %96, %97 : vector<2x128xf32>
    %99 = vector.extract_strided_slice %91 {offsets = [0, 384], sizes = [2, 128], strides = [1, 1]} : vector<2x512xf32> to vector<2x128xf32>
    %100 = arith.mulf %93, %53 : vector<2x128xf32>
    %101 = arith.mulf %92, %98 : vector<2x128xf32>
    %102 = arith.addf %100, %101 : vector<2x128xf32>
    %103 = math.tanh %102 : vector<2x128xf32>
    %104 = arith.mulf %99, %103 : vector<2x128xf32>
    %c2_i32 = arith.constant 2 : i32
    %105 = arith.index_cast %c2_i32 : i32 to index
    %c0_35 = arith.constant 0 : index
    %c0_36 = arith.constant 0 : index
    %106 = vector.load %arg0[%105, %c0_35, %c0_36] : memref<8x2x22xf32, #tpu.memory_space<vmem>>, vector<1x2x22xf32>
    %107 = vector.shape_cast %106 : vector<1x2x22xf32> to vector<2x22xf32>
    %cst_37 = arith.constant dense<0.000000e+00> : vector<2x512xf32>
    %108 = tpu.matmul %107, %0, %cst_37 {dimension_numbers = #tpu.dot_dimension_numbers<[1], [0], [0], [1], [0, 0, 1, 1], [], []>} : vector<2x22xf32>, vector<22x512xf32>, vector<2x512xf32> -> vector<2x512xf32>
    %cst_38 = arith.constant dense<0.000000e+00> : vector<2x512xf32>
    %109 = tpu.matmul %81, %1, %cst_38 {dimension_numbers = #tpu.dot_dimension_numbers<[1], [0], [0], [1], [0, 0, 1, 1], [], []>} : vector<2x128xf32>, vector<128x512xf32>, vector<2x512xf32> -> vector<2x512xf32>
    %110 = arith.addf %108, %109 : vector<2x512xf32>
    %111 = vector.broadcast %2 : vector<1x512xf32> to vector<2x512xf32>
    %112 = arith.addf %110, %111 : vector<2x512xf32>
    %113 = arith.negf %112 : vector<2x512xf32>
    %114 = math.exp %113 : vector<2x512xf32>
    %cst_39 = arith.constant 1.000000e+00 : f32
    %115 = vector.broadcast %cst_39 : f32 to vector<2x512xf32>
    %116 = arith.addf %115, %114 : vector<2x512xf32>
    %117 = arith.divf %115, %116 : vector<2x512xf32>
    %118 = vector.extract_strided_slice %117 {offsets = [0, 0], sizes = [2, 128], strides = [1, 1]} : vector<2x512xf32> to vector<2x128xf32>
    %119 = vector.extract_strided_slice %117 {offsets = [0, 128], sizes = [2, 128], strides = [1, 1]} : vector<2x512xf32> to vector<2x128xf32>
    %120 = vector.extract_strided_slice %117 {offsets = [0, 256], sizes = [2, 128], strides = [1, 1]} : vector<2x512xf32> to vector<2x128xf32>
    %cst_40 = arith.constant 2.000000e+00 : f32
    %121 = vector.broadcast %cst_40 : f32 to vector<2x128xf32>
    %122 = arith.mulf %121, %120 : vector<2x128xf32>
    %cst_41 = arith.constant 1.000000e+00 : f32
    %123 = vector.broadcast %cst_41 : f32 to vector<2x128xf32>
    %124 = arith.subf %122, %123 : vector<2x128xf32>
    %125 = vector.extract_strided_slice %117 {offsets = [0, 384], sizes = [2, 128], strides = [1, 1]} : vector<2x512xf32> to vector<2x128xf32>
    %126 = arith.mulf %119, %79 : vector<2x128xf32>
    %127 = arith.mulf %118, %124 : vector<2x128xf32>
    %128 = arith.addf %126, %127 : vector<2x128xf32>
    %129 = math.tanh %128 : vector<2x128xf32>
    %130 = arith.mulf %125, %129 : vector<2x128xf32>
    %cst_42 = arith.constant dense<0.000000e+00> : vector<2x512xf32>
    %131 = tpu.matmul %130, %3, %cst_42 {dimension_numbers = #tpu.dot_dimension_numbers<[1], [0], [0], [1], [0, 0, 1, 1], [], []>} : vector<2x128xf32>, vector<128x512xf32>, vector<2x512xf32> -> vector<2x512xf32>
    %cst_43 = arith.constant dense<0.000000e+00> : vector<2x512xf32>
    %132 = tpu.matmul %104, %4, %cst_43 {dimension_numbers = #tpu.dot_dimension_numbers<[1], [0], [0], [1], [0, 0, 1, 1], [], []>} : vector<2x128xf32>, vector<128x512xf32>, vector<2x512xf32> -> vector<2x512xf32>
    %133 = arith.addf %131, %132 : vector<2x512xf32>
    %134 = vector.broadcast %5 : vector<1x512xf32> to vector<2x512xf32>
    %135 = arith.addf %133, %134 : vector<2x512xf32>
    %136 = arith.negf %135 : vector<2x512xf32>
    %137 = math.exp %136 : vector<2x512xf32>
    %cst_44 = arith.constant 1.000000e+00 : f32
    %138 = vector.broadcast %cst_44 : f32 to vector<2x512xf32>
    %139 = arith.addf %138, %137 : vector<2x512xf32>
    %140 = arith.divf %138, %139 : vector<2x512xf32>
    %141 = vector.extract_strided_slice %140 {offsets = [0, 0], sizes = [2, 128], strides = [1, 1]} : vector<2x512xf32> to vector<2x128xf32>
    %142 = vector.extract_strided_slice %140 {offsets = [0, 128], sizes = [2, 128], strides = [1, 1]} : vector<2x512xf32> to vector<2x128xf32>
    %143 = vector.extract_strided_slice %140 {offsets = [0, 256], sizes = [2, 128], strides = [1, 1]} : vector<2x512xf32> to vector<2x128xf32>
    %cst_45 = arith.constant 2.000000e+00 : f32
    %144 = vector.broadcast %cst_45 : f32 to vector<2x128xf32>
    %145 = arith.mulf %144, %143 : vector<2x128xf32>
    %cst_46 = arith.constant 1.000000e+00 : f32
    %146 = vector.broadcast %cst_46 : f32 to vector<2x128xf32>
    %147 = arith.subf %145, %146 : vector<2x128xf32>
    %148 = vector.extract_strided_slice %140 {offsets = [0, 384], sizes = [2, 128], strides = [1, 1]} : vector<2x512xf32> to vector<2x128xf32>
    %149 = arith.mulf %142, %102 : vector<2x128xf32>
    %150 = arith.mulf %141, %147 : vector<2x128xf32>
    %151 = arith.addf %149, %150 : vector<2x128xf32>
    %152 = math.tanh %151 : vector<2x128xf32>
    %153 = arith.mulf %148, %152 : vector<2x128xf32>
    %c3_i32 = arith.constant 3 : i32
    %154 = arith.index_cast %c3_i32 : i32 to index
    %c0_47 = arith.constant 0 : index
    %c0_48 = arith.constant 0 : index
    %155 = vector.load %arg0[%154, %c0_47, %c0_48] : memref<8x2x22xf32, #tpu.memory_space<vmem>>, vector<1x2x22xf32>
    %156 = vector.shape_cast %155 : vector<1x2x22xf32> to vector<2x22xf32>
    %cst_49 = arith.constant dense<0.000000e+00> : vector<2x512xf32>
    %157 = tpu.matmul %156, %0, %cst_49 {dimension_numbers = #tpu.dot_dimension_numbers<[1], [0], [0], [1], [0, 0, 1, 1], [], []>} : vector<2x22xf32>, vector<22x512xf32>, vector<2x512xf32> -> vector<2x512xf32>
    %cst_50 = arith.constant dense<0.000000e+00> : vector<2x512xf32>
    %158 = tpu.matmul %130, %1, %cst_50 {dimension_numbers = #tpu.dot_dimension_numbers<[1], [0], [0], [1], [0, 0, 1, 1], [], []>} : vector<2x128xf32>, vector<128x512xf32>, vector<2x512xf32> -> vector<2x512xf32>
    %159 = arith.addf %157, %158 : vector<2x512xf32>
    %160 = vector.broadcast %2 : vector<1x512xf32> to vector<2x512xf32>
    %161 = arith.addf %159, %160 : vector<2x512xf32>
    %162 = arith.negf %161 : vector<2x512xf32>
    %163 = math.exp %162 : vector<2x512xf32>
    %cst_51 = arith.constant 1.000000e+00 : f32
    %164 = vector.broadcast %cst_51 : f32 to vector<2x512xf32>
    %165 = arith.addf %164, %163 : vector<2x512xf32>
    %166 = arith.divf %164, %165 : vector<2x512xf32>
    %167 = vector.extract_strided_slice %166 {offsets = [0, 0], sizes = [2, 128], strides = [1, 1]} : vector<2x512xf32> to vector<2x128xf32>
    %168 = vector.extract_strided_slice %166 {offsets = [0, 128], sizes = [2, 128], strides = [1, 1]} : vector<2x512xf32> to vector<2x128xf32>
    %169 = vector.extract_strided_slice %166 {offsets = [0, 256], sizes = [2, 128], strides = [1, 1]} : vector<2x512xf32> to vector<2x128xf32>
    %cst_52 = arith.constant 2.000000e+00 : f32
    %170 = vector.broadcast %cst_52 : f32 to vector<2x128xf32>
    %171 = arith.mulf %170, %169 : vector<2x128xf32>
    %cst_53 = arith.constant 1.000000e+00 : f32
    %172 = vector.broadcast %cst_53 : f32 to vector<2x128xf32>
    %173 = arith.subf %171, %172 : vector<2x128xf32>
    %174 = vector.extract_strided_slice %166 {offsets = [0, 384], sizes = [2, 128], strides = [1, 1]} : vector<2x512xf32> to vector<2x128xf32>
    %175 = arith.mulf %168, %128 : vector<2x128xf32>
    %176 = arith.mulf %167, %173 : vector<2x128xf32>
    %177 = arith.addf %175, %176 : vector<2x128xf32>
    %178 = math.tanh %177 : vector<2x128xf32>
    %179 = arith.mulf %174, %178 : vector<2x128xf32>
    %cst_54 = arith.constant dense<0.000000e+00> : vector<2x512xf32>
    %180 = tpu.matmul %179, %3, %cst_54 {dimension_numbers = #tpu.dot_dimension_numbers<[1], [0], [0], [1], [0, 0, 1, 1], [], []>} : vector<2x128xf32>, vector<128x512xf32>, vector<2x512xf32> -> vector<2x512xf32>
    %cst_55 = arith.constant dense<0.000000e+00> : vector<2x512xf32>
    %181 = tpu.matmul %153, %4, %cst_55 {dimension_numbers = #tpu.dot_dimension_numbers<[1], [0], [0], [1], [0, 0, 1, 1], [], []>} : vector<2x128xf32>, vector<128x512xf32>, vector<2x512xf32> -> vector<2x512xf32>
    %182 = arith.addf %180, %181 : vector<2x512xf32>
    %183 = vector.broadcast %5 : vector<1x512xf32> to vector<2x512xf32>
    %184 = arith.addf %182, %183 : vector<2x512xf32>
    %185 = arith.negf %184 : vector<2x512xf32>
    %186 = math.exp %185 : vector<2x512xf32>
    %cst_56 = arith.constant 1.000000e+00 : f32
    %187 = vector.broadcast %cst_56 : f32 to vector<2x512xf32>
    %188 = arith.addf %187, %186 : vector<2x512xf32>
    %189 = arith.divf %187, %188 : vector<2x512xf32>
    %190 = vector.extract_strided_slice %189 {offsets = [0, 0], sizes = [2, 128], strides = [1, 1]} : vector<2x512xf32> to vector<2x128xf32>
    %191 = vector.extract_strided_slice %189 {offsets = [0, 128], sizes = [2, 128], strides = [1, 1]} : vector<2x512xf32> to vector<2x128xf32>
    %192 = vector.extract_strided_slice %189 {offsets = [0, 256], sizes = [2, 128], strides = [1, 1]} : vector<2x512xf32> to vector<2x128xf32>
    %cst_57 = arith.constant 2.000000e+00 : f32
    %193 = vector.broadcast %cst_57 : f32 to vector<2x128xf32>
    %194 = arith.mulf %193, %192 : vector<2x128xf32>
    %cst_58 = arith.constant 1.000000e+00 : f32
    %195 = vector.broadcast %cst_58 : f32 to vector<2x128xf32>
    %196 = arith.subf %194, %195 : vector<2x128xf32>
    %197 = vector.extract_strided_slice %189 {offsets = [0, 384], sizes = [2, 128], strides = [1, 1]} : vector<2x512xf32> to vector<2x128xf32>
    %198 = arith.mulf %191, %151 : vector<2x128xf32>
    %199 = arith.mulf %190, %196 : vector<2x128xf32>
    %200 = arith.addf %198, %199 : vector<2x128xf32>
    %201 = math.tanh %200 : vector<2x128xf32>
    %202 = arith.mulf %197, %201 : vector<2x128xf32>
    %c4_i32 = arith.constant 4 : i32
    %203 = arith.index_cast %c4_i32 : i32 to index
    %c0_59 = arith.constant 0 : index
    %c0_60 = arith.constant 0 : index
    %204 = vector.load %arg0[%203, %c0_59, %c0_60] : memref<8x2x22xf32, #tpu.memory_space<vmem>>, vector<1x2x22xf32>
    %205 = vector.shape_cast %204 : vector<1x2x22xf32> to vector<2x22xf32>
    %cst_61 = arith.constant dense<0.000000e+00> : vector<2x512xf32>
    %206 = tpu.matmul %205, %0, %cst_61 {dimension_numbers = #tpu.dot_dimension_numbers<[1], [0], [0], [1], [0, 0, 1, 1], [], []>} : vector<2x22xf32>, vector<22x512xf32>, vector<2x512xf32> -> vector<2x512xf32>
    %cst_62 = arith.constant dense<0.000000e+00> : vector<2x512xf32>
    %207 = tpu.matmul %179, %1, %cst_62 {dimension_numbers = #tpu.dot_dimension_numbers<[1], [0], [0], [1], [0, 0, 1, 1], [], []>} : vector<2x128xf32>, vector<128x512xf32>, vector<2x512xf32> -> vector<2x512xf32>
    %208 = arith.addf %206, %207 : vector<2x512xf32>
    %209 = vector.broadcast %2 : vector<1x512xf32> to vector<2x512xf32>
    %210 = arith.addf %208, %209 : vector<2x512xf32>
    %211 = arith.negf %210 : vector<2x512xf32>
    %212 = math.exp %211 : vector<2x512xf32>
    %cst_63 = arith.constant 1.000000e+00 : f32
    %213 = vector.broadcast %cst_63 : f32 to vector<2x512xf32>
    %214 = arith.addf %213, %212 : vector<2x512xf32>
    %215 = arith.divf %213, %214 : vector<2x512xf32>
    %216 = vector.extract_strided_slice %215 {offsets = [0, 0], sizes = [2, 128], strides = [1, 1]} : vector<2x512xf32> to vector<2x128xf32>
    %217 = vector.extract_strided_slice %215 {offsets = [0, 128], sizes = [2, 128], strides = [1, 1]} : vector<2x512xf32> to vector<2x128xf32>
    %218 = vector.extract_strided_slice %215 {offsets = [0, 256], sizes = [2, 128], strides = [1, 1]} : vector<2x512xf32> to vector<2x128xf32>
    %cst_64 = arith.constant 2.000000e+00 : f32
    %219 = vector.broadcast %cst_64 : f32 to vector<2x128xf32>
    %220 = arith.mulf %219, %218 : vector<2x128xf32>
    %cst_65 = arith.constant 1.000000e+00 : f32
    %221 = vector.broadcast %cst_65 : f32 to vector<2x128xf32>
    %222 = arith.subf %220, %221 : vector<2x128xf32>
    %223 = vector.extract_strided_slice %215 {offsets = [0, 384], sizes = [2, 128], strides = [1, 1]} : vector<2x512xf32> to vector<2x128xf32>
    %224 = arith.mulf %217, %177 : vector<2x128xf32>
    %225 = arith.mulf %216, %222 : vector<2x128xf32>
    %226 = arith.addf %224, %225 : vector<2x128xf32>
    %227 = math.tanh %226 : vector<2x128xf32>
    %228 = arith.mulf %223, %227 : vector<2x128xf32>
    %cst_66 = arith.constant dense<0.000000e+00> : vector<2x512xf32>
    %229 = tpu.matmul %228, %3, %cst_66 {dimension_numbers = #tpu.dot_dimension_numbers<[1], [0], [0], [1], [0, 0, 1, 1], [], []>} : vector<2x128xf32>, vector<128x512xf32>, vector<2x512xf32> -> vector<2x512xf32>
    %cst_67 = arith.constant dense<0.000000e+00> : vector<2x512xf32>
    %230 = tpu.matmul %202, %4, %cst_67 {dimension_numbers = #tpu.dot_dimension_numbers<[1], [0], [0], [1], [0, 0, 1, 1], [], []>} : vector<2x128xf32>, vector<128x512xf32>, vector<2x512xf32> -> vector<2x512xf32>
    %231 = arith.addf %229, %230 : vector<2x512xf32>
    %232 = vector.broadcast %5 : vector<1x512xf32> to vector<2x512xf32>
    %233 = arith.addf %231, %232 : vector<2x512xf32>
    %234 = arith.negf %233 : vector<2x512xf32>
    %235 = math.exp %234 : vector<2x512xf32>
    %cst_68 = arith.constant 1.000000e+00 : f32
    %236 = vector.broadcast %cst_68 : f32 to vector<2x512xf32>
    %237 = arith.addf %236, %235 : vector<2x512xf32>
    %238 = arith.divf %236, %237 : vector<2x512xf32>
    %239 = vector.extract_strided_slice %238 {offsets = [0, 0], sizes = [2, 128], strides = [1, 1]} : vector<2x512xf32> to vector<2x128xf32>
    %240 = vector.extract_strided_slice %238 {offsets = [0, 128], sizes = [2, 128], strides = [1, 1]} : vector<2x512xf32> to vector<2x128xf32>
    %241 = vector.extract_strided_slice %238 {offsets = [0, 256], sizes = [2, 128], strides = [1, 1]} : vector<2x512xf32> to vector<2x128xf32>
    %cst_69 = arith.constant 2.000000e+00 : f32
    %242 = vector.broadcast %cst_69 : f32 to vector<2x128xf32>
    %243 = arith.mulf %242, %241 : vector<2x128xf32>
    %cst_70 = arith.constant 1.000000e+00 : f32
    %244 = vector.broadcast %cst_70 : f32 to vector<2x128xf32>
    %245 = arith.subf %243, %244 : vector<2x128xf32>
    %246 = vector.extract_strided_slice %238 {offsets = [0, 384], sizes = [2, 128], strides = [1, 1]} : vector<2x512xf32> to vector<2x128xf32>
    %247 = arith.mulf %240, %200 : vector<2x128xf32>
    %248 = arith.mulf %239, %245 : vector<2x128xf32>
    %249 = arith.addf %247, %248 : vector<2x128xf32>
    %250 = math.tanh %249 : vector<2x128xf32>
    %251 = arith.mulf %246, %250 : vector<2x128xf32>
    %c5_i32 = arith.constant 5 : i32
    %252 = arith.index_cast %c5_i32 : i32 to index
    %c0_71 = arith.constant 0 : index
    %c0_72 = arith.constant 0 : index
    %253 = vector.load %arg0[%252, %c0_71, %c0_72] : memref<8x2x22xf32, #tpu.memory_space<vmem>>, vector<1x2x22xf32>
    %254 = vector.shape_cast %253 : vector<1x2x22xf32> to vector<2x22xf32>
    %cst_73 = arith.constant dense<0.000000e+00> : vector<2x512xf32>
    %255 = tpu.matmul %254, %0, %cst_73 {dimension_numbers = #tpu.dot_dimension_numbers<[1], [0], [0], [1], [0, 0, 1, 1], [], []>} : vector<2x22xf32>, vector<22x512xf32>, vector<2x512xf32> -> vector<2x512xf32>
    %cst_74 = arith.constant dense<0.000000e+00> : vector<2x512xf32>
    %256 = tpu.matmul %228, %1, %cst_74 {dimension_numbers = #tpu.dot_dimension_numbers<[1], [0], [0], [1], [0, 0, 1, 1], [], []>} : vector<2x128xf32>, vector<128x512xf32>, vector<2x512xf32> -> vector<2x512xf32>
    %257 = arith.addf %255, %256 : vector<2x512xf32>
    %258 = vector.broadcast %2 : vector<1x512xf32> to vector<2x512xf32>
    %259 = arith.addf %257, %258 : vector<2x512xf32>
    %260 = arith.negf %259 : vector<2x512xf32>
    %261 = math.exp %260 : vector<2x512xf32>
    %cst_75 = arith.constant 1.000000e+00 : f32
    %262 = vector.broadcast %cst_75 : f32 to vector<2x512xf32>
    %263 = arith.addf %262, %261 : vector<2x512xf32>
    %264 = arith.divf %262, %263 : vector<2x512xf32>
    %265 = vector.extract_strided_slice %264 {offsets = [0, 0], sizes = [2, 128], strides = [1, 1]} : vector<2x512xf32> to vector<2x128xf32>
    %266 = vector.extract_strided_slice %264 {offsets = [0, 128], sizes = [2, 128], strides = [1, 1]} : vector<2x512xf32> to vector<2x128xf32>
    %267 = vector.extract_strided_slice %264 {offsets = [0, 256], sizes = [2, 128], strides = [1, 1]} : vector<2x512xf32> to vector<2x128xf32>
    %cst_76 = arith.constant 2.000000e+00 : f32
    %268 = vector.broadcast %cst_76 : f32 to vector<2x128xf32>
    %269 = arith.mulf %268, %267 : vector<2x128xf32>
    %cst_77 = arith.constant 1.000000e+00 : f32
    %270 = vector.broadcast %cst_77 : f32 to vector<2x128xf32>
    %271 = arith.subf %269, %270 : vector<2x128xf32>
    %272 = vector.extract_strided_slice %264 {offsets = [0, 384], sizes = [2, 128], strides = [1, 1]} : vector<2x512xf32> to vector<2x128xf32>
    %273 = arith.mulf %266, %226 : vector<2x128xf32>
    %274 = arith.mulf %265, %271 : vector<2x128xf32>
    %275 = arith.addf %273, %274 : vector<2x128xf32>
    %276 = math.tanh %275 : vector<2x128xf32>
    %277 = arith.mulf %272, %276 : vector<2x128xf32>
    %cst_78 = arith.constant dense<0.000000e+00> : vector<2x512xf32>
    %278 = tpu.matmul %277, %3, %cst_78 {dimension_numbers = #tpu.dot_dimension_numbers<[1], [0], [0], [1], [0, 0, 1, 1], [], []>} : vector<2x128xf32>, vector<128x512xf32>, vector<2x512xf32> -> vector<2x512xf32>
    %cst_79 = arith.constant dense<0.000000e+00> : vector<2x512xf32>
    %279 = tpu.matmul %251, %4, %cst_79 {dimension_numbers = #tpu.dot_dimension_numbers<[1], [0], [0], [1], [0, 0, 1, 1], [], []>} : vector<2x128xf32>, vector<128x512xf32>, vector<2x512xf32> -> vector<2x512xf32>
    %280 = arith.addf %278, %279 : vector<2x512xf32>
    %281 = vector.broadcast %5 : vector<1x512xf32> to vector<2x512xf32>
    %282 = arith.addf %280, %281 : vector<2x512xf32>
    %283 = arith.negf %282 : vector<2x512xf32>
    %284 = math.exp %283 : vector<2x512xf32>
    %cst_80 = arith.constant 1.000000e+00 : f32
    %285 = vector.broadcast %cst_80 : f32 to vector<2x512xf32>
    %286 = arith.addf %285, %284 : vector<2x512xf32>
    %287 = arith.divf %285, %286 : vector<2x512xf32>
    %288 = vector.extract_strided_slice %287 {offsets = [0, 0], sizes = [2, 128], strides = [1, 1]} : vector<2x512xf32> to vector<2x128xf32>
    %289 = vector.extract_strided_slice %287 {offsets = [0, 128], sizes = [2, 128], strides = [1, 1]} : vector<2x512xf32> to vector<2x128xf32>
    %290 = vector.extract_strided_slice %287 {offsets = [0, 256], sizes = [2, 128], strides = [1, 1]} : vector<2x512xf32> to vector<2x128xf32>
    %cst_81 = arith.constant 2.000000e+00 : f32
    %291 = vector.broadcast %cst_81 : f32 to vector<2x128xf32>
    %292 = arith.mulf %291, %290 : vector<2x128xf32>
    %cst_82 = arith.constant 1.000000e+00 : f32
    %293 = vector.broadcast %cst_82 : f32 to vector<2x128xf32>
    %294 = arith.subf %292, %293 : vector<2x128xf32>
    %295 = vector.extract_strided_slice %287 {offsets = [0, 384], sizes = [2, 128], strides = [1, 1]} : vector<2x512xf32> to vector<2x128xf32>
    %296 = arith.mulf %289, %249 : vector<2x128xf32>
    %297 = arith.mulf %288, %294 : vector<2x128xf32>
    %298 = arith.addf %296, %297 : vector<2x128xf32>
    %299 = math.tanh %298 : vector<2x128xf32>
    %300 = arith.mulf %295, %299 : vector<2x128xf32>
    %c6_i32 = arith.constant 6 : i32
    %301 = arith.index_cast %c6_i32 : i32 to index
    %c0_83 = arith.constant 0 : index
    %c0_84 = arith.constant 0 : index
    %302 = vector.load %arg0[%301, %c0_83, %c0_84] : memref<8x2x22xf32, #tpu.memory_space<vmem>>, vector<1x2x22xf32>
    %303 = vector.shape_cast %302 : vector<1x2x22xf32> to vector<2x22xf32>
    %cst_85 = arith.constant dense<0.000000e+00> : vector<2x512xf32>
    %304 = tpu.matmul %303, %0, %cst_85 {dimension_numbers = #tpu.dot_dimension_numbers<[1], [0], [0], [1], [0, 0, 1, 1], [], []>} : vector<2x22xf32>, vector<22x512xf32>, vector<2x512xf32> -> vector<2x512xf32>
    %cst_86 = arith.constant dense<0.000000e+00> : vector<2x512xf32>
    %305 = tpu.matmul %277, %1, %cst_86 {dimension_numbers = #tpu.dot_dimension_numbers<[1], [0], [0], [1], [0, 0, 1, 1], [], []>} : vector<2x128xf32>, vector<128x512xf32>, vector<2x512xf32> -> vector<2x512xf32>
    %306 = arith.addf %304, %305 : vector<2x512xf32>
    %307 = vector.broadcast %2 : vector<1x512xf32> to vector<2x512xf32>
    %308 = arith.addf %306, %307 : vector<2x512xf32>
    %309 = arith.negf %308 : vector<2x512xf32>
    %310 = math.exp %309 : vector<2x512xf32>
    %cst_87 = arith.constant 1.000000e+00 : f32
    %311 = vector.broadcast %cst_87 : f32 to vector<2x512xf32>
    %312 = arith.addf %311, %310 : vector<2x512xf32>
    %313 = arith.divf %311, %312 : vector<2x512xf32>
    %314 = vector.extract_strided_slice %313 {offsets = [0, 0], sizes = [2, 128], strides = [1, 1]} : vector<2x512xf32> to vector<2x128xf32>
    %315 = vector.extract_strided_slice %313 {offsets = [0, 128], sizes = [2, 128], strides = [1, 1]} : vector<2x512xf32> to vector<2x128xf32>
    %316 = vector.extract_strided_slice %313 {offsets = [0, 256], sizes = [2, 128], strides = [1, 1]} : vector<2x512xf32> to vector<2x128xf32>
    %cst_88 = arith.constant 2.000000e+00 : f32
    %317 = vector.broadcast %cst_88 : f32 to vector<2x128xf32>
    %318 = arith.mulf %317, %316 : vector<2x128xf32>
    %cst_89 = arith.constant 1.000000e+00 : f32
    %319 = vector.broadcast %cst_89 : f32 to vector<2x128xf32>
    %320 = arith.subf %318, %319 : vector<2x128xf32>
    %321 = vector.extract_strided_slice %313 {offsets = [0, 384], sizes = [2, 128], strides = [1, 1]} : vector<2x512xf32> to vector<2x128xf32>
    %322 = arith.mulf %315, %275 : vector<2x128xf32>
    %323 = arith.mulf %314, %320 : vector<2x128xf32>
    %324 = arith.addf %322, %323 : vector<2x128xf32>
    %325 = math.tanh %324 : vector<2x128xf32>
    %326 = arith.mulf %321, %325 : vector<2x128xf32>
    %cst_90 = arith.constant dense<0.000000e+00> : vector<2x512xf32>
    %327 = tpu.matmul %326, %3, %cst_90 {dimension_numbers = #tpu.dot_dimension_numbers<[1], [0], [0], [1], [0, 0, 1, 1], [], []>} : vector<2x128xf32>, vector<128x512xf32>, vector<2x512xf32> -> vector<2x512xf32>
    %cst_91 = arith.constant dense<0.000000e+00> : vector<2x512xf32>
    %328 = tpu.matmul %300, %4, %cst_91 {dimension_numbers = #tpu.dot_dimension_numbers<[1], [0], [0], [1], [0, 0, 1, 1], [], []>} : vector<2x128xf32>, vector<128x512xf32>, vector<2x512xf32> -> vector<2x512xf32>
    %329 = arith.addf %327, %328 : vector<2x512xf32>
    %330 = vector.broadcast %5 : vector<1x512xf32> to vector<2x512xf32>
    %331 = arith.addf %329, %330 : vector<2x512xf32>
    %332 = arith.negf %331 : vector<2x512xf32>
    %333 = math.exp %332 : vector<2x512xf32>
    %cst_92 = arith.constant 1.000000e+00 : f32
    %334 = vector.broadcast %cst_92 : f32 to vector<2x512xf32>
    %335 = arith.addf %334, %333 : vector<2x512xf32>
    %336 = arith.divf %334, %335 : vector<2x512xf32>
    %337 = vector.extract_strided_slice %336 {offsets = [0, 0], sizes = [2, 128], strides = [1, 1]} : vector<2x512xf32> to vector<2x128xf32>
    %338 = vector.extract_strided_slice %336 {offsets = [0, 128], sizes = [2, 128], strides = [1, 1]} : vector<2x512xf32> to vector<2x128xf32>
    %339 = vector.extract_strided_slice %336 {offsets = [0, 256], sizes = [2, 128], strides = [1, 1]} : vector<2x512xf32> to vector<2x128xf32>
    %cst_93 = arith.constant 2.000000e+00 : f32
    %340 = vector.broadcast %cst_93 : f32 to vector<2x128xf32>
    %341 = arith.mulf %340, %339 : vector<2x128xf32>
    %cst_94 = arith.constant 1.000000e+00 : f32
    %342 = vector.broadcast %cst_94 : f32 to vector<2x128xf32>
    %343 = arith.subf %341, %342 : vector<2x128xf32>
    %344 = vector.extract_strided_slice %336 {offsets = [0, 384], sizes = [2, 128], strides = [1, 1]} : vector<2x512xf32> to vector<2x128xf32>
    %345 = arith.mulf %338, %298 : vector<2x128xf32>
    %346 = arith.mulf %337, %343 : vector<2x128xf32>
    %347 = arith.addf %345, %346 : vector<2x128xf32>
    %348 = math.tanh %347 : vector<2x128xf32>
    %349 = arith.mulf %344, %348 : vector<2x128xf32>
    %c7_i32 = arith.constant 7 : i32
    %350 = arith.index_cast %c7_i32 : i32 to index
    %c0_95 = arith.constant 0 : index
    %c0_96 = arith.constant 0 : index
    %351 = vector.load %arg0[%350, %c0_95, %c0_96] : memref<8x2x22xf32, #tpu.memory_space<vmem>>, vector<1x2x22xf32>
    %352 = vector.shape_cast %351 : vector<1x2x22xf32> to vector<2x22xf32>
    %cst_97 = arith.constant dense<0.000000e+00> : vector<2x512xf32>
    %353 = tpu.matmul %352, %0, %cst_97 {dimension_numbers = #tpu.dot_dimension_numbers<[1], [0], [0], [1], [0, 0, 1, 1], [], []>} : vector<2x22xf32>, vector<22x512xf32>, vector<2x512xf32> -> vector<2x512xf32>
    %cst_98 = arith.constant dense<0.000000e+00> : vector<2x512xf32>
    %354 = tpu.matmul %326, %1, %cst_98 {dimension_numbers = #tpu.dot_dimension_numbers<[1], [0], [0], [1], [0, 0, 1, 1], [], []>} : vector<2x128xf32>, vector<128x512xf32>, vector<2x512xf32> -> vector<2x512xf32>
    %355 = arith.addf %353, %354 : vector<2x512xf32>
    %356 = vector.broadcast %2 : vector<1x512xf32> to vector<2x512xf32>
    %357 = arith.addf %355, %356 : vector<2x512xf32>
    %358 = arith.negf %357 : vector<2x512xf32>
    %359 = math.exp %358 : vector<2x512xf32>
    %cst_99 = arith.constant 1.000000e+00 : f32
    %360 = vector.broadcast %cst_99 : f32 to vector<2x512xf32>
    %361 = arith.addf %360, %359 : vector<2x512xf32>
    %362 = arith.divf %360, %361 : vector<2x512xf32>
    %363 = vector.extract_strided_slice %362 {offsets = [0, 0], sizes = [2, 128], strides = [1, 1]} : vector<2x512xf32> to vector<2x128xf32>
    %364 = vector.extract_strided_slice %362 {offsets = [0, 128], sizes = [2, 128], strides = [1, 1]} : vector<2x512xf32> to vector<2x128xf32>
    %365 = vector.extract_strided_slice %362 {offsets = [0, 256], sizes = [2, 128], strides = [1, 1]} : vector<2x512xf32> to vector<2x128xf32>
    %cst_100 = arith.constant 2.000000e+00 : f32
    %366 = vector.broadcast %cst_100 : f32 to vector<2x128xf32>
    %367 = arith.mulf %366, %365 : vector<2x128xf32>
    %cst_101 = arith.constant 1.000000e+00 : f32
    %368 = vector.broadcast %cst_101 : f32 to vector<2x128xf32>
    %369 = arith.subf %367, %368 : vector<2x128xf32>
    %370 = vector.extract_strided_slice %362 {offsets = [0, 384], sizes = [2, 128], strides = [1, 1]} : vector<2x512xf32> to vector<2x128xf32>
    %371 = arith.mulf %364, %324 : vector<2x128xf32>
    %372 = arith.mulf %363, %369 : vector<2x128xf32>
    %373 = arith.addf %371, %372 : vector<2x128xf32>
    %374 = math.tanh %373 : vector<2x128xf32>
    %375 = arith.mulf %370, %374 : vector<2x128xf32>
    %cst_102 = arith.constant dense<0.000000e+00> : vector<2x512xf32>
    %376 = tpu.matmul %375, %3, %cst_102 {dimension_numbers = #tpu.dot_dimension_numbers<[1], [0], [0], [1], [0, 0, 1, 1], [], []>} : vector<2x128xf32>, vector<128x512xf32>, vector<2x512xf32> -> vector<2x512xf32>
    %cst_103 = arith.constant dense<0.000000e+00> : vector<2x512xf32>
    %377 = tpu.matmul %349, %4, %cst_103 {dimension_numbers = #tpu.dot_dimension_numbers<[1], [0], [0], [1], [0, 0, 1, 1], [], []>} : vector<2x128xf32>, vector<128x512xf32>, vector<2x512xf32> -> vector<2x512xf32>
    %378 = arith.addf %376, %377 : vector<2x512xf32>
    %379 = vector.broadcast %5 : vector<1x512xf32> to vector<2x512xf32>
    %380 = arith.addf %378, %379 : vector<2x512xf32>
    %381 = arith.negf %380 : vector<2x512xf32>
    %382 = math.exp %381 : vector<2x512xf32>
    %cst_104 = arith.constant 1.000000e+00 : f32
    %383 = vector.broadcast %cst_104 : f32 to vector<2x512xf32>
    %384 = arith.addf %383, %382 : vector<2x512xf32>
    %385 = arith.divf %383, %384 : vector<2x512xf32>
    %386 = vector.extract_strided_slice %385 {offsets = [0, 0], sizes = [2, 128], strides = [1, 1]} : vector<2x512xf32> to vector<2x128xf32>
    %387 = vector.extract_strided_slice %385 {offsets = [0, 128], sizes = [2, 128], strides = [1, 1]} : vector<2x512xf32> to vector<2x128xf32>
    %388 = vector.extract_strided_slice %385 {offsets = [0, 256], sizes = [2, 128], strides = [1, 1]} : vector<2x512xf32> to vector<2x128xf32>
    %cst_105 = arith.constant 2.000000e+00 : f32
    %389 = vector.broadcast %cst_105 : f32 to vector<2x128xf32>
    %390 = arith.mulf %389, %388 : vector<2x128xf32>
    %cst_106 = arith.constant 1.000000e+00 : f32
    %391 = vector.broadcast %cst_106 : f32 to vector<2x128xf32>
    %392 = arith.subf %390, %391 : vector<2x128xf32>
    %393 = vector.extract_strided_slice %385 {offsets = [0, 384], sizes = [2, 128], strides = [1, 1]} : vector<2x512xf32> to vector<2x128xf32>
    %394 = arith.mulf %387, %347 : vector<2x128xf32>
    %395 = arith.mulf %386, %392 : vector<2x128xf32>
    %396 = arith.addf %394, %395 : vector<2x128xf32>
    %397 = math.tanh %396 : vector<2x128xf32>
    %398 = arith.mulf %393, %397 : vector<2x128xf32>
    %c8_i32 = arith.constant 8 : i32
    %c0_107 = arith.constant 0 : index
    %c0_108 = arith.constant 0 : index
    %399 = vector.load %arg7[%c0_107, %c0_108] : memref<128x64xf32, #tpu.memory_space<vmem>>, vector<128x64xf32>
    %cst_109 = arith.constant dense<0.000000e+00> : vector<2x64xf32>
    %400 = tpu.matmul %398, %399, %cst_109 {dimension_numbers = #tpu.dot_dimension_numbers<[1], [0], [0], [1], [0, 0, 1, 1], [], []>} : vector<2x128xf32>, vector<128x64xf32>, vector<2x64xf32> -> vector<2x64xf32>
    %c0_110 = arith.constant 0 : index
    %c0_111 = arith.constant 0 : index
    %401 = vector.load %arg8[%c0_110, %c0_111] : memref<1x64xf32, #tpu.memory_space<vmem>>, vector<1x64xf32>
    %402 = vector.broadcast %401 : vector<1x64xf32> to vector<2x64xf32>
    %403 = arith.addf %400, %402 : vector<2x64xf32>
    %cst_112 = arith.constant 0.000000e+00 : f32
    %404 = vector.broadcast %cst_112 : f32 to vector<2x64xf32>
    %405 = arith.maximumf %403, %404 : vector<2x64xf32>
    %c0_113 = arith.constant 0 : index
    %c0_114 = arith.constant 0 : index
    %406 = vector.load %arg9[%c0_113, %c0_114] : memref<64x32xf32, #tpu.memory_space<vmem>>, vector<64x32xf32>
    %cst_115 = arith.constant dense<0.000000e+00> : vector<2x32xf32>
    %407 = tpu.matmul %405, %406, %cst_115 {dimension_numbers = #tpu.dot_dimension_numbers<[1], [0], [0], [1], [0, 0, 1, 1], [], []>} : vector<2x64xf32>, vector<64x32xf32>, vector<2x32xf32> -> vector<2x32xf32>
    %c0_116 = arith.constant 0 : index
    %c0_117 = arith.constant 0 : index
    %408 = vector.load %arg10[%c0_116, %c0_117] : memref<1x32xf32, #tpu.memory_space<vmem>>, vector<1x32xf32>
    %409 = vector.broadcast %408 : vector<1x32xf32> to vector<2x32xf32>
    %410 = arith.addf %407, %409 : vector<2x32xf32>
    %cst_118 = arith.constant 0.000000e+00 : f32
    %411 = vector.broadcast %cst_118 : f32 to vector<2x32xf32>
    %412 = arith.maximumf %410, %411 : vector<2x32xf32>
    %c0_119 = arith.constant 0 : index
    %c0_120 = arith.constant 0 : index
    %413 = vector.load %arg11[%c0_119, %c0_120] : memref<32x128xf32, #tpu.memory_space<vmem>>, vector<32x128xf32>
    %cst_121 = arith.constant dense<0.000000e+00> : vector<2x128xf32>
    %414 = tpu.matmul %412, %413, %cst_121 {dimension_numbers = #tpu.dot_dimension_numbers<[1], [0], [0], [1], [0, 0, 1, 1], [], []>} : vector<2x32xf32>, vector<32x128xf32>, vector<2x128xf32> -> vector<2x128xf32>
    %c0_122 = arith.constant 0 : index
    %c0_123 = arith.constant 0 : index
    %415 = vector.load %arg12[%c0_122, %c0_123] : memref<1x128xf32, #tpu.memory_space<vmem>>, vector<1x128xf32>
    %416 = vector.broadcast %415 : vector<1x128xf32> to vector<2x128xf32>
    %417 = arith.addf %414, %416 : vector<2x128xf32>
    %c0_124 = arith.constant 0 : index
    %c0_125 = arith.constant 0 : index
    %418 = vector.load %arg13[%c0_124, %c0_125] : memref<2x128xf32, #tpu.memory_space<vmem>>, vector<2x128xf32>
    tpu.vector_store %arg13[%c0_124, %c0_125], %417 {strides = array<i32>} : memref<2x128xf32, #tpu.memory_space<vmem>>, vector<2x128xf32>,
    return
  }
}

</mosaic_0001>

<bundles_post_ra>
// kernel: stock_predictor_sent_forward.1
= control target key start
LH: loop header
LB: loop body
LE: loop exit
PB: predicated region body
PF: predicated region fallthrough
CT: control target
= control target key end

     0   :  { %18 = vsyncpa [#allocation3], 0  ;;  %s9748_s0 = inlined_call_operand.vmem [shape: f32[8,2,22], index: 0, kind: input, shape index: {}]   ;;  %s9749_s1 = inlined_call_operand.vmem [shape: f32[22,512], index: 1, kind: input, shape index: {}]   ;;  %s9750_s2 = inlined_call_operand.hbm [shape: f32[128,512], index: 2, kind: input, shape index: {}]   ;;  %s9751_s3 = inlined_call_operand.vmem [shape: f32[1,512], index: 3, kind: input, shape index: {}]   ;;  %s9752_s4 = inlined_call_operand.hbm [shape: f32[128,512], index: 4, kind: input, shape index: {}]   ;;  %s9753_s5 = inlined_call_operand.hbm [shape: f32[128,512], index: 5, kind: input, shape index: {}]   ;;  %s9754_s6 = inlined_call_operand.vmem [shape: f32[1,512], index: 6, kind: input, shape index: {}]   ;;  %s9755_s7 = inlined_call_operand.vmem [shape: f32[128,64], index: 7, kind: input, shape index: {}]   ;;  %s9756_s8 = inlined_call_operand.vmem [shape: f32[1,64], index: 8, kind: input, shape index: {}]   ;;  %s9757_s9 = inlined_call_operand.vmem [shape: f32[64,32], index: 9, kind: input, shape index: {}]   ;;  %s9758_s10 = inlined_call_operand.vmem [shape: f32[1,32], index: 10, kind: input, shape index: {}]   ;;  %s9759_s11 = inlined_call_operand.vmem [shape: f32[32,128], index: 11, kind: input, shape index: {}]   ;;  %s9760_s12 = inlined_call_operand.vmem [shape: f32[1,128], index: 12, kind: input, shape index: {}]   ;;  %s9761_s13 = inlined_call_operand.vmem [shape: f32[2,128], index: 13, kind: output, shape index: {}]  }
   0x1   :  { %19 = vsyncpa [#allocation5], 0  ;;  %s8082_s25 = smov [#allocation4]   ;;  %s8083_s27 = smov [#allocation2]  }
   0x2   :  { %s43_s26 = sshll.u32 %s8082_s25, 4  ;;  %s29_s28 = sshll.u32 %s8083_s27, 4  ;;  %s44_s26 = int_to_ptr.vmem [resolvable:$true] %s43_s26  ;;  %s8160_s28 = int_to_ptr.vmem [resolvable:$true] %s29_s28 }
   0x3   :  { %s8012_s14 = scalar_lea.hbm %s9752_s4, 8192 }
   0x4   :  { %p8013_p0 = scmp.ne.s32.totalorder %s9752_s4, %s8012_s14  ;;  %p8016_p1 = scmp.lt.u32.totalorder %s8012_s14, %s9752_s4 }
   0x6   :  { %p8018_p2 = pnand %p8016_p1, %p8013_p0 }
   0x8   :  { %8021 = shalt.err (!%p8018_p2)
}
   0x9   :  { %s8022_s19 = scalar_lea.vmem %s44_s26, 8192  ;;  %p8027_p4 = scmp.lt.s32.totalorder %s44_s26, %s44_s26 }
   0xa   :  { %p8023_p3 = scmp.ne.s32.totalorder %s44_s26, %s8022_s19  ;;  %p8028_p5 = scmp.lt.s32.totalorder %s8022_s19, %s8022_s19 }
   0xc   :  { %p8029_p6 = por %p8028_p5, %p8027_p4 }
   0xe   :  { %p8030_p7 = pnand %p8029_p6, %p8023_p3 }
  0x10   :  { %8033 = shalt.err (!%p8030_p7)
}
  0x11   :  { %s8084_s20 = smov 512   ;;  %s8085_s21 = smov 32  }
  0x12   :  { %49 = dma.hbm_to_vmem [thread:$0]  %s9752_s4, 8192, %s44_s26, [#allocation5], %s8084_s20, %s8084_s20, %s8085_s21  }
  0x13   :  { %s8034_s27 = scalar_lea.hbm %s9750_s2, 8192 }
  0x14   :  { %p8035_p8 = scmp.ne.s32.totalorder %s9750_s2, %s8034_s27  ;;  %p8038_p9 = scmp.lt.u32.totalorder %s8034_s27, %s9750_s2 }
  0x16   :  { %p8040_p10 = pnand %p8038_p9, %p8035_p8 }
  0x18   :  { %8043 = shalt.err (!%p8040_p10)
}
  0x19   :  { %s8044_s16 = scalar_lea.vmem %s8160_s28, 8192  ;;  %p8049_p12 = scmp.lt.s32.totalorder %s8160_s28, %s8160_s28 }
  0x1a   :  { %p8045_p11 = scmp.ne.s32.totalorder %s8160_s28, %s8044_s16  ;;  %p8050_p13 = scmp.lt.s32.totalorder %s8044_s16, %s8044_s16 }
  0x1c   :  { %p8051_p0 = por %p8050_p13, %p8049_p12 }
  0x1e   :  { %p8052_p1 = pnand %p8051_p0, %p8045_p11 }
  0x20   :  { %8055 = shalt.err (!%p8052_p1)
}
  0x21   :  { %35 = dma.hbm_to_vmem [thread:$0]  %s9750_s2, 8192, %s8160_s28, [#allocation3], %s8084_s20, %s8084_s20, %s8085_s21  }
  0x22   :  { %s8086_s17 = smov [#allocation6]   ;;  %s8056_s23 = scalar_lea.hbm %s9753_s5, 8192 }
  0x23   :  { %s55_s18 = sshll.u32 %s8086_s17, 4  ;;  %p8057_p2 = scmp.ne.s32.totalorder %s9753_s5, %s8056_s23  ;;  %s56_s18 = int_to_ptr.vmem [resolvable:$true] %s55_s18 }
  0x24   :  { %p8060_p3 = scmp.lt.u32.totalorder %s8056_s23, %s9753_s5 }
  0x26   :  { %p8062_p4 = pnand %p8060_p3, %p8057_p2 }
  0x28   :  { %8065 = shalt.err (!%p8062_p4)
}
  0x29   :  { %s8066_s30 = scalar_lea.vmem %s56_s18, 8192  ;;  %p8071_p6 = scmp.lt.s32.totalorder %s56_s18, %s56_s18 }
  0x2a   :  { %p8067_p5 = scmp.ne.s32.totalorder %s56_s18, %s8066_s30  ;;  %p8072_p7 = scmp.lt.s32.totalorder %s8066_s30, %s8066_s30 }
  0x2c   :  { %p8073_p8 = por %p8072_p7, %p8071_p6 }
  0x2e   :  { %p8074_p9 = pnand %p8073_p8, %p8067_p5 }
  0x30   :  { %8077 = shalt.err (!%p8074_p9)
}
  0x31   :  { %61 = dma.hbm_to_vmem [thread:$0]  %s9753_s5, 8192, %s56_s18, [#allocation5], %s8084_s20, %s8084_s20, %s8085_s21  }
  0x32   :  { %8078 = dma.done.wait [#allocation3], 8192  }
  0x33   :  { %8079 = vsyncadd [#allocation3], 4294959104 }
  0x34   :  { %8080 = dma.done.wait [#allocation5], 16384  }
  0x35   :  { %8081 = vsyncadd [#allocation5], 4294950912  ;;  %v9762_v0 = vmov 0.0   ;;  %v100_v1 = vld [vmem:[#allocation2 + $0x18] sm:$0xff]  ;;  %v99_v3 = vld [vmem:[#allocation2 + $0x10] sm:$0xff]  ;;  %vm438_vm0 = vcmask 1045504  }
  0x36   :  { %427 = vmatprep.mubr.f32.mxu1 %v9762_v0  ;;  %356 = vmatprep.mubr.f32.mxu0 %v9762_v0  ;;  %v104_v2 = vld [vmem:[#allocation2 + $0x38] sm:$0xff]  ;;  %v103_v5 = vld [vmem:[#allocation2 + $0x30] sm:$0xff]  ;;  %v98_v12 = vld [vmem:[#allocation2 + $0x8] sm:$0xff]  ;;  %vm434_vm1 = vcmask 179200   ;;  %vm8089_vm2 = vmmov 0   ;;  %vm5599_vm3 = vcmask 523264  }
  0x37   :  { %v8214_v4 = vpack.c.bf16 %v104_v2, %v100_v1  ;;  %v108_v6 = vld [vmem:[#allocation2 + $0x58] sm:$0xff]  ;;  %v8216_v8 = vpack.c.bf16 %v103_v5, %v99_v3  ;;  %v107_v10 = vld [vmem:[#allocation2 + $0x50] sm:$0xff]  ;;  %v102_v13 = vld [vmem:[#allocation2 + $0x28] sm:$0xff]  ;;  %vm5685_vm4 = vcmask 261120  }
  0x38   :  { %v112_v7 = vld [vmem:[#allocation2 + $0x78] sm:$0xff]  ;;  %v111_v11 = vld [vmem:[#allocation2 + $0x70] sm:$0xff]  ;;  %v97_v14 = vld [vmem:[#allocation2] sm:$0xff]  ;;  %v8224_v17 = vpack.c.bf16 %v102_v13, %v98_v12 }
  0x39   :  { %9987 = vst [vmem:[#allocation9_spill] sm:$0xff] %v8214_v4  ;;  %v8218_v9 = vpack.c.bf16 %v112_v7, %v108_v6  ;;  %6035 = vmatprep.subr.bf16.mxu1 %v8214_v4  ;;  %v101_v15 = vld [vmem:[#allocation2 + $0x20] sm:$0xff]  ;;  %v8222_v16 = vpack.c.bf16 %v111_v11, %v107_v10  ;;  %v116_v19 = vld [vmem:[#allocation2 + $0x98] sm:$0xff]  ;;  %v115_v21 = vld [vmem:[#allocation2 + $0x90] sm:$0xff] }
  0x3a   :  { %6037 = vmatpush1.bf16.msra.mxu1 %v8216_v8  ;;  %9989 = vst [vmem:[#allocation11_spill] sm:$0xff] %v8224_v17  ;;  %v8226_v18 = vpack.c.bf16 %v101_v15, %v97_v14  ;;  %v120_v20 = vld [vmem:[#allocation2 + $0xb8] sm:$0xff]  ;;  %v119_v23 = vld [vmem:[#allocation2 + $0xb0] sm:$0xff]  ;;  %v106_v24 = vld [vmem:[#allocation2 + $0x48] sm:$0xff]  ;;  %6003 = vmatprep.subr.bf16.mxu0 %v8224_v17 }
  0x3b   :  { %9988 = vst [vmem:[#allocation10_spill] sm:$0xff] %v8222_v16  ;;  %6039 = vmatprep.subr.bf16.mxu1 %v8218_v9  ;;  %v8229_v22 = vpack.c.bf16 %v120_v20, %v116_v19  ;;  %v110_v25 = vld [vmem:[#allocation2 + $0x68] sm:$0xff]  ;;  %v105_v27 = vld [vmem:[#allocation2 + $0x40] sm:$0xff]  ;;  %v124_v29 = vld [vmem:[#allocation2 + $0xd8] sm:$0xff]  ;;  %v8238_v32 = vpack.c.bf16 %v119_v23, %v115_v21 }
  0x3c   :  { %v8232_v26 = vpack.c.bf16 %v110_v25, %v106_v24  ;;  %v109_v28 = vld [vmem:[#allocation2 + $0x60] sm:$0xff]  ;;  %6005 = vmatpush1.bf16.msra.mxu0 %v8226_v18  ;;  %v128_v31 = vld [vmem:[#allocation2 + $0xf8] sm:$0xff]  ;;  %v114_v33 = vld [vmem:[#allocation2 + $0x88] sm:$0xff] }
  0x3d   :  { %9990 = vst [vmem:[#allocation12_spill] sm:$0xff] %v8229_v22  ;;  %v8235_v30 = vpack.c.bf16 %v109_v28, %v105_v27  ;;  %9991 = vst [vmem:[#allocation13_spill] sm:$0xff] %v8238_v32  ;;  %v118_v34 = vld [vmem:[#allocation2 + $0xa8] sm:$0xff]  ;;  %v113_v35 = vld [vmem:[#allocation2 + $0x80] sm:$0xff]  ;;  %v8242_v36 = vpack.c.bf16 %v128_v31, %v124_v29 }
  0x3e   :  { %6041 = vmatpush1.bf16.msra.mxu1 %v8222_v16  ;;  %6007 = vmatprep.subr.bf16.mxu0 %v8232_v26  ;;  %v123_v37 = vld [vmem:[#allocation2 + $0xd0] sm:$0xff]  ;;  %v8244_v39 = vpack.c.bf16 %v118_v34, %v114_v33  ;;  %v117_v40 = vld [vmem:[#allocation2 + $0xa0] sm:$0xff]  ;;  %v132_v41 = vld [vmem:[#allocation2 + $0x118] sm:$0xff] }
  0x3f   :  { %6043 = vmatprep.subr.bf16.mxu1 %v8229_v22  ;;  %9992 = vst [vmem:[#allocation14_spill] sm:$0xff] %v8242_v36  ;;  %v127_v38 = vld [vmem:[#allocation2 + $0xf0] sm:$0xff]  ;;  %v136_v42 = vld [vmem:[#allocation2 + $0x138] sm:$0xff]  ;;  %v122_v43 = vld [vmem:[#allocation2 + $0xc8] sm:$0xff]  ;;  %v8247_v44 = vpack.c.bf16 %v117_v40, %v113_v35 }
  0x40   :  { %9993 = vst [vmem:[#allocation15_spill] sm:$0xff] %v8244_v39  ;;  %6009 = vmatpush1.bf16.msra.mxu0 %v8235_v30  ;;  %v126_v45 = vld [vmem:[#allocation2 + $0xe8] sm:$0xff]  ;;  %v8250_v46 = vpack.c.bf16 %v127_v38, %v123_v37  ;;  %v131_v47 = vld [vmem:[#allocation2 + $0x110] sm:$0xff]  ;;  %v121_v49 = vld [vmem:[#allocation2 + $0xc0] sm:$0xff]  ;;  %v8256_v51 = vpack.c.bf16 %v136_v42, %v132_v41 }
  0x41   :  { %9994 = vst [vmem:[#allocation16_spill] sm:$0xff] %v8247_v44  ;;  %6011 = vmatprep.subr.bf16.mxu0 %v8244_v39  ;;  %v8253_v48 = vpack.c.bf16 %v126_v45, %v122_v43  ;;  %v125_v50 = vld [vmem:[#allocation2 + $0xe0] sm:$0xff]  ;;  %v135_v52 = vld [vmem:[#allocation2 + $0x130] sm:$0xff]  ;;  %v130_v53 = vld [vmem:[#allocation2 + $0x108] sm:$0xff] }
  0x42   :  { %6045 = vmatpush1.bf16.msra.mxu1 %v8238_v32  ;;  %9995 = vst [vmem:[#allocation17_spill] sm:$0xff] %v8250_v46  ;;  %9997 = vst [vmem:[#allocation19_spill] sm:$0xff] %v8256_v51  ;;  %v134_v54 = vld [vmem:[#allocation2 + $0x128] sm:$0xff]  ;;  %v140_v55 = vld [vmem:[#allocation2 + $0x158] sm:$0xff]  ;;  %v8259_v57 = vpack.c.bf16 %v125_v50, %v121_v49  ;;  %v8262_v58 = vpack.c.bf16 %v135_v52, %v131_v47 }
  0x43   :  { %9996 = vst [vmem:[#allocation18_spill] sm:$0xff] %v8253_v48  ;;  %6047 = vmatprep.subr.bf16.mxu1 %v8242_v36  ;;  %v144_v56 = vld [vmem:[#allocation2 + $0x178] sm:$0xff]  ;;  %v139_v59 = vld [vmem:[#allocation2 + $0x150] sm:$0xff]  ;;  %v8265_v60 = vpack.c.bf16 %v134_v54, %v130_v53  ;;  %v129_v61 = vld [vmem:[#allocation2 + $0x100] sm:$0xff] }
  0x44   :  { %6013 = vmatpush1.bf16.msra.mxu0 %v8247_v44  ;;  %9998 = vst [vmem:[#allocation20_spill] sm:$0xff] %v8259_v57  ;;  %9999 = vst [vmem:[#allocation21_spill] sm:$0xff] %v8262_v58  ;;  %v133_v62 = vld [vmem:[#allocation2 + $0x120] sm:$0xff]  ;;  %v8268_v63 = vpack.c.bf16 %v144_v56, %v140_v55  ;;  %v143_v1 = vld [vmem:[#allocation2 + $0x170] sm:$0xff] }
  0x45   :  { %6015 = vmatprep.subr.bf16.mxu0 %v8253_v48  ;;  %10000 = vst [vmem:[#allocation22_spill] sm:$0xff] %v8265_v60  ;;  %v138_v2 = vld [vmem:[#allocation2 + $0x148] sm:$0xff]  ;;  %v148_v5 = vld [vmem:[#allocation2 + $0x198] sm:$0xff]  ;;  %v8271_v7 = vpack.c.bf16 %v133_v62, %v129_v61  ;;  %v8274_v10 = vpack.c.bf16 %v143_v1, %v139_v59  ;;  %v147_v11 = vld [vmem:[#allocation2 + $0x190] sm:$0xff] }
  0x46   :  { %6049 = vmatpush1.bf16.msra.mxu1 %v8250_v46  ;;  %10001 = vst [vmem:[#allocation23_spill] sm:$0xff] %v8268_v63  ;;  %v142_v3 = vld [vmem:[#allocation2 + $0x168] sm:$0xff]  ;;  %v152_v6 = vld [vmem:[#allocation2 + $0x1b8] sm:$0xff]  ;;  %v137_v13 = vld [vmem:[#allocation2 + $0x140] sm:$0xff] }
  0x47   :  { %6051 = vmatprep.subr.bf16.mxu1 %v8256_v51  ;;  %10002 = vst [vmem:[#allocation24_spill] sm:$0xff] %v8271_v7  ;;  %10003 = vst [vmem:[#allocation25_spill] sm:$0xff] %v8274_v10  ;;  %v8277_v12 = vpack.c.bf16 %v142_v3, %v138_v2  ;;  %v141_v14 = vld [vmem:[#allocation2 + $0x160] sm:$0xff]  ;;  %v8280_v15 = vpack.c.bf16 %v152_v6, %v148_v5  ;;  %v151_v19 = vld [vmem:[#allocation2 + $0x1b0] sm:$0xff] }
  0x48   :  { %6017 = vmatpush1.bf16.msra.mxu0 %v8259_v57  ;;  %v146_v20 = vld [vmem:[#allocation2 + $0x188] sm:$0xff]  ;;  %v156_v23 = vld [vmem:[#allocation2 + $0x1d8] sm:$0xff]  ;;  %v8283_v25 = vpack.c.bf16 %v141_v14, %v137_v13  ;;  %v8286_v27 = vpack.c.bf16 %v151_v19, %v147_v11  ;;  %v155_v28 = vld [vmem:[#allocation2 + $0x1d0] sm:$0xff] }
  0x49   :  { %6019 = vmatprep.subr.bf16.mxu0 %v8265_v60  ;;  %10004 = vst [vmem:[#allocation26_spill] sm:$0xff] %v8277_v12  ;;  %10005 = vst [vmem:[#allocation27_spill] sm:$0xff] %v8280_v15  ;;  %v150_v21 = vld [vmem:[#allocation2 + $0x1a8] sm:$0xff]  ;;  %v160_v24 = vld [vmem:[#allocation2 + $0x1f8] sm:$0xff] }
  0x4a   :  { %6053 = vmatpush1.bf16.msra.mxu1 %v8262_v58  ;;  %10006 = vst [vmem:[#allocation28_spill] sm:$0xff] %v8283_v25  ;;  %10007 = vst [vmem:[#allocation29_spill] sm:$0xff] %v8286_v27  ;;  %v8289_v29 = vpack.c.bf16 %v150_v21, %v146_v20  ;;  %v145_v31 = vld [vmem:[#allocation2 + $0x180] sm:$0xff]  ;;  %v8292_v34 = vpack.c.bf16 %v160_v24, %v156_v23  ;;  %v159_v35 = vld [vmem:[#allocation2 + $0x1f0] sm:$0xff] }
  0x4b   :  { %6055 = vmatprep.subr.bf16.mxu1 %v8268_v63  ;;  %v149_v33 = vld [vmem:[#allocation2 + $0x1a0] sm:$0xff]  ;;  %v154_v37 = vld [vmem:[#allocation2 + $0x1c8] sm:$0xff]  ;;  %v8304_v43 = vpack.c.bf16 %v159_v35, %v155_v28  ;;  %v88_v6 = vld [vmem:[%s9749_s1 + $0x18] sm:$0xff] }
  0x4c   :  { %6021 = vmatpush1.bf16.msra.mxu0 %v8271_v7  ;;  %10008 = vst [vmem:[#allocation30_spill] sm:$0xff] %v8289_v29  ;;  %10009 = vst [vmem:[#allocation31_spill] sm:$0xff] %v8292_v34  ;;  %v158_v38 = vld [vmem:[#allocation2 + $0x1e8] sm:$0xff]  ;;  %v8301_v42 = vpack.c.bf16 %v149_v33, %v145_v31  ;;  %v153_v47 = vld [vmem:[#allocation2 + $0x1c0] sm:$0xff] }
  0x4d   :  { %6023 = vmatprep.subr.bf16.mxu0 %v8277_v12  ;;  %v86_v40 = vld [vmem:[%s9749_s1 + $0x8] sm:$0xff]  ;;  %10011 = vst [vmem:[#allocation33_spill] sm:$0xff] %v8304_v43  ;;  %v8307_v45 = vpack.c.bf16 %v158_v38, %v154_v37  ;;  %v157_v49 = vld [vmem:[#allocation2 + $0x1e0] sm:$0xff]  ;;  %v92_v11 = vld [vmem:[%s9749_s1 + $0x38] sm:$0xff] }
  0x4e   :  { %6057 = vmatpush1.bf16.msra.mxu1 %v8274_v10  ;;  %v90_v41 = vld [vmem:[%s9749_s1 + $0x28] sm:$0xff]  ;;  %10010 = vst [vmem:[#allocation32_spill] sm:$0xff] %v8301_v42  ;;  %v85_v52 = vld [vmem:[%s9749_s1] sm:$0xff]  ;;  %v8319_v56 = vpack.c.bf16 %v157_v49, %v153_v47  ;;  %v87_v13 = vld [vmem:[%s9749_s1 + $0x10] sm:$0xff]  ;;  %v8360_v28 = vpack.c.bf16 %v92_v11, %v88_v6 }
  0x4f   :  { %6059 = vmatprep.subr.bf16.mxu1 %v8280_v15  ;;  %10012 = vst [vmem:[#allocation34_spill] sm:$0xff] %v8307_v45  ;;  %v8310_v50 = vpack.c.bf16 %v90_v41, %v86_v40  ;;  %v89_v53 = vld [vmem:[%s9749_s1 + $0x20] sm:$0xff]  ;;  %v227_v54 = vld [vmem:[#allocation6 + $0x8] sm:$0xff]  ;;  %v91_v14 = vld [vmem:[%s9749_s1 + $0x30] sm:$0xff] }
  0x50   :  { %6025 = vmatpush1.bf16.msra.mxu0 %v8283_v25  ;;  %v231_v55 = vld [vmem:[#allocation6 + $0x28] sm:$0xff]  ;;  %10014 = vst [vmem:[#allocation36_spill] sm:$0xff] %v8319_v56  ;;  %v8322_v59 = vpack.c.bf16 %v89_v53, %v85_v52  ;;  %v226_v61 = vld [vmem:[#allocation6] sm:$0xff]  ;;  %10019 = vst [vmem:[#allocation41_spill] sm:$0xff] %v8360_v28  ;;  %v8367_v37 = vpack.c.bf16 %v91_v14, %v87_v13 }
  0x51   :  { %6027 = vmatprep.subr.bf16.mxu0 %v8289_v29  ;;  %10013 = vst [vmem:[#allocation35_spill] sm:$0xff] %v8310_v50  ;;  %v230_v62 = vld [vmem:[#allocation6 + $0x20] sm:$0xff]  ;;  %v8326_v1 = vpack.c.bf16 %v231_v55, %v227_v54  ;;  %v235_v2 = vld [vmem:[#allocation6 + $0x48] sm:$0xff]  ;;  %v8378_v40 = vld [vmem:[%s9749_s1 + $0x58] sm:$0x3f] }
  0x52   :  { %6061 = vmatpush1.bf16.msra.mxu1 %v8286_v27  ;;  %10015 = vst [vmem:[#allocation37_spill] sm:$0xff] %v8322_v59  ;;  %v239_v3 = vld [vmem:[#allocation6 + $0x68] sm:$0xff]  ;;  %v8347_v19 = vpack.c.bf16 %v230_v62, %v226_v61  ;;  %v234_v21 = vld [vmem:[#allocation6 + $0x40] sm:$0xff]  ;;  %10020 = vst [vmem:[#allocation42_spill] sm:$0xff] %v8367_v37 }
  0x53   :  { %6063 = vmatprep.subr.bf16.mxu1 %v8292_v34  ;;  %10016 = vst [vmem:[#allocation38_spill] sm:$0xff] %v8326_v1  ;;  %v8331_v5 = vld [vmem:[%s9749_s1 + $0x48] sm:$0x3f]  ;;  %v8351_v20 = vpack.c.bf16 %v239_v3, %v235_v2  ;;  %v238_v23 = vld [vmem:[#allocation6 + $0x60] sm:$0xff]  ;;  %v229_v41 = vld [vmem:[#allocation6 + $0x18] sm:$0xff] }
  0x54   :  { %6029 = vmatpush1.bf16.msra.mxu0 %v8301_v42  ;;  %10017 = vst [vmem:[#allocation39_spill] sm:$0xff] %v8347_v19  ;;  %v8358_v24 = vld [vmem:[%s9749_s1 + $0x40] sm:$0x3f]  ;;  %v243_v31 = vld [vmem:[#allocation6 + $0x88] sm:$0xff]  ;;  %v8370_v38 = vpack.c.bf16 %v238_v23, %v234_v21  ;;  %v233_v47 = vld [vmem:[#allocation6 + $0x38] sm:$0xff] }
  0x55   :  { %6031 = vmatprep.subr.bf16.mxu0 %v8307_v45  ;;  %10018 = vst [vmem:[#allocation40_spill] sm:$0xff] %v8351_v20  ;;  %v247_v33 = vld [vmem:[#allocation6 + $0xa8] sm:$0xff]  ;;  %v291_v35 = vld [vmem:[%s9748_s0] sm:$0x3]  ;;  %v228_v52 = vld [vmem:[#allocation6 + $0x10] sm:$0xff]  ;;  %v8394_v62 = vpack.c.bf16 %v233_v47, %v229_v41 }
  0x56   :  { %6065 = vmatpush1.bf16.msra.mxu1 %v8304_v43  ;;  %10021 = vst [vmem:[#allocation43_spill] sm:$0xff] %v8370_v38  ;;  %v8381_v49 = vpack.c.bf16 %v247_v33, %v243_v31  ;;  %v232_v53 = vld [vmem:[#allocation6 + $0x30] sm:$0xff]  ;;  %v237_v54 = vld [vmem:[#allocation6 + $0x58] sm:$0xff]  ;;  %v242_v31 = vld [vmem:[#allocation6 + $0x80] sm:$0xff] }
  0x57   :  { %6067 = vmatprep.subr.bf16.mxu1 %v8310_v50  ;;  %v241_v55 = vld [vmem:[#allocation6 + $0x78] sm:$0xff]  ;;  %v8392_v61 = vld [vmem:[%s9749_s1 + $0x50] sm:$0x3f]  ;;  %10023 = vst [vmem:[#allocation45_spill] sm:$0xff] %v8394_v62  ;;  %v8397_v2 = vpack.c.bf16 %v232_v53, %v228_v52  ;;  %v246_v33 = vld [vmem:[#allocation6 + $0xa0] sm:$0xff] }
  0x58   :  { %6033 = vmatpush1.bf16.msra.mxu0 %v8319_v56  ;;  %10022 = vst [vmem:[#allocation44_spill] sm:$0xff] %v8381_v49  ;;  %v8400_v3 = vpack.c.bf16 %v241_v55, %v237_v54  ;;  %v236_v6 = vld [vmem:[#allocation6 + $0x50] sm:$0xff]  ;;  %v245_v13 = vld [vmem:[#allocation6 + $0x98] sm:$0xff]  ;;  %v8415_v41 = vpack.c.bf16 %v246_v33, %v242_v31  ;;  %v251_v53 = vld [vmem:[#allocation6 + $0xc8] sm:$0xff] }
  0x59   :  { %428 = vmatmul.mubr.f32.vlgmr.msra.gmra.mrb[0].mxu1 %v9762_v0  ;;  %6075 = vmatprep.subr.bf16.mxu0 %v8326_v1  ;;  %10024 = vst [vmem:[#allocation46_spill] sm:$0xff] %v8397_v2  ;;  %v240_v11 = vld [vmem:[#allocation6 + $0x70] sm:$0xff]  ;;  %v249_v14 = vld [vmem:[#allocation6 + $0xb8] sm:$0xff]  ;;  %v255_v54 = vld [vmem:[#allocation6 + $0xe8] sm:$0xff] }
  0x5a   :  { %6069 = vmatpush1.bf16.msra.mxu1 %v8322_v59  ;;  %515 = vmatprep.mubr.f32.mxu1 %v9762_v0  ;;  %10025 = vst [vmem:[#allocation47_spill] sm:$0xff] %v8400_v3  ;;  %v8407_v21 = vpack.c.bf16 %v240_v11, %v236_v6  ;;  %v8411_v23 = vpack.c.bf16 %v249_v14, %v245_v13  ;;  %10028 = vst [vmem:[#allocation50_spill] sm:$0xff] %v8415_v41  ;;  %v248_v47 = vld [vmem:[#allocation6 + $0xb0] sm:$0xff]  ;;  %v253_v55 = vld [vmem:[#allocation6 + $0xd8] sm:$0xff] }
  0x5b   :  { %5766 = vmatprep.subr.msk.mxu1 %vm438_vm0, %v8331_v5  ;;  %357 = vmatmul.mubr.f32.vlgmr.msra.gmra.mrb[0].mxu0 %v9762_v0  ;;  %v8421_v6 = vpack.c.bf16 %v255_v54, %v251_v53  ;;  %v257_v11 = vld [vmem:[#allocation6 + $0xf8] sm:$0xff]  ;;  %v250_v13 = vld [vmem:[#allocation6 + $0xc0] sm:$0xff]  ;;  %v252_v33 = vld [vmem:[#allocation6 + $0xd0] sm:$0xff] }
  0x5c   :  { %6077 = vmatpush1.bf16.msra.mxu0 %v8347_v19  ;;  %713 = vmatprep.mubr.f32.mxu0 %v9762_v0  ;;  %10026 = vst [vmem:[#allocation48_spill] sm:$0xff] %v8407_v21  ;;  %10027 = vst [vmem:[#allocation49_spill] sm:$0xff] %v8411_v23  ;;  %v254_v14 = vld [vmem:[#allocation6 + $0xe0] sm:$0xff]  ;;  %v263_v53 = vld [vmem:[#allocation6 + $0x128] sm:$0xff] }
  0x5d   :  { %6079 = vmatprep.subr.bf16.mxu0 %v8351_v20  ;;  %10030 = vst [vmem:[#allocation52_spill] sm:$0xff] %v8421_v6  ;;  %v8425_v31 = vpack.c.bf16 %v254_v14, %v250_v13  ;;  %v261_v54 = vld [vmem:[#allocation6 + $0x118] sm:$0xff]  ;;  %v262_v13 = vld [vmem:[#allocation6 + $0x120] sm:$0xff] }
  0x5e   :  { %5767 = vmatpush1.msk.msra.mxu1 %vm438_vm0, %v8358_v24 }
  0x5f   :  { %5768 = vmatmul.mubr.msk.f32.vlgmr.msra.gmra.mrb[2].mxu1 %vm434_vm1, %v291_v35  ;;  %6071 = vmatprep.subr.bf16.mxu1 %v8360_v28  ;;  %10032 = vst [vmem:[#allocation54_spill] sm:$0xff] %v8425_v31 }
  0x60   :  { %6073 = vmatpush1.bf16.msra.mxu1 %v8367_v37  ;;  %586 = vmatprep.mubr.f32.mxu1 %v9762_v0 }
  0x61   :  { %5769 = vmatprep.subr.msk.mxu1 %vm438_vm0, %v8378_v40  ;;  %6081 = vmatpush1.bf16.msra.mxu0 %v8370_v38  ;;  %v214_v38 = vld [vmem:[#allocation4 + $0x1a0] sm:$0xff] }
  0x62   :  { %6083 = vmatprep.subr.bf16.mxu0 %v8381_v49 }
  0x64   :  { %5770 = vmatpush1.msk.msra.mxu1 %vm438_vm0, %v8392_v61 }
  0x65   :  { %5771 = vmatmul.mubr.msk.f32.vlgmr.msra.gmra.mrb[0].mxu1 %vm434_vm1, %v291_v35  ;;  %6107 = vmatprep.subr.bf16.mxu1 %v8394_v62  ;;  %v244_v35 = vld [vmem:[#allocation6 + $0x90] sm:$0xff] }
  0x66   :  { %6109 = vmatpush1.bf16.msra.mxu1 %v8397_v2  ;;  %784 = vmatprep.mubr.f32.mxu1 %v9762_v0  ;;  %v8417_v52 = vpack.c.bf16 %v248_v47, %v244_v35  ;;  %v8423_v0 = vpack.c.bf16 %v257_v11, %v253_v55  ;;  %v259_v47 = vld [vmem:[#allocation6 + $0x108] sm:$0xff]  ;;  %v265_v55 = vld [vmem:[#allocation6 + $0x138] sm:$0xff]  ;;  %v258_v11 = vld [vmem:[#allocation6 + $0x100] sm:$0xff] }
  0x67   :  { %6111 = vmatprep.subr.bf16.mxu1 %v8400_v3  ;;  %6085 = vmatpush1.bf16.msra.mxu0 %v8415_v41  ;;  %v8435_v14 = vpack.c.bf16 %v265_v55, %v261_v54  ;;  %v8437_v41 = vpack.c.bf16 %v262_v13, %v258_v11  ;;  %v273_v54 = vld [vmem:[#allocation6 + $0x178] sm:$0xff]  ;;  %v266_v55 = vld [vmem:[#allocation6 + $0x140] sm:$0xff] }
  0x68   :  { %10029 = vst [vmem:[#allocation51_spill] sm:$0xff] %v8417_v52  ;;  %10031 = vst [vmem:[#allocation53_spill] sm:$0xff] %v8423_v0  ;;  %6087 = vmatprep.subr.bf16.mxu0 %v8421_v6  ;;  %v270_v11 = vld [vmem:[#allocation6 + $0x160] sm:$0xff] }
  0x69   :  { %10035 = vst [vmem:[#allocation57_spill] sm:$0xff] %v8435_v14  ;;  %10036 = vst [vmem:[#allocation58_spill] sm:$0xff] %v8437_v41  ;;  %v8449_v6 = vpack.c.bf16 %v270_v11, %v266_v55  ;;  %v278_v55 = vld [vmem:[#allocation6 + $0x1a0] sm:$0xff] }
  0x6a   :  { %6113 = vmatpush1.bf16.msra.mxu1 %v8407_v21  ;;  %v215_v21 = vld [vmem:[#allocation4 + $0x1a8] sm:$0xff] }
  0x6b   :  { %6115 = vmatprep.subr.bf16.mxu1 %v8411_v23  ;;  %v256_v23 = vld [vmem:[#allocation6 + $0xf0] sm:$0xff]  ;;  %6089 = vmatpush1.bf16.msra.mxu0 %v8425_v31  ;;  %10040 = vst [vmem:[#allocation62_spill] sm:$0xff] %v8449_v6 }
  0x6c   :  { %v8428_v35 = vpack.c.bf16 %v256_v23, %v252_v33  ;;  %v260_v23 = vld [vmem:[#allocation6 + $0x110] sm:$0xff] }
  0x6d   :  { %v264_v33 = vld [vmem:[#allocation6 + $0x130] sm:$0xff] }
  0x6e   :  { %6117 = vmatpush1.bf16.msra.mxu1 %v8417_v52  ;;  %10033 = vst [vmem:[#allocation55_spill] sm:$0xff] %v8428_v35  ;;  %v8433_v52 = vpack.c.bf16 %v263_v53, %v259_v47  ;;  %v271_v47 = vld [vmem:[#allocation6 + $0x168] sm:$0xff]  ;;  %v269_v53 = vld [vmem:[#allocation6 + $0x158] sm:$0xff] }
  0x6f   :  { %6119 = vmatprep.subr.bf16.mxu1 %v8423_v0  ;;  %v8440_v0 = vpack.c.bf16 %v264_v33, %v260_v23  ;;  %v8447_v13 = vpack.c.bf16 %v273_v54, %v269_v53  ;;  %v268_v23 = vld [vmem:[#allocation6 + $0x150] sm:$0xff]  ;;  %v281_v53 = vld [vmem:[#allocation6 + $0x1b8] sm:$0xff]  ;;  %v274_v54 = vld [vmem:[#allocation6 + $0x180] sm:$0xff] }
  0x70   :  { %10034 = vst [vmem:[#allocation56_spill] sm:$0xff] %v8433_v52  ;;  %6091 = vmatprep.subr.bf16.mxu0 %v8433_v52  ;;  %v272_v33 = vld [vmem:[#allocation6 + $0x170] sm:$0xff]  ;;  %v8461_v52 = vpack.c.bf16 %v278_v55, %v274_v54  ;;  %v286_v54 = vld [vmem:[#allocation6 + $0x1e0] sm:$0xff] }
  0x71   :  { %10037 = vst [vmem:[#allocation59_spill] sm:$0xff] %v8440_v0  ;;  %6093 = vmatpush1.bf16.msra.mxu0 %v8437_v41  ;;  %10039 = vst [vmem:[#allocation61_spill] sm:$0xff] %v8447_v13 }
  0x72   :  { %6121 = vmatpush1.bf16.msra.mxu1 %v8428_v35  ;;  %v267_v35 = vld [vmem:[#allocation6 + $0x148] sm:$0xff]  ;;  %10044 = vst [vmem:[#allocation66_spill] sm:$0xff] %v8461_v52 }
  0x73   :  { %6123 = vmatprep.subr.bf16.mxu1 %v8435_v14  ;;  %v8445_v31 = vpack.c.bf16 %v271_v47, %v267_v35  ;;  %v8452_v14 = vpack.c.bf16 %v272_v33, %v268_v23  ;;  %v279_v35 = vld [vmem:[#allocation6 + $0x1a8] sm:$0xff]  ;;  %v277_v47 = vld [vmem:[#allocation6 + $0x198] sm:$0xff]  ;;  %v276_v23 = vld [vmem:[#allocation6 + $0x190] sm:$0xff] }
  0x74   :  { %v8459_v11 = vpack.c.bf16 %v281_v53, %v277_v47  ;;  %v280_v33 = vld [vmem:[#allocation6 + $0x1b0] sm:$0xff]  ;;  %v289_v47 = vld [vmem:[#allocation6 + $0x1f8] sm:$0xff]  ;;  %v282_v53 = vld [vmem:[#allocation6 + $0x1c0] sm:$0xff] }
  0x75   :  { %10038 = vst [vmem:[#allocation60_spill] sm:$0xff] %v8445_v31  ;;  %6095 = vmatprep.subr.bf16.mxu0 %v8445_v31  ;;  %10041 = vst [vmem:[#allocation63_spill] sm:$0xff] %v8452_v14  ;;  %v8473_v31 = vpack.c.bf16 %v286_v54, %v282_v53  ;;  %v166_v53 = vld [vmem:[#allocation4 + $0x20] sm:$0xff] }
  0x76   :  { %6125 = vmatpush1.bf16.msra.mxu1 %v8440_v0  ;;  %6097 = vmatpush1.bf16.msra.mxu0 %v8449_v6  ;;  %v275_v0 = vld [vmem:[#allocation6 + $0x188] sm:$0xff]  ;;  %10043 = vst [vmem:[#allocation65_spill] sm:$0xff] %v8459_v11 }
  0x77   :  { %6127 = vmatprep.subr.bf16.mxu1 %v8447_v13  ;;  %v8457_v41 = vpack.c.bf16 %v279_v35, %v275_v0  ;;  %v8464_v13 = vpack.c.bf16 %v280_v33, %v276_v23  ;;  %v287_v0 = vld [vmem:[#allocation6 + $0x1e8] sm:$0xff]  ;;  %v285_v35 = vld [vmem:[#allocation6 + $0x1d8] sm:$0xff]  ;;  %10048 = vst [vmem:[#allocation70_spill] sm:$0xff] %v8473_v31  ;;  %v284_v23 = vld [vmem:[#allocation6 + $0x1d0] sm:$0xff] }
  0x78   :  { %v8471_v55 = vpack.c.bf16 %v289_v47, %v285_v35  ;;  %v288_v33 = vld [vmem:[#allocation6 + $0x1f0] sm:$0xff]  ;;  %v169_v35 = vld [vmem:[#allocation4 + $0x38] sm:$0xff]  ;;  %v162_v47 = vld [vmem:[#allocation4] sm:$0xff] }
  0x79   :  { %10042 = vst [vmem:[#allocation64_spill] sm:$0xff] %v8457_v41  ;;  %6099 = vmatprep.subr.bf16.mxu0 %v8457_v41  ;;  %10045 = vst [vmem:[#allocation67_spill] sm:$0xff] %v8464_v13  ;;  %v8485_v41 = vpack.c.bf16 %v166_v53, %v162_v47  ;;  %v170_v47 = vld [vmem:[#allocation4 + $0x40] sm:$0xff] }
  0x7a   :  { %6129 = vmatpush1.bf16.msra.mxu1 %v8452_v14  ;;  %6101 = vmatpush1.bf16.msra.mxu0 %v8461_v52  ;;  %v283_v14 = vld [vmem:[#allocation6 + $0x1c8] sm:$0xff]  ;;  %10047 = vst [vmem:[#allocation69_spill] sm:$0xff] %v8471_v55  ;;  %v174_v53 = vld [vmem:[#allocation4 + $0x60] sm:$0xff] }
  0x7b   :  { %6131 = vmatprep.subr.bf16.mxu1 %v8459_v11  ;;  %v8469_v6 = vpack.c.bf16 %v287_v0, %v283_v14  ;;  %v8476_v11 = vpack.c.bf16 %v288_v33, %v284_v23  ;;  %v167_v14 = vld [vmem:[#allocation4 + $0x28] sm:$0xff]  ;;  %v165_v0 = vld [vmem:[#allocation4 + $0x18] sm:$0xff]  ;;  %10052 = vst [vmem:[#allocation74_spill] sm:$0xff] %v8485_v41  ;;  %v164_v23 = vld [vmem:[#allocation4 + $0x10] sm:$0xff] }
  0x7c   :  { %v8483_v54 = vpack.c.bf16 %v169_v35, %v165_v0  ;;  %v168_v33 = vld [vmem:[#allocation4 + $0x30] sm:$0xff]  ;;  %v177_v35 = vld [vmem:[#allocation4 + $0x78] sm:$0xff] }
  0x7d   :  { %10046 = vst [vmem:[#allocation68_spill] sm:$0xff] %v8469_v6  ;;  %6103 = vmatprep.subr.bf16.mxu0 %v8469_v6  ;;  %10049 = vst [vmem:[#allocation71_spill] sm:$0xff] %v8476_v11 }
  0x7e   :  { %6133 = vmatpush1.bf16.msra.mxu1 %v8464_v13  ;;  %6105 = vmatpush1.bf16.msra.mxu0 %v8473_v31  ;;  %v163_v13 = vld [vmem:[#allocation4 + $0x8] sm:$0xff]  ;;  %10051 = vst [vmem:[#allocation73_spill] sm:$0xff] %v8483_v54  ;;  %v8489_v31 = vpack.c.bf16 %v168_v33, %v164_v23  ;;  %v8499_v23 = vpack.c.bf16 %v174_v53, %v170_v47  ;;  %v172_v33 = vld [vmem:[#allocation4 + $0x50] sm:$0xff]  ;;  %v178_v47 = vld [vmem:[#allocation4 + $0x80] sm:$0xff] }
  0x7f   :  { %6135 = vmatprep.subr.bf16.mxu1 %v8471_v55  ;;  %v8481_v52 = vpack.c.bf16 %v167_v14, %v163_v13  ;;  %v10053_v55 = vmov 0.0   ;;  %v171_v13 = vld [vmem:[#allocation4 + $0x48] sm:$0xff]  ;;  %v182_v53 = vld [vmem:[#allocation4 + $0xa0] sm:$0xff] }
  0x80   :  { %10054 = vst [vmem:[#allocation75_spill] sm:$0xff] %v8489_v31  ;;  %v175_v14 = vld [vmem:[#allocation4 + $0x68] sm:$0xff]  ;;  %10057 = vst [vmem:[#allocation78_spill] sm:$0xff] %v8499_v23  ;;  %v8513_v49 = vpack.c.bf16 %v182_v53, %v178_v47 }
  0x81   :  { %10050 = vst [vmem:[#allocation72_spill] sm:$0xff] %v8481_v52  ;;  %6139 = vmatprep.subr.bf16.mxu0 %v8481_v52  ;;  %714 = vmatmul.mubr.f32.vlgmr.msra.gmra.mrb[2].mxu0 %v10053_v55  ;;  %v8495_v0 = vpack.c.bf16 %v175_v14, %v171_v13  ;;  %v179_v13 = vld [vmem:[#allocation4 + $0x88] sm:$0xff] }
  0x82   :  { %6137 = vmatpush1.bf16.msra.mxu1 %v8476_v11  ;;  %v173_v11 = vld [vmem:[#allocation4 + $0x58] sm:$0xff]  ;;  %6141 = vmatpush1.bf16.msra.mxu0 %v8485_v41  ;;  %v183_v14 = vld [vmem:[#allocation4 + $0xa8] sm:$0xff]  ;;  %10061 = vst [vmem:[#allocation82_spill] sm:$0xff] %v8513_v49 }
  0x83   :  { %6171 = vmatprep.subr.bf16.mxu1 %v8483_v54  ;;  %10055 = vst [vmem:[#allocation76_spill] sm:$0xff] %v8495_v0  ;;  %v8497_v52 = vpack.c.bf16 %v177_v35, %v173_v11  ;;  %v176_v54 = vld [vmem:[#allocation4 + $0x70] sm:$0xff]  ;;  %855 = vmatprep.mubr.f32.mxu0 %v10053_v55  ;;  %v8509_v11 = vpack.c.bf16 %v183_v14, %v179_v13  ;;  %v185_v35 = vld [vmem:[#allocation4 + $0xb8] sm:$0xff]  ;;  %v186_v14 = vld [vmem:[#allocation4 + $0xc0] sm:$0xff] }
  0x84   :  { %6143 = vmatprep.subr.bf16.mxu0 %v8495_v0  ;;  %v8504_v41 = vpack.c.bf16 %v176_v54, %v172_v33  ;;  %v180_v54 = vld [vmem:[#allocation4 + $0x90] sm:$0xff]  ;;  %v191_v0 = vld [vmem:[#allocation4 + $0xe8] sm:$0xff] }
  0x85   :  { %785 = vmatmul.mubr.f32.vlgmr.msra.gmra.mrb[4].mxu1 %v10053_v55  ;;  %10056 = vst [vmem:[#allocation77_spill] sm:$0xff] %v8497_v52  ;;  %10059 = vst [vmem:[#allocation80_spill] sm:$0xff] %v8509_v11  ;;  %v184_v33 = vld [vmem:[#allocation4 + $0xb0] sm:$0xff] }
  0x86   :  { %6173 = vmatpush1.bf16.msra.mxu1 %v8489_v31  ;;  %926 = vmatprep.mubr.f32.mxu1 %v10053_v55  ;;  %10058 = vst [vmem:[#allocation79_spill] sm:$0xff] %v8504_v41  ;;  %v181_v31 = vld [vmem:[#allocation4 + $0x98] sm:$0xff] }
  0x87   :  { %6175 = vmatprep.subr.bf16.mxu1 %v8497_v52  ;;  %6145 = vmatpush1.bf16.msra.mxu0 %v8499_v23  ;;  %v8511_v6 = vpack.c.bf16 %v185_v35, %v181_v31  ;;  %v8516_v52 = vpack.c.bf16 %v184_v33, %v180_v54  ;;  %v187_v23 = vld [vmem:[#allocation4 + $0xc8] sm:$0xff]  ;;  %v193_v31 = vld [vmem:[#allocation4 + $0xf8] sm:$0xff]  ;;  %v190_v35 = vld [vmem:[#allocation4 + $0xe0] sm:$0xff] }
  0x88   :  { %6147 = vmatprep.subr.bf16.mxu0 %v8509_v11  ;;  %v8521_v13 = vpack.c.bf16 %v191_v0, %v187_v23  ;;  %v8525_v53 = vpack.c.bf16 %v190_v35, %v186_v14  ;;  %v188_v54 = vld [vmem:[#allocation4 + $0xd0] sm:$0xff]  ;;  %v199_v11 = vld [vmem:[#allocation4 + $0x128] sm:$0xff]  ;;  %v194_v23 = vld [vmem:[#allocation4 + $0x100] sm:$0xff] }
  0x89   :  { %10060 = vst [vmem:[#allocation81_spill] sm:$0xff] %v8511_v6  ;;  %10062 = vst [vmem:[#allocation83_spill] sm:$0xff] %v8516_v52  ;;  %v192_v33 = vld [vmem:[#allocation4 + $0xf0] sm:$0xff] }
  0x8a   :  { %6177 = vmatpush1.bf16.msra.mxu1 %v8504_v41  ;;  %v189_v41 = vld [vmem:[#allocation4 + $0xd8] sm:$0xff]  ;;  %10063 = vst [vmem:[#allocation84_spill] sm:$0xff] %v8521_v13  ;;  %10065 = vst [vmem:[#allocation86_spill] sm:$0xff] %v8525_v53 }
  0x8b   :  { %6179 = vmatprep.subr.bf16.mxu1 %v8511_v6  ;;  %6149 = vmatpush1.bf16.msra.mxu0 %v8513_v49  ;;  %v8523_v47 = vpack.c.bf16 %v193_v31, %v189_v41  ;;  %v8528_v6 = vpack.c.bf16 %v192_v33, %v188_v54  ;;  %v195_v49 = vld [vmem:[#allocation4 + $0x108] sm:$0xff]  ;;  %v201_v41 = vld [vmem:[#allocation4 + $0x138] sm:$0xff]  ;;  %v198_v31 = vld [vmem:[#allocation4 + $0x120] sm:$0xff] }
  0x8c   :  { %6151 = vmatprep.subr.bf16.mxu0 %v8521_v13  ;;  %v8533_v0 = vpack.c.bf16 %v199_v11, %v195_v49  ;;  %v8537_v35 = vpack.c.bf16 %v198_v31, %v194_v23  ;;  %v196_v54 = vld [vmem:[#allocation4 + $0x110] sm:$0xff]  ;;  %v207_v13 = vld [vmem:[#allocation4 + $0x168] sm:$0xff]  ;;  %v202_v11 = vld [vmem:[#allocation4 + $0x140] sm:$0xff] }
  0x8d   :  { %10064 = vst [vmem:[#allocation85_spill] sm:$0xff] %v8523_v47  ;;  %10066 = vst [vmem:[#allocation87_spill] sm:$0xff] %v8528_v6  ;;  %v200_v33 = vld [vmem:[#allocation4 + $0x130] sm:$0xff] }
  0x8e   :  { %6181 = vmatpush1.bf16.msra.mxu1 %v8516_v52  ;;  %v197_v52 = vld [vmem:[#allocation4 + $0x118] sm:$0xff]  ;;  %10067 = vst [vmem:[#allocation88_spill] sm:$0xff] %v8533_v0  ;;  %10069 = vst [vmem:[#allocation90_spill] sm:$0xff] %v8537_v35 }
  0x8f   :  { %6183 = vmatprep.subr.bf16.mxu1 %v8523_v47  ;;  %6153 = vmatpush1.bf16.msra.mxu0 %v8525_v53  ;;  %v8535_v14 = vpack.c.bf16 %v201_v41, %v197_v52  ;;  %v8540_v47 = vpack.c.bf16 %v200_v33, %v196_v54  ;;  %v203_v53 = vld [vmem:[#allocation4 + $0x148] sm:$0xff]  ;;  %v209_v52 = vld [vmem:[#allocation4 + $0x178] sm:$0xff]  ;;  %v206_v41 = vld [vmem:[#allocation4 + $0x160] sm:$0xff] }
  0x90   :  { %6155 = vmatprep.subr.bf16.mxu0 %v8533_v0  ;;  %v8545_v49 = vpack.c.bf16 %v207_v13, %v203_v53  ;;  %v8549_v31 = vpack.c.bf16 %v206_v41, %v202_v11  ;;  %v204_v54 = vld [vmem:[#allocation4 + $0x150] sm:$0xff]  ;;  %v211_v0 = vld [vmem:[#allocation4 + $0x188] sm:$0xff]  ;;  %v217_v53 = vld [vmem:[#allocation4 + $0x1b8] sm:$0xff] }
  0x91   :  { %10068 = vst [vmem:[#allocation89_spill] sm:$0xff] %v8535_v14  ;;  %10070 = vst [vmem:[#allocation91_spill] sm:$0xff] %v8540_v47  ;;  %v208_v33 = vld [vmem:[#allocation4 + $0x170] sm:$0xff]  ;;  %v8555_v13 = vpack.c.bf16 %v215_v21, %v211_v0  ;;  %v223_v21 = vld [vmem:[#allocation4 + $0x1e8] sm:$0xff] }
  0x92   :  { %6185 = vmatpush1.bf16.msra.mxu1 %v8528_v6  ;;  %v205_v6 = vld [vmem:[#allocation4 + $0x158] sm:$0xff]  ;;  %10071 = vst [vmem:[#allocation92_spill] sm:$0xff] %v8545_v49  ;;  %10073 = vst [vmem:[#allocation94_spill] sm:$0xff] %v8549_v31  ;;  %v212_v11 = vld [vmem:[#allocation4 + $0x190] sm:$0xff] }
  0x93   :  { %6187 = vmatprep.subr.bf16.mxu1 %v8535_v14  ;;  %6157 = vmatpush1.bf16.msra.mxu0 %v8537_v35  ;;  %v8547_v23 = vpack.c.bf16 %v209_v52, %v205_v6  ;;  %v8552_v14 = vpack.c.bf16 %v208_v33, %v204_v54  ;;  %v213_v35 = vld [vmem:[#allocation4 + $0x198] sm:$0xff]  ;;  %10075 = vst [vmem:[#allocation96_spill] sm:$0xff] %v8555_v13  ;;  %v216_v41 = vld [vmem:[#allocation4 + $0x1b0] sm:$0xff]  ;;  %v219_v54 = vld [vmem:[#allocation4 + $0x1c8] sm:$0xff] }
  0x94   :  { %6159 = vmatprep.subr.bf16.mxu0 %v8545_v49  ;;  %v8559_v6 = vpack.c.bf16 %v217_v53, %v213_v35  ;;  %v8564_v33 = vpack.c.bf16 %v216_v41, %v212_v11  ;;  %v221_v0 = vld [vmem:[#allocation4 + $0x1d8] sm:$0xff]  ;;  %v8567_v49 = vpack.c.bf16 %v223_v21, %v219_v54  ;;  %v218_v35 = vld [vmem:[#allocation4 + $0x1c0] sm:$0xff] }
  0x95   :  { %10072 = vst [vmem:[#allocation93_spill] sm:$0xff] %v8547_v23  ;;  %10074 = vst [vmem:[#allocation95_spill] sm:$0xff] %v8552_v14  ;;  %v222_v53 = vld [vmem:[#allocation4 + $0x1e0] sm:$0xff] }
  0x96   :  { %6189 = vmatpush1.bf16.msra.mxu1 %v8540_v47  ;;  %v210_v47 = vld [vmem:[#allocation4 + $0x180] sm:$0xff]  ;;  %10076 = vst [vmem:[#allocation97_spill] sm:$0xff] %v8559_v6  ;;  %10078 = vst [vmem:[#allocation99_spill] sm:$0xff] %v8564_v33 }
  0x97   :  { %6191 = vmatprep.subr.bf16.mxu1 %v8547_v23  ;;  %6161 = vmatpush1.bf16.msra.mxu0 %v8549_v31  ;;  %v8561_v52 = vpack.c.bf16 %v214_v38, %v210_v47  ;;  %v225_v23 = vld [vmem:[#allocation4 + $0x1f8] sm:$0xff]  ;;  %10079 = vst [vmem:[#allocation100_spill] sm:$0xff] %v8567_v49  ;;  %v220_v38 = vld [vmem:[#allocation4 + $0x1d0] sm:$0xff]  ;;  %v161_v21 = vld [vmem:[%s9751_s3] sm:$0xf] }
  0x98   :  { %6163 = vmatprep.subr.bf16.mxu0 %v8555_v13  ;;  %v8569_v31 = vpack.c.bf16 %v225_v23, %v221_v0  ;;  %v224_v47 = vld [vmem:[#allocation4 + $0x1f0] sm:$0xff]  ;;  %v8573_v13 = vpack.c.bf16 %v222_v53, %v218_v35  ;;  %v594_v23 = vlaneseq }
  0x99   :  { %10077 = vst [vmem:[#allocation98_spill] sm:$0xff] %v8561_v52  ;;  %v8575_v11 = vpack.c.bf16 %v224_v47, %v220_v38 }
  0x9a   :  { %6193 = vmatpush1.bf16.msra.mxu1 %v8552_v14  ;;  %10080 = vst [vmem:[#allocation101_spill] sm:$0xff] %v8569_v31  ;;  %10081 = vst [vmem:[#allocation102_spill] sm:$0xff] %v8573_v13  ;;  %v8583_v41 = vshrl.u32 %v594_v23, 7 }
  0x9b   :  { %6195 = vmatprep.subr.bf16.mxu1 %v8559_v6  ;;  %6165 = vmatpush1.bf16.msra.mxu0 %v8561_v52  ;;  %10082 = vst [vmem:[#allocation103_spill] sm:$0xff] %v8575_v11 }
  0x9c   :  { %6167 = vmatprep.subr.bf16.mxu0 %v8567_v49  ;;  %v9878_v54 = vsub.s32 0, %v8583_v41  ;;  %v9887_v0 = vsub.s32 1, %v8583_v41  ;;  %v9888_v47 = vsub.s32 2, %v8583_v41 }
  0x9e   :  { %6197 = vmatpush1.bf16.msra.mxu1 %v8564_v33  ;;  %v8592_v38 = vrot.slane %v161_v21, %v9878_v54  ;;  %v8597_v23 = vrot.slane %v161_v21, %v9887_v0  ;;  %v8602_v49 = vrot.slane %v161_v21, %v9888_v47 }
  0x9f   :  { %6199 = vmatprep.subr.bf16.mxu1 %v8569_v31  ;;  %6169 = vmatpush1.bf16.msra.mxu0 %v8573_v13 }
  0xa0   :  { %6203 = vmatprep.subr.bf16.mxu0 %v8224_v17  ;;  %10083 = vst [vmem:[#allocation104_spill] sm:$0xff] %v8597_v23  ;;  %10084 = vst [vmem:[#allocation105_spill] sm:$0xff] %v8602_v49 }
  0xa2   :  { %6201 = vmatpush1.bf16.msra.mxu1 %v8575_v11 }
  0xa3   :  { %6235 = vmatprep.subr.bf16.mxu1 %v8214_v4 }
 0x12e   :  { %v358_v35 = vpop.f32.mrb[0].mxu0 }
 0x12f   :  { %v360_v53 = vpop.f32.mrb[1].mxu0 }
 0x132   :  { %v517_v4 = vpop.f32.mrb[2].mxu1 }
 0x133   :  { %v518_v17 = vadd.f32 %v517_v4, %v358_v35  ;;  %v519_v11 = vpop.f32.mrb[3].mxu1  ;;  %v9891_v4 = vsub.s32 3, %v8583_v41 }
 0x134   :  { %v520_v13 = vadd.f32 %v519_v11, %v360_v53 }
 0x135   :  { %v614_v31 = vadd.f32 %v8592_v38, %v518_v17  ;;  %v8609_v17 = vrot.slane %v161_v21, %v9891_v4 }
 0x136   :  { %v615_v33 = vadd.f32 %v8597_v23, %v520_v13 }
 0x137   :  { %v5772_v54 = vmul.f32 -1.442695, %v614_v31  ;;  %10085 = vst [vmem:[#allocation106_spill] sm:$0xff] %v8609_v17 }
 0x138   :  { %v5773_v52 = vmul.f32 -1.442695, %v615_v33  ;;  %v588_v6 = vpop.f32.mrb[0].mxu1 }
 0x139   :  { %v616_v14 = vadd.f32 %v8602_v49, %v588_v6  ;;  %v590_v3 = vpop.f32.mrb[1].mxu1 }
 0x13a   :  { %7716 = vpow2.f32 %v5773_v52  ;;  %v617_v11 = vadd.f32 %v8609_v17, %v590_v3 }
 0x13b   :  { %v5774_v0 = vmul.f32 -1.442695, %v616_v14  ;;  %7718 = vpow2.f32 %v5772_v54 }
 0x13c   :  { %v5775_v33 = vmul.f32 -1.442695, %v617_v11 }
 0x13d   :  { %7720 = vpow2.f32 %v5774_v0 }
 0x144   :  { %v7717_v35 = vpop.eup %7716 }
 0x145   :  { %v7719_v13 = vpop.eup %7718  ;;  %v631_v53 = vadd.f32 1.0, %v7717_v35 }
 0x146   :  { %v630_v6 = vadd.f32 1.0, %v7719_v13  ;;  %v10092_v13 = vld [vmem:[#allocation51_spill] sm:$0xff] }
 0x147   :  { %v7721_v31 = vpop.eup %7720 }
 0x148   :  { %v632_v47 = vadd.f32 1.0, %v7721_v31  ;;  %v10093_v31 = vld [vmem:[#allocation52_spill] sm:$0xff] }
 0x14a   :  { %7722 = vrcp.f32 %v632_v47 }
 0x14b   :  { %7724 = vpow2.f32 %v5775_v33  ;;  %v10094_v33 = vld [vmem:[#allocation53_spill] sm:$0xff] }
 0x14c   :  { %7726 = vrcp.f32 %v631_v53  ;;  %v10095_v53 = vld [vmem:[#allocation54_spill] sm:$0xff] }
 0x14d   :  { %7728 = vrcp.f32 %v630_v6  ;;  %v10096_v6 = vld [vmem:[#allocation55_spill] sm:$0xff] }
 0x154   :  { %v7723_v14 = vpop.eup %7722 }
 0x155   :  { %v7725_v52 = vpop.eup %7724  ;;  %v642_v54 = vmul.f32 2.0, %v7723_v14  ;;  %v10097_v14 = vld [vmem:[#allocation56_spill] sm:$0xff] }
 0x156   :  { %v7727_v0 = vpop.eup %7726  ;;  %v633_v4 = vadd.f32 1.0, %v7725_v52  ;;  %v10098_v52 = vld [vmem:[#allocation57_spill] sm:$0xff] }
 0x157   :  { %v5776_v23 = vadd.f32 -1.0, %v642_v54  ;;  %v7729_v21 = vpop.eup %7728  ;;  %v644_v49 = vmul.f32 0.0, %v7727_v0  ;;  %v10099_v54 = vld [vmem:[#allocation58_spill] sm:$0xff]  ;;  %v10100_v0 = vld [vmem:[#allocation59_spill] sm:$0xff] }
 0x158   :  { %7730 = vrcp.f32 %v633_v4  ;;  %v10091_v4 = vld [vmem:[#allocation50_spill] sm:$0xff] }
 0x159   :  { %v645_v3 = vmul.f32 %v7729_v21, %v5776_v23  ;;  %v10090_v23 = vld [vmem:[#allocation49_spill] sm:$0xff]  ;;  %v10101_v21 = vld [vmem:[#allocation60_spill] sm:$0xff] }
 0x15b   :  { %v8612_v17 = vadd.f32 %v645_v3, %v644_v49  ;;  %v5782_v49 = vld [vmem:[%s9748_s0 + $0x2] sm:$0x3] }
 0x15c   :  { %v10102_v3 = vld [vmem:[#allocation61_spill] sm:$0xff] }
 0x15d   :  { %7732 = vtanh.f32 %v8612_v17 }
 0x162   :  { %v7731_v11 = vpop.eup %7730 }
 0x167   :  { %v7733_v35 = vpop.eup %7732 }
 0x168   :  { %v648_v47 = vmul.f32 %v7733_v35, %v7731_v11  ;;  %v10103_v11 = vld [vmem:[#allocation62_spill] sm:$0xff]  ;;  %v10104_v35 = vld [vmem:[#allocation63_spill] sm:$0xff] }
 0x16a   :  { %856 = vmatmul.mubr.f32.vlgmr.msra.gmra.mrb[2].mxu0 %v648_v47  ;;  %927 = vmatmul.mubr.f32.vlgmr.msra.gmra.mrb[4].mxu1 %v648_v47 }
 0x16b   :  { %6205 = vmatpush1.bf16.msra.mxu0 %v8226_v18  ;;  %6237 = vmatpush1.bf16.msra.mxu1 %v8216_v8 }
 0x16c   :  { %6207 = vmatprep.subr.bf16.mxu0 %v8232_v26  ;;  %6239 = vmatprep.subr.bf16.mxu1 %v8218_v9 }
 0x16d   :  { %1055 = vmatprep.mubr.f32.mxu0 %v10053_v55  ;;  %1126 = vmatprep.mubr.f32.mxu1 %v10053_v55 }
 0x16f   :  { %6209 = vmatpush1.bf16.msra.mxu0 %v8235_v30  ;;  %6241 = vmatpush1.bf16.msra.mxu1 %v8222_v16 }
 0x170   :  { %6211 = vmatprep.subr.bf16.mxu0 %v8244_v39  ;;  %6243 = vmatprep.subr.bf16.mxu1 %v8229_v22 }
 0x173   :  { %6213 = vmatpush1.bf16.msra.mxu0 %v8247_v44  ;;  %6245 = vmatpush1.bf16.msra.mxu1 %v8238_v32 }
 0x174   :  { %6215 = vmatprep.subr.bf16.mxu0 %v8253_v48  ;;  %6247 = vmatprep.subr.bf16.mxu1 %v8242_v36 }
 0x177   :  { %6217 = vmatpush1.bf16.msra.mxu0 %v8259_v57  ;;  %6249 = vmatpush1.bf16.msra.mxu1 %v8250_v46 }
 0x178   :  { %6219 = vmatprep.subr.bf16.mxu0 %v8265_v60  ;;  %6251 = vmatprep.subr.bf16.mxu1 %v8256_v51 }
 0x17b   :  { %6221 = vmatpush1.bf16.msra.mxu0 %v8271_v7  ;;  %6253 = vmatpush1.bf16.msra.mxu1 %v8262_v58 }
 0x17c   :  { %6223 = vmatprep.subr.bf16.mxu0 %v8277_v12  ;;  %6255 = vmatprep.subr.bf16.mxu1 %v8268_v63 }
 0x17f   :  { %6225 = vmatpush1.bf16.msra.mxu0 %v8283_v25  ;;  %6257 = vmatpush1.bf16.msra.mxu1 %v8274_v10 }
 0x180   :  { %6227 = vmatprep.subr.bf16.mxu0 %v8289_v29  ;;  %6259 = vmatprep.subr.bf16.mxu1 %v8280_v15 }
 0x183   :  { %6229 = vmatpush1.bf16.msra.mxu0 %v8301_v42  ;;  %6261 = vmatpush1.bf16.msra.mxu1 %v8286_v27 }
 0x184   :  { %6231 = vmatprep.subr.bf16.mxu0 %v8307_v45  ;;  %6263 = vmatprep.subr.bf16.mxu1 %v8292_v34 }
 0x187   :  { %6233 = vmatpush1.bf16.msra.mxu0 %v8319_v56  ;;  %6265 = vmatpush1.bf16.msra.mxu1 %v8304_v43 }
 0x188   :  { %6271 = vmatprep.subr.bf16.mxu1 %v8360_v28  ;;  %6267 = vmatprep.subr.bf16.mxu0 %v8310_v50 }
 0x18a   :  { %1056 = vmatmul.mubr.f32.vlgmr.msra.gmra.mrb[4].mxu0 %v648_v47  ;;  %1127 = vmatmul.mubr.f32.vlgmr.msra.gmra.mrb[6].mxu1 %v648_v47  ;;  %v10105_v47 = vld [vmem:[#allocation64_spill] sm:$0xff] }
 0x18b   :  { %6273 = vmatpush1.bf16.msra.mxu1 %v8367_v37  ;;  %6269 = vmatpush1.bf16.msra.mxu0 %v8322_v59 }
 0x18c   :  { %5786 = vmatprep.subr.msk.mxu1 %vm438_vm0, %v8378_v40  ;;  %5783 = vmatprep.subr.msk.mxu0 %vm438_vm0, %v8331_v5  ;;  %v10086_v5 = vld [vmem:[#allocation47_spill] sm:$0xff]  ;;  %v10088_v40 = vld [vmem:[#allocation48_spill] sm:$0xff] }
 0x18d   :  { %1200 = vmatprep.mubr.f32.mxu0 %v10053_v55  ;;  %1271 = vmatprep.mubr.f32.mxu1 %v10053_v55 }
 0x18f   :  { %5787 = vmatpush1.msk.msra.mxu1 %vm438_vm0, %v8392_v61  ;;  %5784 = vmatpush1.msk.msra.mxu0 %vm438_vm0, %v8358_v24  ;;  %v10087_v24 = vld [vmem:[#allocation43_spill] sm:$0xff]  ;;  %v10089_v61 = vld [vmem:[#allocation44_spill] sm:$0xff] }
 0x190   :  { %6275 = vmatprep.subr.bf16.mxu0 %v8326_v1  ;;  %6307 = vmatprep.subr.bf16.mxu1 %v8394_v62 }
 0x192   :  { %5785 = vmatmul.mubr.msk.f32.vlgmr.msra.gmra.mrb[4].mxu0 %vm434_vm1, %v5782_v49  ;;  %5788 = vmatmul.mubr.msk.f32.vlgmr.msra.gmra.mrb[6].mxu1 %vm434_vm1, %v5782_v49  ;;  %v10106_v49 = vld [vmem:[#allocation65_spill] sm:$0xff] }
 0x193   :  { %6277 = vmatpush1.bf16.msra.mxu0 %v8347_v19  ;;  %6309 = vmatpush1.bf16.msra.mxu1 %v8397_v2 }
 0x194   :  { %6279 = vmatprep.subr.bf16.mxu0 %v8351_v20  ;;  %6311 = vmatprep.subr.bf16.mxu1 %v10086_v5 }
 0x195   :  { %1377 = vmatprep.mubr.f32.mxu0 %v10053_v55  ;;  %1448 = vmatprep.mubr.f32.mxu1 %v10053_v55 }
 0x197   :  { %6281 = vmatpush1.bf16.msra.mxu0 %v10087_v24  ;;  %6313 = vmatpush1.bf16.msra.mxu1 %v10088_v40 }
 0x198   :  { %6283 = vmatprep.subr.bf16.mxu0 %v10089_v61  ;;  %6315 = vmatprep.subr.bf16.mxu1 %v10090_v23 }
 0x19b   :  { %6285 = vmatpush1.bf16.msra.mxu0 %v10091_v4  ;;  %6317 = vmatpush1.bf16.msra.mxu1 %v10092_v13 }
 0x19c   :  { %6287 = vmatprep.subr.bf16.mxu0 %v10093_v31  ;;  %6319 = vmatprep.subr.bf16.mxu1 %v10094_v33 }
 0x19f   :  { %6289 = vmatpush1.bf16.msra.mxu0 %v10095_v53  ;;  %6321 = vmatpush1.bf16.msra.mxu1 %v10096_v6  ;;  %v10107_v6 = vld [vmem:[#allocation66_spill] sm:$0xff] }
 0x1a0   :  { %6291 = vmatprep.subr.bf16.mxu0 %v10097_v14  ;;  %6323 = vmatprep.subr.bf16.mxu1 %v10098_v52  ;;  %v10108_v14 = vld [vmem:[#allocation67_spill] sm:$0xff]  ;;  %v10109_v52 = vld [vmem:[#allocation68_spill] sm:$0xff] }
 0x1a3   :  { %6293 = vmatpush1.bf16.msra.mxu0 %v10099_v54  ;;  %6325 = vmatpush1.bf16.msra.mxu1 %v10100_v0  ;;  %v10110_v54 = vld [vmem:[#allocation69_spill] sm:$0xff]  ;;  %v10111_v0 = vld [vmem:[#allocation70_spill] sm:$0xff] }
 0x1a4   :  { %6295 = vmatprep.subr.bf16.mxu0 %v10101_v21  ;;  %6327 = vmatprep.subr.bf16.mxu1 %v10102_v3  ;;  %v10112_v21 = vld [vmem:[#allocation71_spill] sm:$0xff]  ;;  %v10113_v3 = vld [vmem:[#allocation72_spill] sm:$0xff] }
 0x1a7   :  { %6297 = vmatpush1.bf16.msra.mxu0 %v10103_v11  ;;  %6329 = vmatpush1.bf16.msra.mxu1 %v10104_v35  ;;  %v10114_v11 = vld [vmem:[#allocation73_spill] sm:$0xff] }
 0x1a8   :  { %6299 = vmatprep.subr.bf16.mxu0 %v10105_v47  ;;  %6331 = vmatprep.subr.bf16.mxu1 %v10106_v49  ;;  %v290_v49 = vld [vmem:[%s9754_s6] sm:$0xf] }
 0x1ab   :  { %6301 = vmatpush1.bf16.msra.mxu0 %v10107_v6  ;;  %6333 = vmatpush1.bf16.msra.mxu1 %v10108_v14  ;;  %v10115_v6 = vsub.s32 0, %v8583_v41 }
 0x1ac   :  { %6303 = vmatprep.subr.bf16.mxu0 %v10109_v52  ;;  %6335 = vmatprep.subr.bf16.mxu1 %v10110_v54  ;;  %v10117_v52 = vsub.s32 2, %v8583_v41 }
 0x1ad   :  { %v8707_v47 = vrot.slane %v290_v49, %v10115_v6 }
 0x1ae   :  { %v8711_v14 = vrot.slane %v290_v49, %v10117_v52  ;;  %v10120_v52 = vsub.s32 3, %v8583_v41 }
 0x1af   :  { %6305 = vmatpush1.bf16.msra.mxu0 %v10111_v0  ;;  %6337 = vmatpush1.bf16.msra.mxu1 %v10112_v21  ;;  %10116 = vst [vmem:[#allocation107_spill] sm:$0xff] %v8707_v47  ;;  %v10119_v0 = vsub.s32 1, %v8583_v41 }
 0x1b0   :  { %6339 = vmatprep.subr.bf16.mxu0 %v10113_v3  ;;  %6371 = vmatprep.subr.bf16.mxu1 %v10114_v11  ;;  %10118 = vst [vmem:[#allocation108_spill] sm:$0xff] %v8711_v14 }
 0x1b1   :  { %v8715_v54 = vrot.slane %v290_v49, %v10119_v0  ;;  %v8722_v0 = vrot.slane %v290_v49, %v10120_v52 }
 0x1b3   :  { %10121 = vst [vmem:[#allocation109_spill] sm:$0xff] %v8722_v0 }
 0x23d   :  { %v857_v21 = vpop.f32.mrb[2].mxu0  ;;  %v928_v3 = vpop.f32.mrb[4].mxu1 }
 0x23e   :  { %v954_v11 = vadd.f32 %v8707_v47, %v857_v21  ;;  %v956_v35 = vadd.f32 %v8711_v14, %v928_v3  ;;  %v859_v53 = vpop.f32.mrb[3].mxu0  ;;  %v930_v33 = vpop.f32.mrb[5].mxu1 }
 0x23f   :  { %v955_v31 = vadd.f32 %v8715_v54, %v859_v53  ;;  %v957_v23 = vadd.f32 %v8722_v0, %v930_v33 }
 0x240   :  { %v5777_v6 = vmul.f32 -1.442695, %v954_v11  ;;  %v5779_v13 = vmul.f32 -1.442695, %v956_v35 }
 0x241   :  { %v5778_v4 = vmul.f32 -1.442695, %v955_v31  ;;  %v5780_v47 = vmul.f32 -1.442695, %v957_v23 }
 0x242   :  { %7734 = vpow2.f32 %v5777_v6 }
 0x243   :  { %7736 = vpow2.f32 %v5779_v13 }
 0x244   :  { %7738 = vpow2.f32 %v5778_v4 }
 0x24c   :  { %v7735_v61 = vpop.eup %7734 }
 0x24d   :  { %v7737_v21 = vpop.eup %7736  ;;  %v970_v24 = vadd.f32 1.0, %v7735_v61 }
 0x24e   :  { %v7739_v3 = vpop.eup %7738  ;;  %v972_v14 = vadd.f32 1.0, %v7737_v21  ;;  %v10123_v21 = vld [vmem:[#allocation104_spill] sm:$0xff] }
 0x24f   :  { %v971_v40 = vadd.f32 1.0, %v7739_v3 }
 0x250   :  { %7740 = vrcp.f32 %v972_v14 }
 0x251   :  { %7742 = vpow2.f32 %v5780_v47 }
 0x252   :  { %7744 = vrcp.f32 %v971_v40  ;;  %v10122_v40 = vld [vmem:[#allocation105_spill] sm:$0xff] }
 0x253   :  { %7746 = vrcp.f32 %v970_v24 }
 0x25a   :  { %v7741_v31 = vpop.eup %7740 }
 0x25b   :  { %v7743_v13 = vpop.eup %7742  ;;  %v982_v4 = vmul.f32 2.0, %v7741_v31 }
 0x25c   :  { %v7745_v53 = vpop.eup %7744  ;;  %v973_v35 = vadd.f32 1.0, %v7743_v13 }
 0x25d   :  { %v5781_v41 = vadd.f32 -1.0, %v982_v4  ;;  %v7747_v11 = vpop.eup %7746  ;;  %v984_v33 = vmul.f32 0.0, %v7745_v53 }
 0x25e   :  { %7748 = vrcp.f32 %v973_v35  ;;  %v10124_v35 = vld [vmem:[#allocation106_spill] sm:$0xff] }
 0x25f   :  { %v985_v49 = vmul.f32 %v7747_v11, %v5781_v41 }
 0x261   :  { %v8725_v6 = vadd.f32 %v985_v49, %v984_v33  ;;  %v10125_v33 = vld [vmem:[#allocation74_spill] sm:$0xff] }
 0x263   :  { %7750 = vtanh.f32 %v8725_v6 }
 0x265   :  { %v1202_v23 = vpop.f32.mrb[4].mxu0  ;;  %v1273_v61 = vpop.f32.mrb[6].mxu1 }
 0x266   :  { %v1278_v14 = vadd.f32 %v1202_v23, %v8592_v38  ;;  %v1280_v24 = vadd.f32 %v1273_v61, %v10122_v40  ;;  %v1204_v47 = vpop.f32.mrb[5].mxu0  ;;  %v1275_v52 = vpop.f32.mrb[7].mxu1  ;;  %v10126_v23 = vld [vmem:[#allocation75_spill] sm:$0xff]  ;;  %v10127_v61 = vld [vmem:[#allocation76_spill] sm:$0xff] }
 0x267   :  { %v1279_v3 = vadd.f32 %v1204_v47, %v10123_v21  ;;  %v1281_v49 = vadd.f32 %v1275_v52, %v10124_v35  ;;  %v10128_v47 = vld [vmem:[#allocation77_spill] sm:$0xff] }
 0x268   :  { %v5789_v31 = vmul.f32 -1.442695, %v1278_v14  ;;  %v5791_v4 = vmul.f32 -1.442695, %v1280_v24  ;;  %v7749_v53 = vpop.eup %7748 }
 0x269   :  { %v5790_v13 = vmul.f32 -1.442695, %v1279_v3  ;;  %v5792_v3 = vmul.f32 -1.442695, %v1281_v49  ;;  %v10135_v49 = vld [vmem:[#allocation84_spill] sm:$0xff] }
 0x26a   :  { %7752 = vpow2.f32 %v5789_v31  ;;  %v10129_v31 = vld [vmem:[#allocation78_spill] sm:$0xff] }
 0x26b   :  { %7754 = vpow2.f32 %v5791_v4  ;;  %v10130_v4 = vld [vmem:[#allocation79_spill] sm:$0xff] }
 0x26c   :  { %7756 = vpow2.f32 %v5790_v13 }
 0x26d   :  { %v7751_v41 = vpop.eup %7750 }
 0x26e   :  { %v988_v11 = vmul.f32 %v7751_v41, %v7749_v53  ;;  %v10131_v53 = vld [vmem:[#allocation80_spill] sm:$0xff]  ;;  %v10132_v41 = vld [vmem:[#allocation81_spill] sm:$0xff] }
 0x270   :  { %1378 = vmatmul.mubr.f32.vlgmr.msra.gmra.mrb[6].mxu0 %v988_v11  ;;  %1449 = vmatmul.mubr.f32.vlgmr.msra.gmra.mrb[8].mxu1 %v988_v11 }
 0x271   :  { %6341 = vmatpush1.bf16.msra.mxu0 %v10125_v33  ;;  %6373 = vmatpush1.bf16.msra.mxu1 %v10126_v23  ;;  %v10134_v23 = vld [vmem:[#allocation83_spill] sm:$0xff] }
 0x272   :  { %6343 = vmatprep.subr.bf16.mxu0 %v10127_v61  ;;  %6375 = vmatprep.subr.bf16.mxu1 %v10128_v47  ;;  %v10133_v47 = vld [vmem:[#allocation82_spill] sm:$0xff] }
 0x273   :  { %1519 = vmatprep.mubr.f32.mxu0 %v10053_v55  ;;  %1590 = vmatprep.mubr.f32.mxu1 %v10053_v55 }
 0x274   :  { %v7753_v14 = vpop.eup %7752 }
 0x275   :  { %v7755_v24 = vpop.eup %7754  ;;  %6345 = vmatpush1.bf16.msra.mxu0 %v10129_v31  ;;  %6377 = vmatpush1.bf16.msra.mxu1 %v10130_v4  ;;  %v1294_v61 = vadd.f32 1.0, %v7753_v14  ;;  %v10136_v31 = vld [vmem:[#allocation85_spill] sm:$0xff]  ;;  %v10137_v4 = vld [vmem:[#allocation86_spill] sm:$0xff] }
 0x276   :  { %v7757_v52 = vpop.eup %7756  ;;  %v1296_v13 = vadd.f32 1.0, %v7755_v24  ;;  %6347 = vmatprep.subr.bf16.mxu0 %v10131_v53  ;;  %6379 = vmatprep.subr.bf16.mxu1 %v10132_v41  ;;  %v10138_v24 = vld [vmem:[#allocation87_spill] sm:$0xff]  ;;  %v10139_v53 = vld [vmem:[#allocation88_spill] sm:$0xff]  ;;  %v10141_v14 = vld [vmem:[#allocation90_spill] sm:$0xff] }
 0x277   :  { %v1295_v11 = vadd.f32 1.0, %v7757_v52  ;;  %v10140_v52 = vld [vmem:[#allocation89_spill] sm:$0xff] }
 0x278   :  { %7758 = vrcp.f32 %v1296_v13 }
 0x279   :  { %7760 = vpow2.f32 %v5792_v3  ;;  %6349 = vmatpush1.bf16.msra.mxu0 %v10133_v47  ;;  %6381 = vmatpush1.bf16.msra.mxu1 %v10134_v23  ;;  %v10142_v3 = vld [vmem:[#allocation91_spill] sm:$0xff]  ;;  %v10143_v23 = vld [vmem:[#allocation92_spill] sm:$0xff] }
 0x27a   :  { %7762 = vrcp.f32 %v1295_v11  ;;  %6351 = vmatprep.subr.bf16.mxu0 %v10135_v49  ;;  %6383 = vmatprep.subr.bf16.mxu1 %v10136_v31  ;;  %v10144_v11 = vld [vmem:[#allocation93_spill] sm:$0xff] }
 0x27b   :  { %7764 = vrcp.f32 %v1294_v61 }
 0x27d   :  { %6353 = vmatpush1.bf16.msra.mxu0 %v10137_v4  ;;  %6385 = vmatpush1.bf16.msra.mxu1 %v10138_v24  ;;  %v10145_v4 = vld [vmem:[#allocation94_spill] sm:$0xff]  ;;  %v10146_v24 = vld [vmem:[#allocation95_spill] sm:$0xff] }
 0x27e   :  { %6355 = vmatprep.subr.bf16.mxu0 %v10139_v53  ;;  %6387 = vmatprep.subr.bf16.mxu1 %v10140_v52  ;;  %v10147_v52 = vld [vmem:[#allocation96_spill] sm:$0xff] }
 0x281   :  { %6357 = vmatpush1.bf16.msra.mxu0 %v10141_v14  ;;  %6389 = vmatpush1.bf16.msra.mxu1 %v10142_v3  ;;  %v10148_v14 = vld [vmem:[#allocation97_spill] sm:$0xff] }
 0x282   :  { %v7759_v13 = vpop.eup %7758  ;;  %6359 = vmatprep.subr.bf16.mxu0 %v10143_v23  ;;  %6391 = vmatprep.subr.bf16.mxu1 %v10144_v11  ;;  %v10149_v11 = vld [vmem:[#allocation98_spill] sm:$0xff] }
 0x283   :  { %v7761_v49 = vpop.eup %7760  ;;  %v1306_v31 = vmul.f32 2.0, %v7759_v13  ;;  %v10150_v13 = vld [vmem:[#allocation99_spill] sm:$0xff] }
 0x284   :  { %v7763_v61 = vpop.eup %7762  ;;  %v1297_v41 = vadd.f32 1.0, %v7761_v49  ;;  %v10153_v49 = vld [vmem:[#allocation102_spill] sm:$0xff] }
 0x285   :  { %v5793_v47 = vadd.f32 -1.0, %v1306_v31  ;;  %6361 = vmatpush1.bf16.msra.mxu0 %v10145_v4  ;;  %6393 = vmatpush1.bf16.msra.mxu1 %v10146_v24  ;;  %v7765_v53 = vpop.eup %7764  ;;  %v1308_v33 = vmul.f32 %v7763_v61, %v8612_v17  ;;  %v10151_v31 = vld [vmem:[#allocation100_spill] sm:$0xff]  ;;  %v10152_v4 = vld [vmem:[#allocation101_spill] sm:$0xff]  ;;  %v8816_v61 = vld [vmem:[%s9749_s1 + $0x48] sm:$0x3f] }
 0x286   :  { %6363 = vmatprep.subr.bf16.mxu0 %v10147_v52  ;;  %6395 = vmatprep.subr.bf16.mxu1 %v10148_v14  ;;  %7766 = vrcp.f32 %v1297_v41  ;;  %v10154_v52 = vld [vmem:[#allocation103_spill] sm:$0xff]  ;;  %v10156_v17 = vld [vmem:[#allocation9_spill] sm:$0xff]  ;;  %v8809_v41 = vld [vmem:[%s9749_s1 + $0x58] sm:$0x3f]  ;;  %10158 = vst [vmem:[#allocation104_spill] sm:$0xff] %v8816_v61 }
 0x287   :  { %v1309_v3 = vmul.f32 %v7765_v53, %v5793_v47  ;;  %v10155_v47 = vld [vmem:[#allocation11_spill] sm:$0xff]  ;;  %10157 = vst [vmem:[#allocation105_spill] sm:$0xff] %v8809_v41 }
 0x289   :  { %v8759_v23 = vadd.f32 %v1309_v3, %v1308_v33  ;;  %6365 = vmatpush1.bf16.msra.mxu0 %v10149_v11  ;;  %6397 = vmatpush1.bf16.msra.mxu1 %v10150_v13 }
 0x28a   :  { %6367 = vmatprep.subr.bf16.mxu0 %v10151_v31  ;;  %6399 = vmatprep.subr.bf16.mxu1 %v10152_v4 }
 0x28b   :  { %7768 = vtanh.f32 %v8759_v23 }
 0x28d   :  { %6369 = vmatpush1.bf16.msra.mxu0 %v10153_v49  ;;  %6401 = vmatpush1.bf16.msra.mxu1 %v10154_v52 }
 0x28e   :  { %6403 = vmatprep.subr.bf16.mxu0 %v10155_v47  ;;  %6435 = vmatprep.subr.bf16.mxu1 %v10156_v17 }
 0x290   :  { %v7767_v33 = vpop.eup %7766 }
 0x295   :  { %v7769_v53 = vpop.eup %7768 }
 0x296   :  { %v1312_v3 = vmul.f32 %v7769_v53, %v7767_v33  ;;  %v8825_v33 = vld [vmem:[%s9749_s1 + $0x50] sm:$0x3f]  ;;  %v8832_v53 = vld [vmem:[%s9749_s1 + $0x40] sm:$0x3f] }
 0x297   :  { %10159 = vst [vmem:[#allocation106_spill] sm:$0xff] %v8825_v33  ;;  %10160 = vst [vmem:[#allocation95_spill] sm:$0xff] %v8832_v53 }
 0x298   :  { %1520 = vmatmul.mubr.f32.vlgmr.msra.gmra.mrb[6].mxu0 %v1312_v3  ;;  %1591 = vmatmul.mubr.f32.vlgmr.msra.gmra.mrb[8].mxu1 %v1312_v3 }
 0x299   :  { %6405 = vmatpush1.bf16.msra.mxu0 %v8226_v18  ;;  %6437 = vmatpush1.bf16.msra.mxu1 %v8216_v8 }
 0x29a   :  { %6407 = vmatprep.subr.bf16.mxu0 %v8232_v26  ;;  %6439 = vmatprep.subr.bf16.mxu1 %v8218_v9 }
 0x29b   :  { %1698 = vmatprep.mubr.f32.mxu0 %v10053_v55  ;;  %1769 = vmatprep.mubr.f32.mxu1 %v10053_v55 }
 0x29d   :  { %6409 = vmatpush1.bf16.msra.mxu0 %v8235_v30  ;;  %6441 = vmatpush1.bf16.msra.mxu1 %v8222_v16 }
 0x29e   :  { %6411 = vmatprep.subr.bf16.mxu0 %v8244_v39  ;;  %6443 = vmatprep.subr.bf16.mxu1 %v8229_v22 }
 0x2a1   :  { %6413 = vmatpush1.bf16.msra.mxu0 %v8247_v44  ;;  %6445 = vmatpush1.bf16.msra.mxu1 %v8238_v32 }
 0x2a2   :  { %6415 = vmatprep.subr.bf16.mxu0 %v8253_v48  ;;  %6447 = vmatprep.subr.bf16.mxu1 %v8242_v36 }
 0x2a5   :  { %6417 = vmatpush1.bf16.msra.mxu0 %v8259_v57  ;;  %6449 = vmatpush1.bf16.msra.mxu1 %v8250_v46 }
 0x2a6   :  { %6419 = vmatprep.subr.bf16.mxu0 %v8265_v60  ;;  %6451 = vmatprep.subr.bf16.mxu1 %v8256_v51 }
 0x2a9   :  { %6421 = vmatpush1.bf16.msra.mxu0 %v8271_v7  ;;  %6453 = vmatpush1.bf16.msra.mxu1 %v8262_v58 }
 0x2aa   :  { %6423 = vmatprep.subr.bf16.mxu0 %v8277_v12  ;;  %6455 = vmatprep.subr.bf16.mxu1 %v8268_v63 }
 0x2ad   :  { %6425 = vmatpush1.bf16.msra.mxu0 %v8283_v25  ;;  %6457 = vmatpush1.bf16.msra.mxu1 %v8274_v10 }
 0x2ae   :  { %6427 = vmatprep.subr.bf16.mxu0 %v8289_v29  ;;  %6459 = vmatprep.subr.bf16.mxu1 %v8280_v15 }
 0x2b1   :  { %6429 = vmatpush1.bf16.msra.mxu0 %v8301_v42  ;;  %6461 = vmatpush1.bf16.msra.mxu1 %v8286_v27 }
 0x2b2   :  { %6431 = vmatprep.subr.bf16.mxu0 %v8307_v45  ;;  %6463 = vmatprep.subr.bf16.mxu1 %v8292_v34 }
 0x2b5   :  { %6433 = vmatpush1.bf16.msra.mxu0 %v8319_v56  ;;  %6465 = vmatpush1.bf16.msra.mxu1 %v8304_v43 }
 0x2b6   :  { %6471 = vmatprep.subr.bf16.mxu1 %v8360_v28  ;;  %6467 = vmatprep.subr.bf16.mxu0 %v8310_v50 }
 0x2b8   :  { %1699 = vmatmul.mubr.f32.vlgmr.msra.gmra.mrb[8].mxu0 %v1312_v3  ;;  %1770 = vmatmul.mubr.f32.vlgmr.msra.gmra.mrb[10].mxu1 %v1312_v3  ;;  %v5799_v3 = vld [vmem:[%s9748_s0 + $0x4] sm:$0x3] }
 0x2b9   :  { %6473 = vmatpush1.bf16.msra.mxu1 %v8367_v37  ;;  %6469 = vmatpush1.bf16.msra.mxu0 %v8322_v59  ;;  %v10189_v59 = vld [vmem:[#allocation107_spill] sm:$0xff]  ;;  %v10190_v37 = vld [vmem:[#allocation108_spill] sm:$0xff] }
 0x2ba   :  { %5803 = vmatprep.subr.msk.mxu1 %vm438_vm0, %v8809_v41  ;;  %5800 = vmatprep.subr.msk.mxu0 %vm438_vm0, %v8816_v61  ;;  %v10170_v61 = vld [vmem:[#allocation55_spill] sm:$0xff]  ;;  %v10171_v41 = vld [vmem:[#allocation56_spill] sm:$0xff] }
 0x2bb   :  { %1843 = vmatprep.mubr.f32.mxu0 %v10053_v55  ;;  %1914 = vmatprep.mubr.f32.mxu1 %v10053_v55 }
 0x2bd   :  { %5804 = vmatpush1.msk.msra.mxu1 %vm438_vm0, %v8825_v33  ;;  %5801 = vmatpush1.msk.msra.mxu0 %vm438_vm0, %v8832_v53  ;;  %v10161_v53 = vld [vmem:[#allocation43_spill] sm:$0xff]  ;;  %v10164_v33 = vld [vmem:[#allocation49_spill] sm:$0xff] }
 0x2be   :  { %6475 = vmatprep.subr.bf16.mxu0 %v8326_v1  ;;  %6507 = vmatprep.subr.bf16.mxu1 %v8394_v62  ;;  %v10162_v1 = vld [vmem:[#allocation48_spill] sm:$0xff] }
 0x2bf   :  { %v10163_v62 = vld [vmem:[#allocation44_spill] sm:$0xff] }
 0x2c0   :  { %5802 = vmatmul.mubr.msk.f32.vlgmr.msra.gmra.mrb[8].mxu0 %vm434_vm1, %v5799_v3  ;;  %5805 = vmatmul.mubr.msk.f32.vlgmr.msra.gmra.mrb[10].mxu1 %vm434_vm1, %v5799_v3  ;;  %v10165_v3 = vld [vmem:[#allocation50_spill] sm:$0xff] }
 0x2c1   :  { %6477 = vmatpush1.bf16.msra.mxu0 %v8347_v19  ;;  %6509 = vmatpush1.bf16.msra.mxu1 %v8397_v2  ;;  %v10166_v19 = vld [vmem:[#allocation51_spill] sm:$0xff]  ;;  %v10167_v2 = vld [vmem:[#allocation52_spill] sm:$0xff] }
 0x2c2   :  { %6479 = vmatprep.subr.bf16.mxu0 %v8351_v20  ;;  %6511 = vmatprep.subr.bf16.mxu1 %v10086_v5  ;;  %v10168_v20 = vld [vmem:[#allocation53_spill] sm:$0xff]  ;;  %v10169_v5 = vld [vmem:[#allocation54_spill] sm:$0xff] }
 0x2c3   :  { %2020 = vmatprep.mubr.f32.mxu0 %v10053_v55  ;;  %2091 = vmatprep.mubr.f32.mxu1 %v10053_v55 }
 0x2c5   :  { %6481 = vmatpush1.bf16.msra.mxu0 %v10161_v53  ;;  %6513 = vmatpush1.bf16.msra.mxu1 %v10162_v1  ;;  %v10172_v53 = vld [vmem:[#allocation57_spill] sm:$0xff]  ;;  %v10173_v1 = vld [vmem:[#allocation58_spill] sm:$0xff] }
 0x2c6   :  { %6483 = vmatprep.subr.bf16.mxu0 %v10163_v62  ;;  %6515 = vmatprep.subr.bf16.mxu1 %v10164_v33  ;;  %v10174_v62 = vld [vmem:[#allocation59_spill] sm:$0xff]  ;;  %v10175_v33 = vld [vmem:[#allocation60_spill] sm:$0xff] }
 0x2c9   :  { %6485 = vmatpush1.bf16.msra.mxu0 %v10165_v3  ;;  %6517 = vmatpush1.bf16.msra.mxu1 %v10166_v19  ;;  %v10176_v3 = vld [vmem:[#allocation61_spill] sm:$0xff]  ;;  %v10177_v19 = vld [vmem:[#allocation62_spill] sm:$0xff] }
 0x2ca   :  { %6487 = vmatprep.subr.bf16.mxu0 %v10167_v2  ;;  %6519 = vmatprep.subr.bf16.mxu1 %v10168_v20  ;;  %v10178_v2 = vld [vmem:[#allocation63_spill] sm:$0xff]  ;;  %v10179_v20 = vld [vmem:[#allocation64_spill] sm:$0xff] }
 0x2cd   :  { %6489 = vmatpush1.bf16.msra.mxu0 %v10169_v5  ;;  %6521 = vmatpush1.bf16.msra.mxu1 %v10170_v61  ;;  %v10180_v5 = vld [vmem:[#allocation65_spill] sm:$0xff]  ;;  %v10181_v61 = vld [vmem:[#allocation66_spill] sm:$0xff] }
 0x2ce   :  { %6491 = vmatprep.subr.bf16.mxu0 %v10171_v41  ;;  %6523 = vmatprep.subr.bf16.mxu1 %v10172_v53  ;;  %v10182_v41 = vld [vmem:[#allocation67_spill] sm:$0xff]  ;;  %v10183_v53 = vld [vmem:[#allocation68_spill] sm:$0xff] }
 0x2d1   :  { %6493 = vmatpush1.bf16.msra.mxu0 %v10173_v1  ;;  %6525 = vmatpush1.bf16.msra.mxu1 %v10174_v62  ;;  %v10184_v1 = vld [vmem:[#allocation69_spill] sm:$0xff]  ;;  %v10185_v62 = vld [vmem:[#allocation70_spill] sm:$0xff] }
 0x2d2   :  { %6495 = vmatprep.subr.bf16.mxu0 %v10175_v33  ;;  %6527 = vmatprep.subr.bf16.mxu1 %v10176_v3  ;;  %v10186_v33 = vld [vmem:[#allocation71_spill] sm:$0xff]  ;;  %v10187_v3 = vld [vmem:[#allocation72_spill] sm:$0xff] }
 0x2d5   :  { %6497 = vmatpush1.bf16.msra.mxu0 %v10177_v19  ;;  %6529 = vmatpush1.bf16.msra.mxu1 %v10178_v2  ;;  %v10188_v19 = vld [vmem:[#allocation73_spill] sm:$0xff] }
 0x2d6   :  { %6499 = vmatprep.subr.bf16.mxu0 %v10179_v20  ;;  %6531 = vmatprep.subr.bf16.mxu1 %v10180_v5 }
 0x2d9   :  { %6501 = vmatpush1.bf16.msra.mxu0 %v10181_v61  ;;  %6533 = vmatpush1.bf16.msra.mxu1 %v10182_v41 }
 0x2da   :  { %6503 = vmatprep.subr.bf16.mxu0 %v10183_v53  ;;  %6535 = vmatprep.subr.bf16.mxu1 %v10184_v1 }
 0x2dd   :  { %6505 = vmatpush1.bf16.msra.mxu0 %v10185_v62  ;;  %6537 = vmatpush1.bf16.msra.mxu1 %v10186_v33 }
 0x2de   :  { %6539 = vmatprep.subr.bf16.mxu0 %v10187_v3  ;;  %6571 = vmatprep.subr.bf16.mxu1 %v10188_v19 }
 0x36b   :  { %v1521_v2 = vpop.f32.mrb[6].mxu0  ;;  %v1592_v20 = vpop.f32.mrb[8].mxu1 }
 0x36c   :  { %v1597_v5 = vadd.f32 %v1521_v2, %v10189_v59  ;;  %v1599_v61 = vadd.f32 %v1592_v20, %v10190_v37  ;;  %v1523_v50 = vpop.f32.mrb[7].mxu0  ;;  %v1594_v41 = vpop.f32.mrb[9].mxu1 }
 0x36d   :  { %v1598_v53 = vadd.f32 %v1523_v50, %v8715_v54  ;;  %v1600_v3 = vadd.f32 %v1594_v41, %v8722_v0 }
 0x36e   :  { %v5794_v28 = vmul.f32 -1.442695, %v1597_v5  ;;  %v5796_v1 = vmul.f32 -1.442695, %v1599_v61 }
 0x36f   :  { %v5795_v43 = vmul.f32 -1.442695, %v1598_v53  ;;  %v5797_v62 = vmul.f32 -1.442695, %v1600_v3 }
 0x370   :  { %7770 = vpow2.f32 %v5794_v28 }
 0x371   :  { %7772 = vpow2.f32 %v5796_v1 }
 0x372   :  { %7774 = vpow2.f32 %v5795_v43 }
 0x37a   :  { %v7771_v33 = vpop.eup %7770 }
 0x37b   :  { %v7773_v19 = vpop.eup %7772  ;;  %v1613_v59 = vadd.f32 1.0, %v7771_v33 }
 0x37c   :  { %v7775_v56 = vpop.eup %7774  ;;  %v1615_v34 = vadd.f32 1.0, %v7773_v19 }
 0x37d   :  { %v1614_v2 = vadd.f32 1.0, %v7775_v56 }
 0x37e   :  { %7776 = vrcp.f32 %v1615_v34 }
 0x37f   :  { %7778 = vpow2.f32 %v5797_v62 }
 0x380   :  { %7780 = vrcp.f32 %v1614_v2 }
 0x381   :  { %7782 = vrcp.f32 %v1613_v59 }
 0x388   :  { %v7777_v50 = vpop.eup %7776 }
 0x389   :  { %v7779_v20 = vpop.eup %7778  ;;  %v1625_v5 = vmul.f32 2.0, %v7777_v50 }
 0x38a   :  { %v7781_v61 = vpop.eup %7780  ;;  %v1616_v43 = vadd.f32 1.0, %v7779_v20 }
 0x38b   :  { %v5798_v28 = vadd.f32 -1.0, %v1625_v5  ;;  %v7783_v1 = vpop.eup %7782  ;;  %v1627_v41 = vmul.f32 %v7781_v61, %v8725_v6 }
 0x38c   :  { %7784 = vrcp.f32 %v1616_v43  ;;  %v10192_v43 = vld [vmem:[#allocation75_spill] sm:$0xff] }
 0x38d   :  { %v1628_v53 = vmul.f32 %v7783_v1, %v5798_v28  ;;  %v10191_v1 = vld [vmem:[#allocation74_spill] sm:$0xff] }
 0x38f   :  { %v8882_v0 = vadd.f32 %v1628_v53, %v1627_v41  ;;  %v10193_v53 = vld [vmem:[#allocation76_spill] sm:$0xff]  ;;  %v10194_v41 = vld [vmem:[#allocation77_spill] sm:$0xff] }
 0x391   :  { %7786 = vtanh.f32 %v8882_v0 }
 0x393   :  { %v1845_v56 = vpop.f32.mrb[8].mxu0  ;;  %v1916_v34 = vpop.f32.mrb[10].mxu1 }
 0x394   :  { %v1921_v19 = vadd.f32 %v1845_v56, %v8592_v38  ;;  %v1923_v59 = vadd.f32 %v1916_v34, %v10122_v40  ;;  %v1847_v62 = vpop.f32.mrb[9].mxu0  ;;  %v1918_v33 = vpop.f32.mrb[11].mxu1 }
 0x395   :  { %v1922_v3 = vadd.f32 %v1847_v62, %v10123_v21  ;;  %v1924_v28 = vadd.f32 %v1918_v33, %v10124_v35  ;;  %v10196_v62 = vld [vmem:[#allocation79_spill] sm:$0xff] }
 0x396   :  { %v5806_v2 = vmul.f32 -1.442695, %v1921_v19  ;;  %v5808_v50 = vmul.f32 -1.442695, %v1923_v59  ;;  %v7785_v6 = vpop.eup %7784  ;;  %v10195_v59 = vld [vmem:[#allocation78_spill] sm:$0xff] }
 0x397   :  { %v5807_v20 = vmul.f32 -1.442695, %v1922_v3  ;;  %v5809_v19 = vmul.f32 -1.442695, %v1924_v28  ;;  %v10201_v28 = vld [vmem:[#allocation84_spill] sm:$0xff] }
 0x398   :  { %7788 = vpow2.f32 %v5806_v2  ;;  %v10197_v2 = vld [vmem:[#allocation80_spill] sm:$0xff] }
 0x399   :  { %7790 = vpow2.f32 %v5808_v50  ;;  %v10198_v50 = vld [vmem:[#allocation81_spill] sm:$0xff] }
 0x39a   :  { %7792 = vpow2.f32 %v5807_v20 }
 0x39b   :  { %v7787_v5 = vpop.eup %7786 }
 0x39c   :  { %v1631_v61 = vmul.f32 %v7787_v5, %v7785_v6  ;;  %v10199_v5 = vld [vmem:[#allocation82_spill] sm:$0xff] }
 0x39e   :  { %2021 = vmatmul.mubr.f32.vlgmr.msra.gmra.mrb[10].mxu0 %v1631_v61  ;;  %2092 = vmatmul.mubr.f32.vlgmr.msra.gmra.mrb[12].mxu1 %v1631_v61  ;;  %v10200_v61 = vld [vmem:[#allocation83_spill] sm:$0xff] }
 0x39f   :  { %6541 = vmatpush1.bf16.msra.mxu0 %v10191_v1  ;;  %6573 = vmatpush1.bf16.msra.mxu1 %v10192_v43 }
 0x3a0   :  { %6543 = vmatprep.subr.bf16.mxu0 %v10193_v53  ;;  %6575 = vmatprep.subr.bf16.mxu1 %v10194_v41 }
 0x3a1   :  { %2162 = vmatprep.mubr.f32.mxu0 %v10053_v55  ;;  %2233 = vmatprep.mubr.f32.mxu1 %v10053_v55 }
 0x3a2   :  { %v7789_v56 = vpop.eup %7788 }
 0x3a3   :  { %v7791_v34 = vpop.eup %7790  ;;  %6545 = vmatpush1.bf16.msra.mxu0 %v10195_v59  ;;  %6577 = vmatpush1.bf16.msra.mxu1 %v10196_v62  ;;  %v1937_v6 = vadd.f32 1.0, %v7789_v56  ;;  %v10202_v59 = vld [vmem:[#allocation85_spill] sm:$0xff]  ;;  %v10203_v62 = vld [vmem:[#allocation86_spill] sm:$0xff] }
 0x3a4   :  { %v7793_v33 = vpop.eup %7792  ;;  %v1939_v3 = vadd.f32 1.0, %v7791_v34  ;;  %6547 = vmatprep.subr.bf16.mxu0 %v10197_v2  ;;  %6579 = vmatprep.subr.bf16.mxu1 %v10198_v50  ;;  %v10204_v34 = vld [vmem:[#allocation87_spill] sm:$0xff]  ;;  %v10205_v2 = vld [vmem:[#allocation88_spill] sm:$0xff]  ;;  %v10207_v56 = vld [vmem:[#allocation90_spill] sm:$0xff] }
 0x3a5   :  { %v1938_v20 = vadd.f32 1.0, %v7793_v33  ;;  %v10206_v33 = vld [vmem:[#allocation89_spill] sm:$0xff] }
 0x3a6   :  { %7794 = vrcp.f32 %v1939_v3 }
 0x3a7   :  { %7796 = vpow2.f32 %v5809_v19  ;;  %6549 = vmatpush1.bf16.msra.mxu0 %v10199_v5  ;;  %6581 = vmatpush1.bf16.msra.mxu1 %v10200_v61  ;;  %v10208_v19 = vld [vmem:[#allocation91_spill] sm:$0xff]  ;;  %v10209_v61 = vld [vmem:[#allocation92_spill] sm:$0xff] }
 0x3a8   :  { %7798 = vrcp.f32 %v1938_v20  ;;  %6551 = vmatprep.subr.bf16.mxu0 %v10201_v28  ;;  %6583 = vmatprep.subr.bf16.mxu1 %v10202_v59  ;;  %v10210_v20 = vld [vmem:[#allocation93_spill] sm:$0xff] }
 0x3a9   :  { %7800 = vrcp.f32 %v1937_v6 }
 0x3ab   :  { %6553 = vmatpush1.bf16.msra.mxu0 %v10203_v62  ;;  %6585 = vmatpush1.bf16.msra.mxu1 %v10204_v34  ;;  %v10211_v62 = vld [vmem:[#allocation94_spill] sm:$0xff] }
 0x3ac   :  { %6555 = vmatprep.subr.bf16.mxu0 %v10205_v2  ;;  %6587 = vmatprep.subr.bf16.mxu1 %v10206_v33  ;;  %v10212_v33 = vld [vmem:[#allocation96_spill] sm:$0xff] }
 0x3af   :  { %6557 = vmatpush1.bf16.msra.mxu0 %v10207_v56  ;;  %6589 = vmatpush1.bf16.msra.mxu1 %v10208_v19 }
 0x3b0   :  { %v7795_v3 = vpop.eup %7794  ;;  %6559 = vmatprep.subr.bf16.mxu0 %v10209_v61  ;;  %6591 = vmatprep.subr.bf16.mxu1 %v10210_v20 }
 0x3b1   :  { %v7797_v28 = vpop.eup %7796  ;;  %v1949_v59 = vmul.f32 2.0, %v7795_v3  ;;  %v10218_v3 = vld [vmem:[#allocation42_spill] sm:$0xff] }
 0x3b2   :  { %v7799_v6 = vpop.eup %7798  ;;  %v1940_v34 = vadd.f32 1.0, %v7797_v28  ;;  %v10214_v28 = vld [vmem:[#allocation36_spill] sm:$0xff] }
 0x3b3   :  { %v5810_v5 = vadd.f32 -1.0, %v1949_v59  ;;  %6561 = vmatpush1.bf16.msra.mxu0 %v10211_v62  ;;  %6593 = vmatpush1.bf16.msra.mxu1 %v10146_v24  ;;  %v7801_v2 = vpop.eup %7800  ;;  %v1951_v56 = vmul.f32 %v7799_v6, %v8759_v23  ;;  %v10219_v6 = vld [vmem:[#allocation37_spill] sm:$0xff] }
 0x3b4   :  { %6563 = vmatprep.subr.bf16.mxu0 %v10212_v33  ;;  %6595 = vmatprep.subr.bf16.mxu1 %v10148_v14  ;;  %7802 = vrcp.f32 %v1940_v34  ;;  %v10215_v34 = vld [vmem:[#allocation33_spill] sm:$0xff] }
 0x3b5   :  { %v1952_v19 = vmul.f32 %v7801_v2, %v5810_v5  ;;  %v10213_v5 = vld [vmem:[#allocation31_spill] sm:$0xff] }
 0x3b7   :  { %v8916_v61 = vadd.f32 %v1952_v19, %v1951_v56  ;;  %6565 = vmatpush1.bf16.msra.mxu0 %v10149_v11  ;;  %6597 = vmatpush1.bf16.msra.mxu1 %v10150_v13  ;;  %v10216_v56 = vld [vmem:[#allocation41_spill] sm:$0xff]  ;;  %v10217_v19 = vld [vmem:[#allocation35_spill] sm:$0xff] }
 0x3b8   :  { %6567 = vmatprep.subr.bf16.mxu0 %v10151_v31  ;;  %6599 = vmatprep.subr.bf16.mxu1 %v10152_v4 }
 0x3b9   :  { %7804 = vtanh.f32 %v8916_v61 }
 0x3bb   :  { %6569 = vmatpush1.bf16.msra.mxu0 %v10153_v49  ;;  %6601 = vmatpush1.bf16.msra.mxu1 %v10154_v52 }
 0x3bc   :  { %6603 = vmatprep.subr.bf16.mxu0 %v10155_v47  ;;  %6635 = vmatprep.subr.bf16.mxu1 %v10156_v17 }
 0x3be   :  { %v7803_v23 = vpop.eup %7802 }
 0x3c3   :  { %v7805_v59 = vpop.eup %7804 }
 0x3c4   :  { %v1955_v2 = vmul.f32 %v7805_v59, %v7803_v23  ;;  %v10220_v23 = vld [vmem:[#allocation105_spill] sm:$0xff]  ;;  %v10221_v59 = vld [vmem:[#allocation104_spill] sm:$0xff] }
 0x3c6   :  { %2163 = vmatmul.mubr.f32.vlgmr.msra.gmra.mrb[10].mxu0 %v1955_v2  ;;  %2234 = vmatmul.mubr.f32.vlgmr.msra.gmra.mrb[12].mxu1 %v1955_v2 }
 0x3c7   :  { %6605 = vmatpush1.bf16.msra.mxu0 %v8226_v18  ;;  %6637 = vmatpush1.bf16.msra.mxu1 %v8216_v8 }
 0x3c8   :  { %6607 = vmatprep.subr.bf16.mxu0 %v8232_v26  ;;  %6639 = vmatprep.subr.bf16.mxu1 %v8218_v9 }
 0x3c9   :  { %2341 = vmatprep.mubr.f32.mxu0 %v10053_v55  ;;  %2412 = vmatprep.mubr.f32.mxu1 %v10053_v55 }
 0x3cb   :  { %6609 = vmatpush1.bf16.msra.mxu0 %v8235_v30  ;;  %6641 = vmatpush1.bf16.msra.mxu1 %v8222_v16 }
 0x3cc   :  { %6611 = vmatprep.subr.bf16.mxu0 %v8244_v39  ;;  %6643 = vmatprep.subr.bf16.mxu1 %v8229_v22 }
 0x3cf   :  { %6613 = vmatpush1.bf16.msra.mxu0 %v8247_v44  ;;  %6645 = vmatpush1.bf16.msra.mxu1 %v8238_v32 }
 0x3d0   :  { %6615 = vmatprep.subr.bf16.mxu0 %v8253_v48  ;;  %6647 = vmatprep.subr.bf16.mxu1 %v8242_v36 }
 0x3d3   :  { %6617 = vmatpush1.bf16.msra.mxu0 %v8259_v57  ;;  %6649 = vmatpush1.bf16.msra.mxu1 %v8250_v46 }
 0x3d4   :  { %6619 = vmatprep.subr.bf16.mxu0 %v8265_v60  ;;  %6651 = vmatprep.subr.bf16.mxu1 %v8256_v51 }
 0x3d7   :  { %6621 = vmatpush1.bf16.msra.mxu0 %v8271_v7  ;;  %6653 = vmatpush1.bf16.msra.mxu1 %v8262_v58 }
 0x3d8   :  { %6623 = vmatprep.subr.bf16.mxu0 %v8277_v12  ;;  %6655 = vmatprep.subr.bf16.mxu1 %v8268_v63 }
 0x3db   :  { %6625 = vmatpush1.bf16.msra.mxu0 %v8283_v25  ;;  %6657 = vmatpush1.bf16.msra.mxu1 %v8274_v10 }
 0x3dc   :  { %6627 = vmatprep.subr.bf16.mxu0 %v8289_v29  ;;  %6659 = vmatprep.subr.bf16.mxu1 %v8280_v15 }
 0x3df   :  { %6629 = vmatpush1.bf16.msra.mxu0 %v8301_v42  ;;  %6661 = vmatpush1.bf16.msra.mxu1 %v8286_v27  ;;  %v10258_v27 = vld [vmem:[#allocation107_spill] sm:$0xff] }
 0x3e0   :  { %6631 = vmatprep.subr.bf16.mxu0 %v8307_v45  ;;  %6663 = vmatprep.subr.bf16.mxu1 %v10213_v5  ;;  %v10239_v5 = vld [vmem:[#allocation55_spill] sm:$0xff]  ;;  %v10240_v45 = vld [vmem:[#allocation56_spill] sm:$0xff] }
 0x3e3   :  { %6633 = vmatpush1.bf16.msra.mxu0 %v10214_v28  ;;  %6665 = vmatpush1.bf16.msra.mxu1 %v10215_v34  ;;  %v10222_v34 = vld [vmem:[#allocation106_spill] sm:$0xff]  ;;  %v10233_v28 = vld [vmem:[#allocation49_spill] sm:$0xff] }
 0x3e4   :  { %6671 = vmatprep.subr.bf16.mxu1 %v10216_v56  ;;  %6667 = vmatprep.subr.bf16.mxu0 %v10217_v19  ;;  %v10223_v19 = vld [vmem:[#allocation95_spill] sm:$0xff] }
 0x3e5   :  { %v10229_v56 = vld [vmem:[#allocation47_spill] sm:$0xff] }
 0x3e6   :  { %2342 = vmatmul.mubr.f32.vlgmr.msra.gmra.mrb[12].mxu0 %v1955_v2  ;;  %2413 = vmatmul.mubr.f32.vlgmr.msra.gmra.mrb[14].mxu1 %v1955_v2  ;;  %v5816_v2 = vld [vmem:[%s9748_s0 + $0x6] sm:$0x3] }
 0x3e7   :  { %6673 = vmatpush1.bf16.msra.mxu1 %v10218_v3  ;;  %6669 = vmatpush1.bf16.msra.mxu0 %v10219_v6  ;;  %v10224_v6 = vld [vmem:[#allocation38_spill] sm:$0xff] }
 0x3e8   :  { %5820 = vmatprep.subr.msk.mxu1 %vm438_vm0, %v10220_v23  ;;  %5817 = vmatprep.subr.msk.mxu0 %vm438_vm0, %v10221_v59  ;;  %v10225_v23 = vld [vmem:[#allocation45_spill] sm:$0xff]  ;;  %v10226_v59 = vld [vmem:[#allocation39_spill] sm:$0xff]  ;;  %v10227_v3 = vld [vmem:[#allocation46_spill] sm:$0xff] }
 0x3e9   :  { %2486 = vmatprep.mubr.f32.mxu0 %v10053_v55  ;;  %2557 = vmatprep.mubr.f32.mxu1 %v10053_v55 }
 0x3eb   :  { %5821 = vmatpush1.msk.msra.mxu1 %vm438_vm0, %v10222_v34  ;;  %5818 = vmatpush1.msk.msra.mxu0 %vm438_vm0, %v10223_v19  ;;  %v10228_v34 = vld [vmem:[#allocation40_spill] sm:$0xff]  ;;  %v10230_v19 = vld [vmem:[#allocation43_spill] sm:$0xff] }
 0x3ec   :  { %6675 = vmatprep.subr.bf16.mxu0 %v10224_v6  ;;  %6707 = vmatprep.subr.bf16.mxu1 %v10225_v23  ;;  %v10231_v6 = vld [vmem:[#allocation48_spill] sm:$0xff] }
 0x3ed   :  { %v10232_v23 = vld [vmem:[#allocation44_spill] sm:$0xff] }
 0x3ee   :  { %5819 = vmatmul.mubr.msk.f32.vlgmr.msra.gmra.mrb[12].mxu0 %vm434_vm1, %v5816_v2  ;;  %5822 = vmatmul.mubr.msk.f32.vlgmr.msra.gmra.mrb[14].mxu1 %vm434_vm1, %v5816_v2  ;;  %v10234_v2 = vld [vmem:[#allocation50_spill] sm:$0xff] }
 0x3ef   :  { %6677 = vmatpush1.bf16.msra.mxu0 %v10226_v59  ;;  %6709 = vmatpush1.bf16.msra.mxu1 %v10227_v3  ;;  %v10235_v59 = vld [vmem:[#allocation51_spill] sm:$0xff]  ;;  %v10236_v3 = vld [vmem:[#allocation52_spill] sm:$0xff] }
 0x3f0   :  { %6679 = vmatprep.subr.bf16.mxu0 %v10228_v34  ;;  %6711 = vmatprep.subr.bf16.mxu1 %v10229_v56  ;;  %v10237_v34 = vld [vmem:[#allocation53_spill] sm:$0xff]  ;;  %v10238_v56 = vld [vmem:[#allocation54_spill] sm:$0xff] }
 0x3f1   :  { %2663 = vmatprep.mubr.f32.mxu0 %v10053_v55  ;;  %2734 = vmatprep.mubr.f32.mxu1 %v10053_v55 }
 0x3f3   :  { %6681 = vmatpush1.bf16.msra.mxu0 %v10230_v19  ;;  %6713 = vmatpush1.bf16.msra.mxu1 %v10231_v6  ;;  %v10241_v19 = vld [vmem:[#allocation57_spill] sm:$0xff]  ;;  %v10242_v6 = vld [vmem:[#allocation58_spill] sm:$0xff] }
 0x3f4   :  { %6683 = vmatprep.subr.bf16.mxu0 %v10232_v23  ;;  %6715 = vmatprep.subr.bf16.mxu1 %v10233_v28  ;;  %v10243_v23 = vld [vmem:[#allocation59_spill] sm:$0xff]  ;;  %v10244_v28 = vld [vmem:[#allocation60_spill] sm:$0xff] }
 0x3f7   :  { %6685 = vmatpush1.bf16.msra.mxu0 %v10234_v2  ;;  %6717 = vmatpush1.bf16.msra.mxu1 %v10235_v59  ;;  %v10245_v2 = vld [vmem:[#allocation61_spill] sm:$0xff]  ;;  %v10246_v59 = vld [vmem:[#allocation62_spill] sm:$0xff] }
 0x3f8   :  { %6687 = vmatprep.subr.bf16.mxu0 %v10236_v3  ;;  %6719 = vmatprep.subr.bf16.mxu1 %v10237_v34  ;;  %v10247_v3 = vld [vmem:[#allocation63_spill] sm:$0xff]  ;;  %v10248_v34 = vld [vmem:[#allocation64_spill] sm:$0xff] }
 0x3fb   :  { %6689 = vmatpush1.bf16.msra.mxu0 %v10238_v56  ;;  %6721 = vmatpush1.bf16.msra.mxu1 %v10239_v5  ;;  %v10249_v56 = vld [vmem:[#allocation65_spill] sm:$0xff]  ;;  %v10250_v5 = vld [vmem:[#allocation66_spill] sm:$0xff] }
 0x3fc   :  { %6691 = vmatprep.subr.bf16.mxu0 %v10240_v45  ;;  %6723 = vmatprep.subr.bf16.mxu1 %v10241_v19  ;;  %v10251_v45 = vld [vmem:[#allocation67_spill] sm:$0xff]  ;;  %v10252_v19 = vld [vmem:[#allocation68_spill] sm:$0xff] }
 0x3ff   :  { %6693 = vmatpush1.bf16.msra.mxu0 %v10242_v6  ;;  %6725 = vmatpush1.bf16.msra.mxu1 %v10243_v23  ;;  %v10253_v6 = vld [vmem:[#allocation69_spill] sm:$0xff]  ;;  %v10254_v23 = vld [vmem:[#allocation70_spill] sm:$0xff] }
 0x400   :  { %6695 = vmatprep.subr.bf16.mxu0 %v10244_v28  ;;  %6727 = vmatprep.subr.bf16.mxu1 %v10245_v2  ;;  %v10255_v28 = vld [vmem:[#allocation71_spill] sm:$0xff]  ;;  %v10256_v2 = vld [vmem:[#allocation72_spill] sm:$0xff] }
 0x403   :  { %6697 = vmatpush1.bf16.msra.mxu0 %v10246_v59  ;;  %6729 = vmatpush1.bf16.msra.mxu1 %v10247_v3  ;;  %v10257_v59 = vld [vmem:[#allocation73_spill] sm:$0xff] }
 0x404   :  { %6699 = vmatprep.subr.bf16.mxu0 %v10248_v34  ;;  %6731 = vmatprep.subr.bf16.mxu1 %v10249_v56 }
 0x407   :  { %6701 = vmatpush1.bf16.msra.mxu0 %v10250_v5  ;;  %6733 = vmatpush1.bf16.msra.mxu1 %v10251_v45 }
 0x408   :  { %6703 = vmatprep.subr.bf16.mxu0 %v10252_v19  ;;  %6735 = vmatprep.subr.bf16.mxu1 %v10253_v6 }
 0x40b   :  { %6705 = vmatpush1.bf16.msra.mxu0 %v10254_v23  ;;  %6737 = vmatpush1.bf16.msra.mxu1 %v10255_v28  ;;  %v10259_v28 = vld [vmem:[#allocation109_spill] sm:$0xff] }
 0x40c   :  { %6739 = vmatprep.subr.bf16.mxu0 %v10256_v2  ;;  %6771 = vmatprep.subr.bf16.mxu1 %v10257_v59 }
 0x499   :  { %v2164_v3 = vpop.f32.mrb[10].mxu0  ;;  %v2235_v34 = vpop.f32.mrb[12].mxu1 }
 0x49a   :  { %v2240_v56 = vadd.f32 %v2164_v3, %v10258_v27  ;;  %v2242_v5 = vadd.f32 %v2235_v34, %v10190_v37  ;;  %v2166_v42 = vpop.f32.mrb[11].mxu0  ;;  %v2237_v45 = vpop.f32.mrb[13].mxu1 }
 0x49b   :  { %v2241_v19 = vadd.f32 %v2166_v42, %v8715_v54  ;;  %v2243_v2 = vadd.f32 %v2237_v45, %v10259_v28 }
 0x49c   :  { %v5811_v15 = vmul.f32 -1.442695, %v2240_v56  ;;  %v5813_v6 = vmul.f32 -1.442695, %v2242_v5 }
 0x49d   :  { %v5812_v29 = vmul.f32 -1.442695, %v2241_v19  ;;  %v5814_v10 = vmul.f32 -1.442695, %v2243_v2 }
 0x49e   :  { %7806 = vpow2.f32 %v5811_v15 }
 0x49f   :  { %7808 = vpow2.f32 %v5813_v6 }
 0x4a0   :  { %7810 = vpow2.f32 %v5812_v29 }
 0x4a8   :  { %v7807_v23 = vpop.eup %7806 }
 0x4a9   :  { %v7809_v59 = vpop.eup %7808  ;;  %v2256_v27 = vadd.f32 1.0, %v7807_v23 }
 0x4aa   :  { %v7811_v25 = vpop.eup %7810  ;;  %v2258_v63 = vadd.f32 1.0, %v7809_v59 }
 0x4ab   :  { %v2257_v3 = vadd.f32 1.0, %v7811_v25 }
 0x4ac   :  { %7812 = vrcp.f32 %v2258_v63 }
 0x4ad   :  { %7814 = vpow2.f32 %v5814_v10 }
 0x4ae   :  { %7816 = vrcp.f32 %v2257_v3 }
 0x4af   :  { %7818 = vrcp.f32 %v2256_v27 }
 0x4b6   :  { %v7813_v42 = vpop.eup %7812 }
 0x4b7   :  { %v7815_v34 = vpop.eup %7814  ;;  %v2268_v5 = vmul.f32 2.0, %v7813_v42 }
 0x4b8   :  { %v7817_v56 = vpop.eup %7816  ;;  %v2259_v29 = vadd.f32 1.0, %v7815_v34 }
 0x4b9   :  { %v5815_v15 = vadd.f32 -1.0, %v2268_v5  ;;  %v7819_v19 = vpop.eup %7818  ;;  %v2270_v45 = vmul.f32 %v7817_v56, %v8882_v0 }
 0x4ba   :  { %7820 = vrcp.f32 %v2259_v29 }
 0x4bb   :  { %v2271_v6 = vmul.f32 %v7819_v19, %v5815_v15 }
 0x4bd   :  { %v9019_v28 = vadd.f32 %v2271_v6, %v2270_v45  ;;  %v10260_v45 = vld [vmem:[#allocation78_spill] sm:$0xff] }
 0x4bf   :  { %7822 = vtanh.f32 %v9019_v28 }
 0x4c1   :  { %v2488_v25 = vpop.f32.mrb[12].mxu0  ;;  %v2559_v63 = vpop.f32.mrb[14].mxu1 }
 0x4c2   :  { %v2564_v10 = vadd.f32 %v2488_v25, %v8592_v38  ;;  %v2566_v27 = vadd.f32 %v2559_v63, %v10122_v40  ;;  %v2490_v23 = vpop.f32.mrb[13].mxu0  ;;  %v2561_v59 = vpop.f32.mrb[15].mxu1  ;;  %v10261_v25 = vld [vmem:[#allocation79_spill] sm:$0xff] }
 0x4c3   :  { %v2565_v2 = vadd.f32 %v2490_v23, %v10123_v21  ;;  %v2567_v15 = vadd.f32 %v2561_v59, %v10124_v35 }
 0x4c4   :  { %v5823_v3 = vmul.f32 -1.442695, %v2564_v10  ;;  %v5825_v42 = vmul.f32 -1.442695, %v2566_v27  ;;  %v7821_v0 = vpop.eup %7820  ;;  %v10262_v27 = vld [vmem:[#allocation80_spill] sm:$0xff] }
 0x4c5   :  { %v5824_v34 = vmul.f32 -1.442695, %v2565_v2  ;;  %v5826_v6 = vmul.f32 -1.442695, %v2567_v15  ;;  %v10263_v2 = vld [vmem:[#allocation82_spill] sm:$0xff]  ;;  %v10270_v15 = vld [vmem:[#allocation89_spill] sm:$0xff] }
 0x4c6   :  { %7824 = vpow2.f32 %v5823_v3  ;;  %v10264_v3 = vld [vmem:[#allocation83_spill] sm:$0xff] }
 0x4c7   :  { %7826 = vpow2.f32 %v5825_v42  ;;  %v10265_v42 = vld [vmem:[#allocation84_spill] sm:$0xff] }
 0x4c8   :  { %7828 = vpow2.f32 %v5824_v34  ;;  %v10266_v34 = vld [vmem:[#allocation85_spill] sm:$0xff] }
 0x4c9   :  { %v7823_v5 = vpop.eup %7822 }
 0x4ca   :  { %v2274_v56 = vmul.f32 %v7823_v5, %v7821_v0  ;;  %v10267_v0 = vld [vmem:[#allocation86_spill] sm:$0xff]  ;;  %v10268_v5 = vld [vmem:[#allocation87_spill] sm:$0xff] }
 0x4cc   :  { %2664 = vmatmul.mubr.f32.vlgmr.msra.gmra.mrb[14].mxu0 %v2274_v56  ;;  %2735 = vmatmul.mubr.f32.vlgmr.msra.gmra.mrb[16].mxu1 %v2274_v56  ;;  %v10269_v56 = vld [vmem:[#allocation88_spill] sm:$0xff] }
 0x4cd   :  { %6741 = vmatpush1.bf16.msra.mxu0 %v10191_v1  ;;  %6773 = vmatpush1.bf16.msra.mxu1 %v10192_v43 }
 0x4ce   :  { %6743 = vmatprep.subr.bf16.mxu0 %v10193_v53  ;;  %6775 = vmatprep.subr.bf16.mxu1 %v10194_v41 }
 0x4cf   :  { %2805 = vmatprep.mubr.f32.mxu0 %v10053_v55  ;;  %2876 = vmatprep.mubr.f32.mxu1 %v10053_v55 }
 0x4d0   :  { %v7825_v19 = vpop.eup %7824 }
 0x4d1   :  { %v7827_v29 = vpop.eup %7826  ;;  %6745 = vmatpush1.bf16.msra.mxu0 %v10260_v45  ;;  %6777 = vmatpush1.bf16.msra.mxu1 %v10261_v25  ;;  %v2580_v59 = vadd.f32 1.0, %v7825_v19  ;;  %v10271_v19 = vld [vmem:[#allocation90_spill] sm:$0xff] }
 0x4d2   :  { %v7829_v63 = vpop.eup %7828  ;;  %v2582_v10 = vadd.f32 1.0, %v7827_v29  ;;  %6747 = vmatprep.subr.bf16.mxu0 %v10262_v27  ;;  %6779 = vmatprep.subr.bf16.mxu1 %v10198_v50  ;;  %v10272_v29 = vld [vmem:[#allocation91_spill] sm:$0xff] }
 0x4d3   :  { %v2581_v23 = vadd.f32 1.0, %v7829_v63  ;;  %v10273_v63 = vld [vmem:[#allocation92_spill] sm:$0xff] }
 0x4d4   :  { %7830 = vrcp.f32 %v2582_v10 }
 0x4d5   :  { %7832 = vpow2.f32 %v5826_v6  ;;  %6749 = vmatpush1.bf16.msra.mxu0 %v10263_v2  ;;  %6781 = vmatpush1.bf16.msra.mxu1 %v10264_v3 }
 0x4d6   :  { %7834 = vrcp.f32 %v2581_v23  ;;  %6751 = vmatprep.subr.bf16.mxu0 %v10265_v42  ;;  %6783 = vmatprep.subr.bf16.mxu1 %v10266_v34 }
 0x4d7   :  { %7836 = vrcp.f32 %v2580_v59 }
 0x4d9   :  { %6753 = vmatpush1.bf16.msra.mxu0 %v10267_v0  ;;  %6785 = vmatpush1.bf16.msra.mxu1 %v10268_v5 }
 0x4da   :  { %6755 = vmatprep.subr.bf16.mxu0 %v10269_v56  ;;  %6787 = vmatprep.subr.bf16.mxu1 %v10270_v15 }
 0x4dd   :  { %6757 = vmatpush1.bf16.msra.mxu0 %v10271_v19  ;;  %6789 = vmatpush1.bf16.msra.mxu1 %v10272_v29 }
 0x4de   :  { %v7831_v6 = vpop.eup %7830  ;;  %6759 = vmatprep.subr.bf16.mxu0 %v10273_v63  ;;  %6791 = vmatprep.subr.bf16.mxu1 %v10210_v20 }
 0x4df   :  { %v7833_v10 = vpop.eup %7832  ;;  %v2592_v23 = vmul.f32 2.0, %v7831_v6  ;;  %v10277_v6 = vld [vmem:[#allocation30_spill] sm:$0xff] }
 0x4e0   :  { %v7835_v59 = vpop.eup %7834  ;;  %v2583_v5 = vadd.f32 1.0, %v7833_v10  ;;  %v10278_v10 = vld [vmem:[#allocation27_spill] sm:$0xff] }
 0x4e1   :  { %v5827_v34 = vadd.f32 -1.0, %v2592_v23  ;;  %6761 = vmatpush1.bf16.msra.mxu0 %v10211_v62  ;;  %6793 = vmatpush1.bf16.msra.mxu1 %v10146_v24  ;;  %v7837_v56 = vpop.eup %7836  ;;  %v2594_v19 = vmul.f32 %v7835_v59, %v8916_v61  ;;  %v10279_v23 = vld [vmem:[#allocation32_spill] sm:$0xff]  ;;  %v10280_v59 = vld [vmem:[#allocation29_spill] sm:$0xff] }
 0x4e2   :  { %6763 = vmatprep.subr.bf16.mxu0 %v10212_v33  ;;  %6795 = vmatprep.subr.bf16.mxu1 %v10148_v14  ;;  %7838 = vrcp.f32 %v2583_v5  ;;  %v10274_v5 = vld [vmem:[#allocation23_spill] sm:$0xff] }
 0x4e3   :  { %v2595_v29 = vmul.f32 %v7837_v56, %v5827_v34 }
 0x4e5   :  { %v9053_v63 = vadd.f32 %v2595_v29, %v2594_v19  ;;  %6765 = vmatpush1.bf16.msra.mxu0 %v10149_v11  ;;  %6797 = vmatpush1.bf16.msra.mxu1 %v10150_v13  ;;  %v10275_v19 = vld [vmem:[#allocation28_spill] sm:$0xff]  ;;  %v10276_v29 = vld [vmem:[#allocation25_spill] sm:$0xff] }
 0x4e6   :  { %6767 = vmatprep.subr.bf16.mxu0 %v10151_v31  ;;  %6799 = vmatprep.subr.bf16.mxu1 %v10152_v4 }
 0x4e7   :  { %7840 = vtanh.f32 %v9053_v63 }
 0x4e9   :  { %6769 = vmatpush1.bf16.msra.mxu0 %v10153_v49  ;;  %6801 = vmatpush1.bf16.msra.mxu1 %v10154_v52 }
 0x4ea   :  { %6803 = vmatprep.subr.bf16.mxu0 %v10155_v47  ;;  %6835 = vmatprep.subr.bf16.mxu1 %v10156_v17 }
 0x4ec   :  { %v7839_v61 = vpop.eup %7838 }
 0x4f1   :  { %v7841_v34 = vpop.eup %7840 }
 0x4f2   :  { %v2598_v56 = vmul.f32 %v7841_v34, %v7839_v61  ;;  %v10281_v61 = vld [vmem:[#allocation34_spill] sm:$0xff]  ;;  %v10282_v34 = vld [vmem:[#allocation31_spill] sm:$0xff] }
 0x4f4   :  { %2806 = vmatmul.mubr.f32.vlgmr.msra.gmra.mrb[14].mxu0 %v2598_v56  ;;  %2877 = vmatmul.mubr.f32.vlgmr.msra.gmra.mrb[16].mxu1 %v2598_v56 }
 0x4f5   :  { %6805 = vmatpush1.bf16.msra.mxu0 %v8226_v18  ;;  %6837 = vmatpush1.bf16.msra.mxu1 %v8216_v8 }
 0x4f6   :  { %6807 = vmatprep.subr.bf16.mxu0 %v8232_v26  ;;  %6839 = vmatprep.subr.bf16.mxu1 %v8218_v9 }
 0x4f7   :  { %2984 = vmatprep.mubr.f32.mxu0 %v10053_v55  ;;  %3055 = vmatprep.mubr.f32.mxu1 %v10053_v55 }
 0x4f9   :  { %6809 = vmatpush1.bf16.msra.mxu0 %v8235_v30  ;;  %6841 = vmatpush1.bf16.msra.mxu1 %v8222_v16 }
 0x4fa   :  { %6811 = vmatprep.subr.bf16.mxu0 %v8244_v39  ;;  %6843 = vmatprep.subr.bf16.mxu1 %v8229_v22 }
 0x4fd   :  { %6813 = vmatpush1.bf16.msra.mxu0 %v8247_v44  ;;  %6845 = vmatpush1.bf16.msra.mxu1 %v8238_v32 }
 0x4fe   :  { %6815 = vmatprep.subr.bf16.mxu0 %v8253_v48  ;;  %6847 = vmatprep.subr.bf16.mxu1 %v8242_v36 }
 0x501   :  { %6817 = vmatpush1.bf16.msra.mxu0 %v8259_v57  ;;  %6849 = vmatpush1.bf16.msra.mxu1 %v8250_v46 }
 0x502   :  { %6819 = vmatprep.subr.bf16.mxu0 %v8265_v60  ;;  %6851 = vmatprep.subr.bf16.mxu1 %v8256_v51 }
 0x505   :  { %6821 = vmatpush1.bf16.msra.mxu0 %v8271_v7  ;;  %6853 = vmatpush1.bf16.msra.mxu1 %v8262_v58  ;;  %v10283_v58 = vld [vmem:[#allocation36_spill] sm:$0xff] }
 0x506   :  { %6823 = vmatprep.subr.bf16.mxu0 %v8277_v12  ;;  %6855 = vmatprep.subr.bf16.mxu1 %v10274_v5  ;;  %v10284_v12 = vld [vmem:[#allocation33_spill] sm:$0xff] }
 0x507   :  { %v10285_v5 = vld [vmem:[#allocation41_spill] sm:$0xff] }
 0x509   :  { %6825 = vmatpush1.bf16.msra.mxu0 %v10275_v19  ;;  %6857 = vmatpush1.bf16.msra.mxu1 %v10276_v29  ;;  %v10286_v19 = vld [vmem:[#allocation35_spill] sm:$0xff] }
 0x50a   :  { %6827 = vmatprep.subr.bf16.mxu0 %v10277_v6  ;;  %6859 = vmatprep.subr.bf16.mxu1 %v10278_v10  ;;  %v10287_v6 = vld [vmem:[#allocation42_spill] sm:$0xff]  ;;  %v10288_v10 = vld [vmem:[#allocation37_spill] sm:$0xff]  ;;  %v10327_v29 = vld [vmem:[#allocation107_spill] sm:$0xff] }
 0x50d   :  { %6829 = vmatpush1.bf16.msra.mxu0 %v10279_v23  ;;  %6861 = vmatpush1.bf16.msra.mxu1 %v10280_v59  ;;  %v10289_v23 = vld [vmem:[#allocation105_spill] sm:$0xff]  ;;  %v10309_v59 = vld [vmem:[#allocation56_spill] sm:$0xff] }
 0x50e   :  { %6831 = vmatprep.subr.bf16.mxu0 %v10281_v61  ;;  %6863 = vmatprep.subr.bf16.mxu1 %v10282_v34  ;;  %v10290_v61 = vld [vmem:[#allocation104_spill] sm:$0xff]  ;;  %v10308_v34 = vld [vmem:[#allocation55_spill] sm:$0xff] }
 0x511   :  { %6833 = vmatpush1.bf16.msra.mxu0 %v10283_v58  ;;  %6865 = vmatpush1.bf16.msra.mxu1 %v10284_v12  ;;  %v10291_v12 = vld [vmem:[#allocation106_spill] sm:$0xff]  ;;  %v10302_v58 = vld [vmem:[#allocation49_spill] sm:$0xff] }
 0x512   :  { %6871 = vmatprep.subr.bf16.mxu1 %v10285_v5  ;;  %6867 = vmatprep.subr.bf16.mxu0 %v10286_v19  ;;  %v10292_v19 = vld [vmem:[#allocation95_spill] sm:$0xff] }
 0x513   :  { %v10298_v5 = vld [vmem:[#allocation47_spill] sm:$0xff] }
 0x514   :  { %2985 = vmatmul.mubr.f32.vlgmr.msra.gmra.mrb[16].mxu0 %v2598_v56  ;;  %3056 = vmatmul.mubr.f32.vlgmr.msra.gmra.mrb[18].mxu1 %v2598_v56  ;;  %v5833_v56 = vld [vmem:[%s9748_s0 + $0x8] sm:$0x3] }
 0x515   :  { %6873 = vmatpush1.bf16.msra.mxu1 %v10287_v6  ;;  %6869 = vmatpush1.bf16.msra.mxu0 %v10288_v10  ;;  %v10293_v10 = vld [vmem:[#allocation38_spill] sm:$0xff] }
 0x516   :  { %5837 = vmatprep.subr.msk.mxu1 %vm438_vm0, %v10289_v23  ;;  %5834 = vmatprep.subr.msk.mxu0 %vm438_vm0, %v10290_v61  ;;  %v10294_v23 = vld [vmem:[#allocation45_spill] sm:$0xff]  ;;  %v10295_v61 = vld [vmem:[#allocation39_spill] sm:$0xff]  ;;  %v10296_v6 = vld [vmem:[#allocation46_spill] sm:$0xff] }
 0x517   :  { %3129 = vmatprep.mubr.f32.mxu0 %v10053_v55  ;;  %3200 = vmatprep.mubr.f32.mxu1 %v10053_v55 }
 0x519   :  { %5838 = vmatpush1.msk.msra.mxu1 %vm438_vm0, %v10291_v12  ;;  %5835 = vmatpush1.msk.msra.mxu0 %vm438_vm0, %v10292_v19  ;;  %v10297_v12 = vld [vmem:[#allocation40_spill] sm:$0xff]  ;;  %v10299_v19 = vld [vmem:[#allocation43_spill] sm:$0xff] }
 0x51a   :  { %6875 = vmatprep.subr.bf16.mxu0 %v10293_v10  ;;  %6907 = vmatprep.subr.bf16.mxu1 %v10294_v23  ;;  %v10300_v10 = vld [vmem:[#allocation48_spill] sm:$0xff] }
 0x51b   :  { %v10301_v23 = vld [vmem:[#allocation44_spill] sm:$0xff] }
 0x51c   :  { %5836 = vmatmul.mubr.msk.f32.vlgmr.msra.gmra.mrb[16].mxu0 %vm434_vm1, %v5833_v56  ;;  %5839 = vmatmul.mubr.msk.f32.vlgmr.msra.gmra.mrb[18].mxu1 %vm434_vm1, %v5833_v56  ;;  %v10303_v56 = vld [vmem:[#allocation50_spill] sm:$0xff] }
 0x51d   :  { %6877 = vmatpush1.bf16.msra.mxu0 %v10295_v61  ;;  %6909 = vmatpush1.bf16.msra.mxu1 %v10296_v6  ;;  %v10304_v61 = vld [vmem:[#allocation51_spill] sm:$0xff]  ;;  %v10305_v6 = vld [vmem:[#allocation52_spill] sm:$0xff] }
 0x51e   :  { %6879 = vmatprep.subr.bf16.mxu0 %v10297_v12  ;;  %6911 = vmatprep.subr.bf16.mxu1 %v10298_v5  ;;  %v10306_v12 = vld [vmem:[#allocation53_spill] sm:$0xff]  ;;  %v10307_v5 = vld [vmem:[#allocation54_spill] sm:$0xff] }
 0x51f   :  { %3306 = vmatprep.mubr.f32.mxu0 %v10053_v55  ;;  %3377 = vmatprep.mubr.f32.mxu1 %v10053_v55 }
 0x521   :  { %6881 = vmatpush1.bf16.msra.mxu0 %v10299_v19  ;;  %6913 = vmatpush1.bf16.msra.mxu1 %v10300_v10  ;;  %v10310_v19 = vld [vmem:[#allocation57_spill] sm:$0xff]  ;;  %v10311_v10 = vld [vmem:[#allocation58_spill] sm:$0xff] }
 0x522   :  { %6883 = vmatprep.subr.bf16.mxu0 %v10301_v23  ;;  %6915 = vmatprep.subr.bf16.mxu1 %v10302_v58  ;;  %v10312_v23 = vld [vmem:[#allocation59_spill] sm:$0xff]  ;;  %v10313_v58 = vld [vmem:[#allocation60_spill] sm:$0xff] }
 0x525   :  { %6885 = vmatpush1.bf16.msra.mxu0 %v10303_v56  ;;  %6917 = vmatpush1.bf16.msra.mxu1 %v10304_v61  ;;  %v10314_v56 = vld [vmem:[#allocation61_spill] sm:$0xff]  ;;  %v10315_v61 = vld [vmem:[#allocation62_spill] sm:$0xff] }
 0x526   :  { %6887 = vmatprep.subr.bf16.mxu0 %v10305_v6  ;;  %6919 = vmatprep.subr.bf16.mxu1 %v10306_v12  ;;  %v10316_v6 = vld [vmem:[#allocation63_spill] sm:$0xff]  ;;  %v10317_v12 = vld [vmem:[#allocation64_spill] sm:$0xff] }
 0x529   :  { %6889 = vmatpush1.bf16.msra.mxu0 %v10307_v5  ;;  %6921 = vmatpush1.bf16.msra.mxu1 %v10308_v34  ;;  %v10318_v5 = vld [vmem:[#allocation65_spill] sm:$0xff]  ;;  %v10319_v34 = vld [vmem:[#allocation66_spill] sm:$0xff] }
 0x52a   :  { %6891 = vmatprep.subr.bf16.mxu0 %v10309_v59  ;;  %6923 = vmatprep.subr.bf16.mxu1 %v10310_v19  ;;  %v10320_v59 = vld [vmem:[#allocation67_spill] sm:$0xff]  ;;  %v10321_v19 = vld [vmem:[#allocation68_spill] sm:$0xff] }
 0x52d   :  { %6893 = vmatpush1.bf16.msra.mxu0 %v10311_v10  ;;  %6925 = vmatpush1.bf16.msra.mxu1 %v10312_v23  ;;  %v10322_v10 = vld [vmem:[#allocation69_spill] sm:$0xff]  ;;  %v10323_v23 = vld [vmem:[#allocation70_spill] sm:$0xff] }
 0x52e   :  { %6895 = vmatprep.subr.bf16.mxu0 %v10313_v58  ;;  %6927 = vmatprep.subr.bf16.mxu1 %v10314_v56  ;;  %v10324_v58 = vld [vmem:[#allocation71_spill] sm:$0xff]  ;;  %v10325_v56 = vld [vmem:[#allocation72_spill] sm:$0xff] }
 0x531   :  { %6897 = vmatpush1.bf16.msra.mxu0 %v10315_v61  ;;  %6929 = vmatpush1.bf16.msra.mxu1 %v10316_v6  ;;  %v10326_v61 = vld [vmem:[#allocation73_spill] sm:$0xff] }
 0x532   :  { %6899 = vmatprep.subr.bf16.mxu0 %v10317_v12  ;;  %6931 = vmatprep.subr.bf16.mxu1 %v10318_v5 }
 0x535   :  { %6901 = vmatpush1.bf16.msra.mxu0 %v10319_v34  ;;  %6933 = vmatpush1.bf16.msra.mxu1 %v10320_v59 }
 0x536   :  { %6903 = vmatprep.subr.bf16.mxu0 %v10321_v19  ;;  %6935 = vmatprep.subr.bf16.mxu1 %v10322_v10 }
 0x539   :  { %6905 = vmatpush1.bf16.msra.mxu0 %v10323_v23  ;;  %6937 = vmatpush1.bf16.msra.mxu1 %v10324_v58  ;;  %v10328_v58 = vld [vmem:[#allocation109_spill] sm:$0xff] }
 0x53a   :  { %6939 = vmatprep.subr.bf16.mxu0 %v10325_v56  ;;  %6971 = vmatprep.subr.bf16.mxu1 %v10326_v61 }
 0x5c7   :  { %v2807_v6 = vpop.f32.mrb[14].mxu0  ;;  %v2878_v12 = vpop.f32.mrb[16].mxu1 }
 0x5c8   :  { %v2883_v5 = vadd.f32 %v2807_v6, %v10327_v29  ;;  %v2885_v34 = vadd.f32 %v2878_v12, %v10190_v37  ;;  %v2809_v7 = vpop.f32.mrb[15].mxu0  ;;  %v2880_v59 = vpop.f32.mrb[17].mxu1 }
 0x5c9   :  { %v2884_v19 = vadd.f32 %v2809_v7, %v8715_v54  ;;  %v2886_v56 = vadd.f32 %v2880_v59, %v10328_v58 }
 0x5ca   :  { %v5828_v51 = vmul.f32 -1.442695, %v2883_v5  ;;  %v5830_v10 = vmul.f32 -1.442695, %v2885_v34 }
 0x5cb   :  { %v5829_v60 = vmul.f32 -1.442695, %v2884_v19  ;;  %v5831_v46 = vmul.f32 -1.442695, %v2886_v56 }
 0x5cc   :  { %7842 = vpow2.f32 %v5828_v51 }
 0x5cd   :  { %7844 = vpow2.f32 %v5830_v10 }
 0x5ce   :  { %7846 = vpow2.f32 %v5829_v60 }
 0x5d6   :  { %v7843_v23 = vpop.eup %7842 }
 0x5d7   :  { %v7845_v61 = vpop.eup %7844  ;;  %v2899_v29 = vadd.f32 1.0, %v7843_v23 }
 0x5d8   :  { %v7847_v57 = vpop.eup %7846  ;;  %v2901_v36 = vadd.f32 1.0, %v7845_v61 }
 0x5d9   :  { %v2900_v6 = vadd.f32 1.0, %v7847_v57 }
 0x5da   :  { %7848 = vrcp.f32 %v2901_v36 }
 0x5db   :  { %7850 = vpow2.f32 %v5831_v46 }
 0x5dc   :  { %7852 = vrcp.f32 %v2900_v6 }
 0x5dd   :  { %7854 = vrcp.f32 %v2899_v29 }
 0x5e4   :  { %v7849_v7 = vpop.eup %7848 }
 0x5e5   :  { %v7851_v5 = vpop.eup %7850  ;;  %v2911_v34 = vmul.f32 2.0, %v7849_v7 }
 0x5e6   :  { %v7853_v12 = vpop.eup %7852  ;;  %v2902_v60 = vadd.f32 1.0, %v7851_v5 }
 0x5e7   :  { %v5832_v51 = vadd.f32 -1.0, %v2911_v34  ;;  %v7855_v10 = vpop.eup %7854  ;;  %v2913_v59 = vmul.f32 %v7853_v12, %v9019_v28 }
 0x5e8   :  { %7856 = vrcp.f32 %v2902_v60 }
 0x5e9   :  { %v2914_v19 = vmul.f32 %v7855_v10, %v5832_v51 }
 0x5eb   :  { %v9156_v58 = vadd.f32 %v2914_v19, %v2913_v59 }
 0x5ed   :  { %7858 = vtanh.f32 %v9156_v58 }
 0x5ef   :  { %v3131_v57 = vpop.f32.mrb[16].mxu0  ;;  %v3202_v36 = vpop.f32.mrb[18].mxu1 }
 0x5f0   :  { %v3207_v46 = vadd.f32 %v3131_v57, %v8592_v38  ;;  %v3209_v29 = vadd.f32 %v3202_v36, %v10122_v40  ;;  %v3133_v23 = vpop.f32.mrb[17].mxu0  ;;  %v3204_v61 = vpop.f32.mrb[19].mxu1 }
 0x5f1   :  { %v3208_v56 = vadd.f32 %v3133_v23, %v10123_v21  ;;  %v3210_v51 = vadd.f32 %v3204_v61, %v10124_v35  ;;  %v10330_v23 = vld [vmem:[#allocation87_spill] sm:$0xff]  ;;  %v10331_v61 = vld [vmem:[#allocation88_spill] sm:$0xff] }
 0x5f2   :  { %v5840_v6 = vmul.f32 -1.442695, %v3207_v46  ;;  %v5842_v7 = vmul.f32 -1.442695, %v3209_v29  ;;  %v7857_v28 = vpop.eup %7856  ;;  %v10329_v29 = vld [vmem:[#allocation85_spill] sm:$0xff] }
 0x5f3   :  { %v5841_v5 = vmul.f32 -1.442695, %v3208_v56  ;;  %v5843_v19 = vmul.f32 -1.442695, %v3210_v51  ;;  %v10332_v56 = vld [vmem:[#allocation90_spill] sm:$0xff] }
 0x5f4   :  { %7860 = vpow2.f32 %v5840_v6  ;;  %v10333_v6 = vld [vmem:[#allocation91_spill] sm:$0xff] }
 0x5f5   :  { %7862 = vpow2.f32 %v5842_v7 }
 0x5f6   :  { %7864 = vpow2.f32 %v5841_v5  ;;  %v10334_v5 = vld [vmem:[#allocation92_spill] sm:$0xff] }
 0x5f7   :  { %v7859_v34 = vpop.eup %7858 }
 0x5f8   :  { %v2917_v12 = vmul.f32 %v7859_v34, %v7857_v28 }
 0x5fa   :  { %3307 = vmatmul.mubr.f32.vlgmr.msra.gmra.mrb[18].mxu0 %v2917_v12  ;;  %3378 = vmatmul.mubr.f32.vlgmr.msra.gmra.mrb[20].mxu1 %v2917_v12 }
 0x5fb   :  { %6941 = vmatpush1.bf16.msra.mxu0 %v10191_v1  ;;  %6973 = vmatpush1.bf16.msra.mxu1 %v10192_v43 }
 0x5fc   :  { %6943 = vmatprep.subr.bf16.mxu0 %v10193_v53  ;;  %6975 = vmatprep.subr.bf16.mxu1 %v10194_v41 }
 0x5fd   :  { %3448 = vmatprep.mubr.f32.mxu0 %v10053_v55  ;;  %3519 = vmatprep.mubr.f32.mxu1 %v10053_v55 }
 0x5fe   :  { %v7861_v10 = vpop.eup %7860 }
 0x5ff   :  { %v7863_v60 = vpop.eup %7862  ;;  %6945 = vmatpush1.bf16.msra.mxu0 %v10260_v45  ;;  %6977 = vmatpush1.bf16.msra.mxu1 %v10261_v25  ;;  %v3223_v46 = vadd.f32 1.0, %v7861_v10 }
 0x600   :  { %v7865_v59 = vpop.eup %7864  ;;  %v3225_v57 = vadd.f32 1.0, %v7863_v60  ;;  %6947 = vmatprep.subr.bf16.mxu0 %v10262_v27  ;;  %6979 = vmatprep.subr.bf16.mxu1 %v10198_v50 }
 0x601   :  { %v3224_v36 = vadd.f32 1.0, %v7865_v59 }
 0x602   :  { %7866 = vrcp.f32 %v3225_v57 }
 0x603   :  { %7868 = vpow2.f32 %v5843_v19  ;;  %6949 = vmatpush1.bf16.msra.mxu0 %v10263_v2  ;;  %6981 = vmatpush1.bf16.msra.mxu1 %v10264_v3 }
 0x604   :  { %7870 = vrcp.f32 %v3224_v36  ;;  %6951 = vmatprep.subr.bf16.mxu0 %v10265_v42  ;;  %6983 = vmatprep.subr.bf16.mxu1 %v10329_v29 }
 0x605   :  { %7872 = vrcp.f32 %v3223_v46 }
 0x607   :  { %6953 = vmatpush1.bf16.msra.mxu0 %v10267_v0  ;;  %6985 = vmatpush1.bf16.msra.mxu1 %v10330_v23 }
 0x608   :  { %6955 = vmatprep.subr.bf16.mxu0 %v10331_v61  ;;  %6987 = vmatprep.subr.bf16.mxu1 %v10270_v15 }
 0x60b   :  { %6957 = vmatpush1.bf16.msra.mxu0 %v10332_v56  ;;  %6989 = vmatpush1.bf16.msra.mxu1 %v10333_v6 }
 0x60c   :  { %v7867_v7 = vpop.eup %7866  ;;  %6959 = vmatprep.subr.bf16.mxu0 %v10334_v5  ;;  %6991 = vmatprep.subr.bf16.mxu1 %v10210_v20 }
 0x60d   :  { %v7869_v28 = vpop.eup %7868  ;;  %v3235_v34 = vmul.f32 2.0, %v7867_v7  ;;  %v10335_v7 = vld [vmem:[#allocation14_spill] sm:$0xff] }
 0x60e   :  { %v7871_v12 = vpop.eup %7870  ;;  %v3226_v60 = vadd.f32 1.0, %v7869_v28  ;;  %v10336_v28 = vld [vmem:[#allocation20_spill] sm:$0xff] }
 0x60f   :  { %v5844_v51 = vadd.f32 -1.0, %v3235_v34  ;;  %6961 = vmatpush1.bf16.msra.mxu0 %v10211_v62  ;;  %6993 = vmatpush1.bf16.msra.mxu1 %v10146_v24  ;;  %v7873_v10 = vpop.eup %7872  ;;  %v3237_v59 = vmul.f32 %v7871_v12, %v9053_v63  ;;  %v10337_v34 = vld [vmem:[#allocation17_spill] sm:$0xff]  ;;  %v10338_v12 = vld [vmem:[#allocation22_spill] sm:$0xff] }
 0x610   :  { %6963 = vmatprep.subr.bf16.mxu0 %v10212_v33  ;;  %6995 = vmatprep.subr.bf16.mxu1 %v10148_v14  ;;  %7874 = vrcp.f32 %v3226_v60  ;;  %v10341_v60 = vld [vmem:[#allocation21_spill] sm:$0xff] }
 0x611   :  { %v3238_v19 = vmul.f32 %v7873_v10, %v5844_v51  ;;  %v10339_v51 = vld [vmem:[#allocation19_spill] sm:$0xff]  ;;  %v10340_v10 = vld [vmem:[#allocation24_spill] sm:$0xff] }
 0x613   :  { %v9190_v57 = vadd.f32 %v3238_v19, %v3237_v59  ;;  %6965 = vmatpush1.bf16.msra.mxu0 %v10149_v11  ;;  %6997 = vmatpush1.bf16.msra.mxu1 %v10150_v13  ;;  %v10342_v19 = vld [vmem:[#allocation26_spill] sm:$0xff]  ;;  %v10343_v59 = vld [vmem:[#allocation23_spill] sm:$0xff] }
 0x614   :  { %6967 = vmatprep.subr.bf16.mxu0 %v10151_v31  ;;  %6999 = vmatprep.subr.bf16.mxu1 %v10152_v4 }
 0x615   :  { %7876 = vtanh.f32 %v9190_v57 }
 0x617   :  { %6969 = vmatpush1.bf16.msra.mxu0 %v10153_v49  ;;  %7001 = vmatpush1.bf16.msra.mxu1 %v10154_v52 }
 0x618   :  { %7003 = vmatprep.subr.bf16.mxu0 %v10155_v47  ;;  %7035 = vmatprep.subr.bf16.mxu1 %v10156_v17 }
 0x61a   :  { %v7875_v63 = vpop.eup %7874 }
 0x61f   :  { %v7877_v36 = vpop.eup %7876 }
 0x620   :  { %v3241_v46 = vmul.f32 %v7877_v36, %v7875_v63  ;;  %v10344_v63 = vld [vmem:[#allocation28_spill] sm:$0xff]  ;;  %v10345_v36 = vld [vmem:[#allocation25_spill] sm:$0xff] }
 0x622   :  { %3449 = vmatmul.mubr.f32.vlgmr.msra.gmra.mrb[18].mxu0 %v3241_v46  ;;  %3520 = vmatmul.mubr.f32.vlgmr.msra.gmra.mrb[20].mxu1 %v3241_v46 }
 0x623   :  { %7005 = vmatpush1.bf16.msra.mxu0 %v8226_v18  ;;  %7037 = vmatpush1.bf16.msra.mxu1 %v8216_v8 }
 0x624   :  { %7007 = vmatprep.subr.bf16.mxu0 %v8232_v26  ;;  %7039 = vmatprep.subr.bf16.mxu1 %v8218_v9 }
 0x625   :  { %3627 = vmatprep.mubr.f32.mxu0 %v10053_v55  ;;  %3698 = vmatprep.mubr.f32.mxu1 %v10053_v55 }
 0x627   :  { %7009 = vmatpush1.bf16.msra.mxu0 %v8235_v30  ;;  %7041 = vmatpush1.bf16.msra.mxu1 %v8222_v16 }
 0x628   :  { %7011 = vmatprep.subr.bf16.mxu0 %v8244_v39  ;;  %7043 = vmatprep.subr.bf16.mxu1 %v8229_v22 }
 0x62b   :  { %7013 = vmatpush1.bf16.msra.mxu0 %v8247_v44  ;;  %7045 = vmatpush1.bf16.msra.mxu1 %v8238_v32 }
 0x62c   :  { %7015 = vmatprep.subr.bf16.mxu0 %v8253_v48  ;;  %7047 = vmatprep.subr.bf16.mxu1 %v10335_v7  ;;  %v10346_v7 = vld [vmem:[#allocation30_spill] sm:$0xff] }
 0x62f   :  { %7017 = vmatpush1.bf16.msra.mxu0 %v10336_v28  ;;  %7049 = vmatpush1.bf16.msra.mxu1 %v10337_v34  ;;  %v10347_v28 = vld [vmem:[#allocation27_spill] sm:$0xff]  ;;  %v10348_v34 = vld [vmem:[#allocation32_spill] sm:$0xff] }
 0x630   :  { %7019 = vmatprep.subr.bf16.mxu0 %v10338_v12  ;;  %7051 = vmatprep.subr.bf16.mxu1 %v10339_v51  ;;  %v10349_v12 = vld [vmem:[#allocation29_spill] sm:$0xff]  ;;  %v10350_v51 = vld [vmem:[#allocation34_spill] sm:$0xff] }
 0x633   :  { %7021 = vmatpush1.bf16.msra.mxu0 %v10340_v10  ;;  %7053 = vmatpush1.bf16.msra.mxu1 %v10341_v60  ;;  %v10351_v10 = vld [vmem:[#allocation31_spill] sm:$0xff]  ;;  %v10352_v60 = vld [vmem:[#allocation36_spill] sm:$0xff] }
 0x634   :  { %7023 = vmatprep.subr.bf16.mxu0 %v10342_v19  ;;  %7055 = vmatprep.subr.bf16.mxu1 %v10343_v59  ;;  %v10353_v19 = vld [vmem:[#allocation33_spill] sm:$0xff] }
 0x635   :  { %v10354_v59 = vld [vmem:[#allocation41_spill] sm:$0xff] }
 0x637   :  { %7025 = vmatpush1.bf16.msra.mxu0 %v10344_v63  ;;  %7057 = vmatpush1.bf16.msra.mxu1 %v10345_v36  ;;  %v10355_v63 = vld [vmem:[#allocation35_spill] sm:$0xff] }
 0x638   :  { %7027 = vmatprep.subr.bf16.mxu0 %v10346_v7  ;;  %7059 = vmatprep.subr.bf16.mxu1 %v10347_v28  ;;  %v10356_v7 = vld [vmem:[#allocation42_spill] sm:$0xff]  ;;  %v10357_v28 = vld [vmem:[#allocation37_spill] sm:$0xff]  ;;  %v10396_v36 = vld [vmem:[#allocation107_spill] sm:$0xff] }
 0x63b   :  { %7029 = vmatpush1.bf16.msra.mxu0 %v10348_v34  ;;  %7061 = vmatpush1.bf16.msra.mxu1 %v10349_v12  ;;  %v10377_v12 = vld [vmem:[#allocation55_spill] sm:$0xff]  ;;  %v10378_v34 = vld [vmem:[#allocation56_spill] sm:$0xff] }
 0x63c   :  { %7031 = vmatprep.subr.bf16.mxu0 %v10350_v51  ;;  %7063 = vmatprep.subr.bf16.mxu1 %v10351_v10  ;;  %v9240_v51 = vld [vmem:[%s9749_s1 + $0x58] sm:$0x3f]  ;;  %v10371_v10 = vld [vmem:[#allocation49_spill] sm:$0xff] }
 0x63d   :  { %10358 = vst [vmem:[#allocation97_spill] sm:$0xff] %v9240_v51 }
 0x63f   :  { %7033 = vmatpush1.bf16.msra.mxu0 %v10352_v60  ;;  %7065 = vmatpush1.bf16.msra.mxu1 %v10353_v19  ;;  %v10366_v19 = vld [vmem:[#allocation40_spill] sm:$0xff]  ;;  %v10367_v60 = vld [vmem:[#allocation47_spill] sm:$0xff] }
 0x640   :  { %7071 = vmatprep.subr.bf16.mxu1 %v10354_v59  ;;  %7067 = vmatprep.subr.bf16.mxu0 %v10355_v63  ;;  %v9247_v59 = vld [vmem:[%s9749_s1 + $0x48] sm:$0x3f] }
 0x641   :  { %10359 = vst [vmem:[#allocation98_spill] sm:$0xff] %v9247_v59  ;;  %v10365_v63 = vld [vmem:[#allocation46_spill] sm:$0xff] }
 0x642   :  { %3628 = vmatmul.mubr.f32.vlgmr.msra.gmra.mrb[20].mxu0 %v3241_v46  ;;  %3699 = vmatmul.mubr.f32.vlgmr.msra.gmra.mrb[22].mxu1 %v3241_v46  ;;  %v9256_v46 = vld [vmem:[%s9749_s1 + $0x50] sm:$0x3f] }
 0x643   :  { %7073 = vmatpush1.bf16.msra.mxu1 %v10356_v7  ;;  %7069 = vmatpush1.bf16.msra.mxu0 %v10357_v28  ;;  %10360 = vst [vmem:[#allocation99_spill] sm:$0xff] %v9256_v46  ;;  %v10362_v28 = vld [vmem:[#allocation38_spill] sm:$0xff]  ;;  %v10363_v7 = vld [vmem:[#allocation45_spill] sm:$0xff] }
 0x644   :  { %5854 = vmatprep.subr.msk.mxu1 %vm438_vm0, %v9240_v51  ;;  %5851 = vmatprep.subr.msk.mxu0 %vm438_vm0, %v9247_v59  ;;  %v9263_v51 = vld [vmem:[%s9749_s1 + $0x40] sm:$0x3f]  ;;  %v5850_v59 = vld [vmem:[%s9748_s0 + $0xa] sm:$0x3] }
 0x645   :  { %3772 = vmatprep.mubr.f32.mxu0 %v10053_v55  ;;  %3843 = vmatprep.mubr.f32.mxu1 %v10053_v55  ;;  %10361 = vst [vmem:[#allocation100_spill] sm:$0xff] %v9263_v51 }
 0x647   :  { %5855 = vmatpush1.msk.msra.mxu1 %vm438_vm0, %v9256_v46  ;;  %5852 = vmatpush1.msk.msra.mxu0 %vm438_vm0, %v9263_v51  ;;  %v10364_v46 = vld [vmem:[#allocation39_spill] sm:$0xff] }
 0x648   :  { %7075 = vmatprep.subr.bf16.mxu0 %v10362_v28  ;;  %7107 = vmatprep.subr.bf16.mxu1 %v10363_v7  ;;  %v10368_v51 = vld [vmem:[#allocation43_spill] sm:$0xff]  ;;  %v10369_v28 = vld [vmem:[#allocation48_spill] sm:$0xff] }
 0x649   :  { %v10370_v7 = vld [vmem:[#allocation44_spill] sm:$0xff] }
 0x64a   :  { %5853 = vmatmul.mubr.msk.f32.vlgmr.msra.gmra.mrb[20].mxu0 %vm434_vm1, %v5850_v59  ;;  %5856 = vmatmul.mubr.msk.f32.vlgmr.msra.gmra.mrb[22].mxu1 %vm434_vm1, %v5850_v59  ;;  %v10372_v59 = vld [vmem:[#allocation50_spill] sm:$0xff] }
 0x64b   :  { %7077 = vmatpush1.bf16.msra.mxu0 %v10364_v46  ;;  %7109 = vmatpush1.bf16.msra.mxu1 %v10365_v63  ;;  %v10373_v46 = vld [vmem:[#allocation51_spill] sm:$0xff]  ;;  %v10374_v63 = vld [vmem:[#allocation52_spill] sm:$0xff] }
 0x64c   :  { %7079 = vmatprep.subr.bf16.mxu0 %v10366_v19  ;;  %7111 = vmatprep.subr.bf16.mxu1 %v10367_v60  ;;  %v10375_v19 = vld [vmem:[#allocation53_spill] sm:$0xff]  ;;  %v10376_v60 = vld [vmem:[#allocation54_spill] sm:$0xff] }
 0x64d   :  { %3949 = vmatprep.mubr.f32.mxu0 %v10053_v55  ;;  %4020 = vmatprep.mubr.f32.mxu1 %v10053_v55 }
 0x64f   :  { %7081 = vmatpush1.bf16.msra.mxu0 %v10368_v51  ;;  %7113 = vmatpush1.bf16.msra.mxu1 %v10369_v28  ;;  %v10379_v51 = vld [vmem:[#allocation57_spill] sm:$0xff]  ;;  %v10380_v28 = vld [vmem:[#allocation58_spill] sm:$0xff] }
 0x650   :  { %7083 = vmatprep.subr.bf16.mxu0 %v10370_v7  ;;  %7115 = vmatprep.subr.bf16.mxu1 %v10371_v10  ;;  %v10381_v7 = vld [vmem:[#allocation59_spill] sm:$0xff]  ;;  %v10382_v10 = vld [vmem:[#allocation60_spill] sm:$0xff] }
 0x653   :  { %7085 = vmatpush1.bf16.msra.mxu0 %v10372_v59  ;;  %7117 = vmatpush1.bf16.msra.mxu1 %v10373_v46  ;;  %v10383_v59 = vld [vmem:[#allocation61_spill] sm:$0xff]  ;;  %v10384_v46 = vld [vmem:[#allocation62_spill] sm:$0xff] }
 0x654   :  { %7087 = vmatprep.subr.bf16.mxu0 %v10374_v63  ;;  %7119 = vmatprep.subr.bf16.mxu1 %v10375_v19  ;;  %v10385_v63 = vld [vmem:[#allocation63_spill] sm:$0xff]  ;;  %v10386_v19 = vld [vmem:[#allocation64_spill] sm:$0xff] }
 0x657   :  { %7089 = vmatpush1.bf16.msra.mxu0 %v10376_v60  ;;  %7121 = vmatpush1.bf16.msra.mxu1 %v10377_v12  ;;  %v10387_v60 = vld [vmem:[#allocation65_spill] sm:$0xff]  ;;  %v10388_v12 = vld [vmem:[#allocation66_spill] sm:$0xff] }
 0x658   :  { %7091 = vmatprep.subr.bf16.mxu0 %v10378_v34  ;;  %7123 = vmatprep.subr.bf16.mxu1 %v10379_v51  ;;  %v10389_v34 = vld [vmem:[#allocation67_spill] sm:$0xff]  ;;  %v10390_v51 = vld [vmem:[#allocation68_spill] sm:$0xff] }
 0x65b   :  { %7093 = vmatpush1.bf16.msra.mxu0 %v10380_v28  ;;  %7125 = vmatpush1.bf16.msra.mxu1 %v10381_v7  ;;  %v10391_v28 = vld [vmem:[#allocation69_spill] sm:$0xff]  ;;  %v10392_v7 = vld [vmem:[#allocation70_spill] sm:$0xff] }
 0x65c   :  { %7095 = vmatprep.subr.bf16.mxu0 %v10382_v10  ;;  %7127 = vmatprep.subr.bf16.mxu1 %v10383_v59  ;;  %v10393_v10 = vld [vmem:[#allocation71_spill] sm:$0xff]  ;;  %v10394_v59 = vld [vmem:[#allocation72_spill] sm:$0xff] }
 0x65f   :  { %7097 = vmatpush1.bf16.msra.mxu0 %v10384_v46  ;;  %7129 = vmatpush1.bf16.msra.mxu1 %v10385_v63  ;;  %v10395_v46 = vld [vmem:[#allocation73_spill] sm:$0xff] }
 0x660   :  { %7099 = vmatprep.subr.bf16.mxu0 %v10386_v19  ;;  %7131 = vmatprep.subr.bf16.mxu1 %v10387_v60 }
 0x663   :  { %7101 = vmatpush1.bf16.msra.mxu0 %v10388_v12  ;;  %7133 = vmatpush1.bf16.msra.mxu1 %v10389_v34 }
 0x664   :  { %7103 = vmatprep.subr.bf16.mxu0 %v10390_v51  ;;  %7135 = vmatprep.subr.bf16.mxu1 %v10391_v28 }
 0x667   :  { %7105 = vmatpush1.bf16.msra.mxu0 %v10392_v7  ;;  %7137 = vmatpush1.bf16.msra.mxu1 %v10393_v10  ;;  %v10397_v10 = vld [vmem:[#allocation109_spill] sm:$0xff] }
 0x668   :  { %7139 = vmatprep.subr.bf16.mxu0 %v10394_v59  ;;  %7171 = vmatprep.subr.bf16.mxu1 %v10395_v46 }
 0x6f5   :  { %v3450_v63 = vpop.f32.mrb[18].mxu0  ;;  %v3521_v19 = vpop.f32.mrb[20].mxu1 }
 0x6f6   :  { %v3526_v60 = vadd.f32 %v3450_v63, %v10396_v36  ;;  %v3528_v12 = vadd.f32 %v3521_v19, %v10190_v37  ;;  %v3452_v48 = vpop.f32.mrb[19].mxu0  ;;  %v3523_v34 = vpop.f32.mrb[21].mxu1 }
 0x6f7   :  { %v3527_v51 = vadd.f32 %v3452_v48, %v8715_v54  ;;  %v3529_v59 = vadd.f32 %v3523_v34, %v10397_v10 }
 0x6f8   :  { %v5845_v32 = vmul.f32 -1.442695, %v3526_v60  ;;  %v5847_v28 = vmul.f32 -1.442695, %v3528_v12 }
 0x6f9   :  { %v5846_v44 = vmul.f32 -1.442695, %v3527_v51  ;;  %v5848_v22 = vmul.f32 -1.442695, %v3529_v59 }
 0x6fa   :  { %7878 = vpow2.f32 %v5845_v32 }
 0x6fb   :  { %7880 = vpow2.f32 %v5847_v28 }
 0x6fc   :  { %7882 = vpow2.f32 %v5846_v44 }
 0x704   :  { %v7879_v7 = vpop.eup %7878 }
 0x705   :  { %v7881_v46 = vpop.eup %7880  ;;  %v3542_v36 = vadd.f32 1.0, %v7879_v7 }
 0x706   :  { %v7883_v39 = vpop.eup %7882  ;;  %v3544_v16 = vadd.f32 1.0, %v7881_v46 }
 0x707   :  { %v3543_v63 = vadd.f32 1.0, %v7883_v39 }
 0x708   :  { %7884 = vrcp.f32 %v3544_v16 }
 0x709   :  { %7886 = vpow2.f32 %v5848_v22 }
 0x70a   :  { %7888 = vrcp.f32 %v3543_v63 }
 0x70b   :  { %7890 = vrcp.f32 %v3542_v36 }
 0x712   :  { %v7885_v48 = vpop.eup %7884 }
 0x713   :  { %v7887_v60 = vpop.eup %7886  ;;  %v3554_v12 = vmul.f32 2.0, %v7885_v48 }
 0x714   :  { %v7889_v51 = vpop.eup %7888  ;;  %v3545_v44 = vadd.f32 1.0, %v7887_v60 }
 0x715   :  { %v5849_v32 = vadd.f32 -1.0, %v3554_v12  ;;  %v7891_v28 = vpop.eup %7890  ;;  %v3556_v34 = vmul.f32 %v7889_v51, %v9156_v58 }
 0x716   :  { %7892 = vrcp.f32 %v3545_v44 }
 0x717   :  { %v3557_v19 = vmul.f32 %v7891_v28, %v5849_v32 }
 0x719   :  { %v9313_v10 = vadd.f32 %v3557_v19, %v3556_v34 }
 0x71b   :  { %7894 = vtanh.f32 %v9313_v10 }
 0x71d   :  { %v3774_v39 = vpop.f32.mrb[20].mxu0  ;;  %v3845_v16 = vpop.f32.mrb[22].mxu1 }
 0x71e   :  { %v3850_v22 = vadd.f32 %v3774_v39, %v8592_v38  ;;  %v3852_v7 = vadd.f32 %v3845_v16, %v10122_v40  ;;  %v3776_v36 = vpop.f32.mrb[21].mxu0  ;;  %v3847_v46 = vpop.f32.mrb[23].mxu1 }
 0x71f   :  { %v3851_v59 = vadd.f32 %v3776_v36, %v10123_v21  ;;  %v3853_v32 = vadd.f32 %v3847_v46, %v10124_v35 }
 0x720   :  { %v5857_v63 = vmul.f32 -1.442695, %v3850_v22  ;;  %v5859_v48 = vmul.f32 -1.442695, %v3852_v7  ;;  %v7893_v58 = vpop.eup %7892 }
 0x721   :  { %v5858_v60 = vmul.f32 -1.442695, %v3851_v59  ;;  %v5860_v19 = vmul.f32 -1.442695, %v3853_v32 }
 0x722   :  { %7896 = vpow2.f32 %v5857_v63 }
 0x723   :  { %7898 = vpow2.f32 %v5859_v48 }
 0x724   :  { %7900 = vpow2.f32 %v5858_v60 }
 0x725   :  { %v7895_v12 = vpop.eup %7894 }
 0x726   :  { %v3560_v51 = vmul.f32 %v7895_v12, %v7893_v58 }
 0x728   :  { %3950 = vmatmul.mubr.f32.vlgmr.msra.gmra.mrb[22].mxu0 %v3560_v51  ;;  %4021 = vmatmul.mubr.f32.vlgmr.msra.gmra.mrb[24].mxu1 %v3560_v51 }
 0x729   :  { %7141 = vmatpush1.bf16.msra.mxu0 %v10191_v1  ;;  %7173 = vmatpush1.bf16.msra.mxu1 %v10192_v43 }
 0x72a   :  { %7143 = vmatprep.subr.bf16.mxu0 %v10193_v53  ;;  %7175 = vmatprep.subr.bf16.mxu1 %v10194_v41 }
 0x72b   :  { %4091 = vmatprep.mubr.f32.mxu0 %v10053_v55  ;;  %4162 = vmatprep.mubr.f32.mxu1 %v10053_v55 }
 0x72c   :  { %v7897_v28 = vpop.eup %7896 }
 0x72d   :  { %v7899_v44 = vpop.eup %7898  ;;  %7145 = vmatpush1.bf16.msra.mxu0 %v10260_v45  ;;  %7177 = vmatpush1.bf16.msra.mxu1 %v10261_v25  ;;  %v3866_v22 = vadd.f32 1.0, %v7897_v28 }
 0x72e   :  { %v7901_v34 = vpop.eup %7900  ;;  %v3868_v39 = vadd.f32 1.0, %v7899_v44  ;;  %7147 = vmatprep.subr.bf16.mxu0 %v10262_v27  ;;  %7179 = vmatprep.subr.bf16.mxu1 %v10198_v50  ;;  %v10398_v44 = vld [vmem:[#allocation10_spill] sm:$0xff] }
 0x72f   :  { %v3867_v16 = vadd.f32 1.0, %v7901_v34  ;;  %v10400_v34 = vld [vmem:[#allocation12_spill] sm:$0xff] }
 0x730   :  { %7902 = vrcp.f32 %v3868_v39  ;;  %v10401_v39 = vld [vmem:[#allocation16_spill] sm:$0xff] }
 0x731   :  { %7904 = vpow2.f32 %v5860_v19  ;;  %7149 = vmatpush1.bf16.msra.mxu0 %v10263_v2  ;;  %7181 = vmatpush1.bf16.msra.mxu1 %v10264_v3  ;;  %v10399_v19 = vld [vmem:[#allocation15_spill] sm:$0xff] }
 0x732   :  { %7906 = vrcp.f32 %v3867_v16  ;;  %7151 = vmatprep.subr.bf16.mxu0 %v10265_v42  ;;  %7183 = vmatprep.subr.bf16.mxu1 %v10329_v29  ;;  %v10402_v16 = vld [vmem:[#allocation13_spill] sm:$0xff] }
 0x733   :  { %7908 = vrcp.f32 %v3866_v22  ;;  %v10403_v22 = vld [vmem:[#allocation18_spill] sm:$0xff] }
 0x735   :  { %7153 = vmatpush1.bf16.msra.mxu0 %v10267_v0  ;;  %7185 = vmatpush1.bf16.msra.mxu1 %v10330_v23 }
 0x736   :  { %7155 = vmatprep.subr.bf16.mxu0 %v10331_v61  ;;  %7187 = vmatprep.subr.bf16.mxu1 %v10270_v15 }
 0x739   :  { %7157 = vmatpush1.bf16.msra.mxu0 %v10332_v56  ;;  %7189 = vmatpush1.bf16.msra.mxu1 %v10333_v6 }
 0x73a   :  { %v7903_v7 = vpop.eup %7902  ;;  %7159 = vmatprep.subr.bf16.mxu0 %v10334_v5  ;;  %7191 = vmatprep.subr.bf16.mxu1 %v10210_v20 }
 0x73b   :  { %v7905_v36 = vpop.eup %7904  ;;  %v3878_v46 = vmul.f32 2.0, %v7903_v7  ;;  %v10404_v7 = vld [vmem:[#allocation14_spill] sm:$0xff] }
 0x73c   :  { %v7907_v59 = vpop.eup %7906  ;;  %v3869_v60 = vadd.f32 1.0, %v7905_v36  ;;  %v10405_v36 = vld [vmem:[#allocation20_spill] sm:$0xff] }
 0x73d   :  { %v5861_v63 = vadd.f32 -1.0, %v3878_v46  ;;  %7161 = vmatpush1.bf16.msra.mxu0 %v10211_v62  ;;  %7193 = vmatpush1.bf16.msra.mxu1 %v10146_v24  ;;  %v7909_v48 = vpop.eup %7908  ;;  %v3880_v12 = vmul.f32 %v7907_v59, %v9190_v57  ;;  %v10406_v46 = vld [vmem:[#allocation17_spill] sm:$0xff]  ;;  %v10407_v59 = vld [vmem:[#allocation22_spill] sm:$0xff] }
 0x73e   :  { %7163 = vmatprep.subr.bf16.mxu0 %v10212_v33  ;;  %7195 = vmatprep.subr.bf16.mxu1 %v10148_v14  ;;  %7910 = vrcp.f32 %v3869_v60  ;;  %v10410_v60 = vld [vmem:[#allocation21_spill] sm:$0xff] }
 0x73f   :  { %v3881_v58 = vmul.f32 %v7909_v48, %v5861_v63  ;;  %v10408_v63 = vld [vmem:[#allocation19_spill] sm:$0xff]  ;;  %v10409_v48 = vld [vmem:[#allocation24_spill] sm:$0xff] }
 0x741   :  { %v9347_v51 = vadd.f32 %v3881_v58, %v3880_v12  ;;  %7165 = vmatpush1.bf16.msra.mxu0 %v10149_v11  ;;  %7197 = vmatpush1.bf16.msra.mxu1 %v10150_v13  ;;  %v10411_v58 = vld [vmem:[#allocation26_spill] sm:$0xff]  ;;  %v10412_v12 = vld [vmem:[#allocation23_spill] sm:$0xff] }
 0x742   :  { %7167 = vmatprep.subr.bf16.mxu0 %v10151_v31  ;;  %7199 = vmatprep.subr.bf16.mxu1 %v10152_v4 }
 0x743   :  { %7912 = vtanh.f32 %v9347_v51 }
 0x745   :  { %7169 = vmatpush1.bf16.msra.mxu0 %v10153_v49  ;;  %7201 = vmatpush1.bf16.msra.mxu1 %v10154_v52 }
 0x746   :  { %7203 = vmatprep.subr.bf16.mxu0 %v10155_v47  ;;  %7235 = vmatprep.subr.bf16.mxu1 %v10156_v17 }
 0x748   :  { %v7911_v57 = vpop.eup %7910 }
 0x74d   :  { %v7913_v32 = vpop.eup %7912 }
 0x74e   :  { %v3884_v28 = vmul.f32 %v7913_v32, %v7911_v57  ;;  %v10413_v57 = vld [vmem:[#allocation28_spill] sm:$0xff]  ;;  %v10414_v32 = vld [vmem:[#allocation25_spill] sm:$0xff] }
 0x750   :  { %4092 = vmatmul.mubr.f32.vlgmr.msra.gmra.mrb[22].mxu0 %v3884_v28  ;;  %4163 = vmatmul.mubr.f32.vlgmr.msra.gmra.mrb[24].mxu1 %v3884_v28 }
 0x751   :  { %7205 = vmatpush1.bf16.msra.mxu0 %v8226_v18  ;;  %7237 = vmatpush1.bf16.msra.mxu1 %v8216_v8 }
 0x752   :  { %7207 = vmatprep.subr.bf16.mxu0 %v8232_v26  ;;  %7239 = vmatprep.subr.bf16.mxu1 %v8218_v9 }
 0x753   :  { %4270 = vmatprep.mubr.f32.mxu0 %v10053_v55  ;;  %4341 = vmatprep.mubr.f32.mxu1 %v10053_v55 }
 0x755   :  { %7209 = vmatpush1.bf16.msra.mxu0 %v8235_v30  ;;  %7241 = vmatpush1.bf16.msra.mxu1 %v10398_v44 }
 0x756   :  { %7211 = vmatprep.subr.bf16.mxu0 %v10399_v19  ;;  %7243 = vmatprep.subr.bf16.mxu1 %v10400_v34 }
 0x759   :  { %7213 = vmatpush1.bf16.msra.mxu0 %v10401_v39  ;;  %7245 = vmatpush1.bf16.msra.mxu1 %v10402_v16 }
 0x75a   :  { %7215 = vmatprep.subr.bf16.mxu0 %v10403_v22  ;;  %7247 = vmatprep.subr.bf16.mxu1 %v10404_v7  ;;  %v10415_v7 = vld [vmem:[#allocation30_spill] sm:$0xff] }
 0x75d   :  { %7217 = vmatpush1.bf16.msra.mxu0 %v10405_v36  ;;  %7249 = vmatpush1.bf16.msra.mxu1 %v10406_v46  ;;  %v10416_v36 = vld [vmem:[#allocation27_spill] sm:$0xff]  ;;  %v10417_v46 = vld [vmem:[#allocation32_spill] sm:$0xff] }
 0x75e   :  { %7219 = vmatprep.subr.bf16.mxu0 %v10407_v59  ;;  %7251 = vmatprep.subr.bf16.mxu1 %v10408_v63  ;;  %v10418_v59 = vld [vmem:[#allocation29_spill] sm:$0xff]  ;;  %v10419_v63 = vld [vmem:[#allocation34_spill] sm:$0xff] }
 0x761   :  { %7221 = vmatpush1.bf16.msra.mxu0 %v10409_v48  ;;  %7253 = vmatpush1.bf16.msra.mxu1 %v10410_v60  ;;  %v10420_v48 = vld [vmem:[#allocation31_spill] sm:$0xff]  ;;  %v10421_v60 = vld [vmem:[#allocation36_spill] sm:$0xff] }
 0x762   :  { %7223 = vmatprep.subr.bf16.mxu0 %v10411_v58  ;;  %7255 = vmatprep.subr.bf16.mxu1 %v10412_v12  ;;  %v10422_v58 = vld [vmem:[#allocation33_spill] sm:$0xff] }
 0x763   :  { %v10423_v12 = vld [vmem:[#allocation41_spill] sm:$0xff] }
 0x765   :  { %7225 = vmatpush1.bf16.msra.mxu0 %v10413_v57  ;;  %7257 = vmatpush1.bf16.msra.mxu1 %v10414_v32  ;;  %v10424_v57 = vld [vmem:[#allocation35_spill] sm:$0xff] }
 0x766   :  { %7227 = vmatprep.subr.bf16.mxu0 %v10415_v7  ;;  %7259 = vmatprep.subr.bf16.mxu1 %v10416_v36  ;;  %v10425_v7 = vld [vmem:[#allocation42_spill] sm:$0xff]  ;;  %v10426_v36 = vld [vmem:[#allocation37_spill] sm:$0xff]  ;;  %v10465_v32 = vld [vmem:[#allocation107_spill] sm:$0xff] }
 0x769   :  { %7229 = vmatpush1.bf16.msra.mxu0 %v10417_v46  ;;  %7261 = vmatpush1.bf16.msra.mxu1 %v10418_v59  ;;  %v10427_v46 = vld [vmem:[#allocation97_spill] sm:$0xff]  ;;  %v10447_v59 = vld [vmem:[#allocation56_spill] sm:$0xff] }
 0x76a   :  { %7231 = vmatprep.subr.bf16.mxu0 %v10419_v63  ;;  %7263 = vmatprep.subr.bf16.mxu1 %v10420_v48  ;;  %v10428_v63 = vld [vmem:[#allocation98_spill] sm:$0xff]  ;;  %v10446_v48 = vld [vmem:[#allocation55_spill] sm:$0xff] }
 0x76d   :  { %7233 = vmatpush1.bf16.msra.mxu0 %v10421_v60  ;;  %7265 = vmatpush1.bf16.msra.mxu1 %v10422_v58  ;;  %v10429_v58 = vld [vmem:[#allocation99_spill] sm:$0xff]  ;;  %v10440_v60 = vld [vmem:[#allocation49_spill] sm:$0xff] }
 0x76e   :  { %7271 = vmatprep.subr.bf16.mxu1 %v10423_v12  ;;  %7267 = vmatprep.subr.bf16.mxu0 %v10424_v57  ;;  %v10430_v57 = vld [vmem:[#allocation100_spill] sm:$0xff]  ;;  %v10436_v12 = vld [vmem:[#allocation47_spill] sm:$0xff] }
 0x770   :  { %4271 = vmatmul.mubr.f32.vlgmr.msra.gmra.mrb[24].mxu0 %v3884_v28  ;;  %4342 = vmatmul.mubr.f32.vlgmr.msra.gmra.mrb[26].mxu1 %v3884_v28  ;;  %v5867_v28 = vld [vmem:[%s9748_s0 + $0xc] sm:$0x3] }
 0x771   :  { %7273 = vmatpush1.bf16.msra.mxu1 %v10425_v7  ;;  %7269 = vmatpush1.bf16.msra.mxu0 %v10426_v36  ;;  %v10431_v36 = vld [vmem:[#allocation38_spill] sm:$0xff] }
 0x772   :  { %5871 = vmatprep.subr.msk.mxu1 %vm438_vm0, %v10427_v46  ;;  %5868 = vmatprep.subr.msk.mxu0 %vm438_vm0, %v10428_v63  ;;  %v10432_v46 = vld [vmem:[#allocation45_spill] sm:$0xff]  ;;  %v10433_v63 = vld [vmem:[#allocation39_spill] sm:$0xff]  ;;  %v10434_v7 = vld [vmem:[#allocation46_spill] sm:$0xff] }
 0x773   :  { %4415 = vmatprep.mubr.f32.mxu0 %v10053_v55  ;;  %4486 = vmatprep.mubr.f32.mxu1 %v10053_v55 }
 0x775   :  { %5872 = vmatpush1.msk.msra.mxu1 %vm438_vm0, %v10429_v58  ;;  %5869 = vmatpush1.msk.msra.mxu0 %vm438_vm0, %v10430_v57  ;;  %v10435_v58 = vld [vmem:[#allocation40_spill] sm:$0xff]  ;;  %v10437_v57 = vld [vmem:[#allocation43_spill] sm:$0xff] }
 0x776   :  { %7275 = vmatprep.subr.bf16.mxu0 %v10431_v36  ;;  %7307 = vmatprep.subr.bf16.mxu1 %v10432_v46  ;;  %v10438_v36 = vld [vmem:[#allocation48_spill] sm:$0xff] }
 0x777   :  { %v10439_v46 = vld [vmem:[#allocation44_spill] sm:$0xff] }
 0x778   :  { %5870 = vmatmul.mubr.msk.f32.vlgmr.msra.gmra.mrb[24].mxu0 %vm434_vm1, %v5867_v28  ;;  %5873 = vmatmul.mubr.msk.f32.vlgmr.msra.gmra.mrb[26].mxu1 %vm434_vm1, %v5867_v28  ;;  %v10441_v28 = vld [vmem:[#allocation50_spill] sm:$0xff] }
 0x779   :  { %7277 = vmatpush1.bf16.msra.mxu0 %v10433_v63  ;;  %7309 = vmatpush1.bf16.msra.mxu1 %v10434_v7  ;;  %v10442_v63 = vld [vmem:[#allocation51_spill] sm:$0xff]  ;;  %v10443_v7 = vld [vmem:[#allocation52_spill] sm:$0xff] }
 0x77a   :  { %7279 = vmatprep.subr.bf16.mxu0 %v10435_v58  ;;  %7311 = vmatprep.subr.bf16.mxu1 %v10436_v12  ;;  %v10444_v58 = vld [vmem:[#allocation53_spill] sm:$0xff]  ;;  %v10445_v12 = vld [vmem:[#allocation54_spill] sm:$0xff] }
 0x77b   :  { %4592 = vmatprep.mubr.f32.mxu0 %v10053_v55  ;;  %4663 = vmatprep.mubr.f32.mxu1 %v10053_v55 }
 0x77d   :  { %7281 = vmatpush1.bf16.msra.mxu0 %v10437_v57  ;;  %7313 = vmatpush1.bf16.msra.mxu1 %v10438_v36  ;;  %v10448_v57 = vld [vmem:[#allocation57_spill] sm:$0xff]  ;;  %v10449_v36 = vld [vmem:[#allocation58_spill] sm:$0xff] }
 0x77e   :  { %7283 = vmatprep.subr.bf16.mxu0 %v10439_v46  ;;  %7315 = vmatprep.subr.bf16.mxu1 %v10440_v60  ;;  %v10450_v46 = vld [vmem:[#allocation59_spill] sm:$0xff]  ;;  %v10451_v60 = vld [vmem:[#allocation60_spill] sm:$0xff] }
 0x781   :  { %7285 = vmatpush1.bf16.msra.mxu0 %v10441_v28  ;;  %7317 = vmatpush1.bf16.msra.mxu1 %v10442_v63  ;;  %v10452_v28 = vld [vmem:[#allocation61_spill] sm:$0xff]  ;;  %v10453_v63 = vld [vmem:[#allocation62_spill] sm:$0xff] }
 0x782   :  { %7287 = vmatprep.subr.bf16.mxu0 %v10443_v7  ;;  %7319 = vmatprep.subr.bf16.mxu1 %v10444_v58  ;;  %v10454_v7 = vld [vmem:[#allocation63_spill] sm:$0xff]  ;;  %v10455_v58 = vld [vmem:[#allocation64_spill] sm:$0xff] }
 0x785   :  { %7289 = vmatpush1.bf16.msra.mxu0 %v10445_v12  ;;  %7321 = vmatpush1.bf16.msra.mxu1 %v10446_v48  ;;  %v10456_v12 = vld [vmem:[#allocation65_spill] sm:$0xff]  ;;  %v10457_v48 = vld [vmem:[#allocation66_spill] sm:$0xff] }
 0x786   :  { %7291 = vmatprep.subr.bf16.mxu0 %v10447_v59  ;;  %7323 = vmatprep.subr.bf16.mxu1 %v10448_v57  ;;  %v10458_v59 = vld [vmem:[#allocation67_spill] sm:$0xff]  ;;  %v10459_v57 = vld [vmem:[#allocation68_spill] sm:$0xff] }
 0x789   :  { %7293 = vmatpush1.bf16.msra.mxu0 %v10449_v36  ;;  %7325 = vmatpush1.bf16.msra.mxu1 %v10450_v46  ;;  %v10460_v36 = vld [vmem:[#allocation69_spill] sm:$0xff]  ;;  %v10461_v46 = vld [vmem:[#allocation70_spill] sm:$0xff] }
 0x78a   :  { %7295 = vmatprep.subr.bf16.mxu0 %v10451_v60  ;;  %7327 = vmatprep.subr.bf16.mxu1 %v10452_v28  ;;  %v10462_v60 = vld [vmem:[#allocation71_spill] sm:$0xff]  ;;  %v10463_v28 = vld [vmem:[#allocation72_spill] sm:$0xff] }
 0x78d   :  { %7297 = vmatpush1.bf16.msra.mxu0 %v10453_v63  ;;  %7329 = vmatpush1.bf16.msra.mxu1 %v10454_v7  ;;  %v10464_v63 = vld [vmem:[#allocation73_spill] sm:$0xff] }
 0x78e   :  { %7299 = vmatprep.subr.bf16.mxu0 %v10455_v58  ;;  %7331 = vmatprep.subr.bf16.mxu1 %v10456_v12 }
 0x791   :  { %7301 = vmatpush1.bf16.msra.mxu0 %v10457_v48  ;;  %7333 = vmatpush1.bf16.msra.mxu1 %v10458_v59 }
 0x792   :  { %7303 = vmatprep.subr.bf16.mxu0 %v10459_v57  ;;  %7335 = vmatprep.subr.bf16.mxu1 %v10460_v36 }
 0x795   :  { %7305 = vmatpush1.bf16.msra.mxu0 %v10461_v46  ;;  %7337 = vmatpush1.bf16.msra.mxu1 %v10462_v60  ;;  %v10466_v60 = vld [vmem:[#allocation109_spill] sm:$0xff] }
 0x796   :  { %7339 = vmatprep.subr.bf16.mxu0 %v10463_v28  ;;  %7371 = vmatprep.subr.bf16.mxu1 %v10464_v63 }
 0x823   :  { %v4093_v7 = vpop.f32.mrb[22].mxu0  ;;  %v4164_v58 = vpop.f32.mrb[24].mxu1 }
 0x824   :  { %v4169_v12 = vadd.f32 %v4093_v7, %v10465_v32  ;;  %v4171_v48 = vadd.f32 %v4164_v58, %v10190_v37  ;;  %v4095_v22 = vpop.f32.mrb[23].mxu0  ;;  %v4166_v59 = vpop.f32.mrb[25].mxu1 }
 0x825   :  { %v4170_v57 = vadd.f32 %v4095_v22, %v8715_v54  ;;  %v4172_v28 = vadd.f32 %v4166_v59, %v10466_v60 }
 0x826   :  { %v5862_v16 = vmul.f32 -1.442695, %v4169_v12  ;;  %v5864_v36 = vmul.f32 -1.442695, %v4171_v48 }
 0x827   :  { %v5863_v39 = vmul.f32 -1.442695, %v4170_v57  ;;  %v5865_v34 = vmul.f32 -1.442695, %v4172_v28 }
 0x828   :  { %7914 = vpow2.f32 %v5862_v16 }
 0x829   :  { %7916 = vpow2.f32 %v5864_v36 }
 0x82a   :  { %7918 = vpow2.f32 %v5863_v39 }
 0x832   :  { %v7915_v46 = vpop.eup %7914 }
 0x833   :  { %v7917_v63 = vpop.eup %7916  ;;  %v4185_v32 = vadd.f32 1.0, %v7915_v46 }
 0x834   :  { %v7919_v19 = vpop.eup %7918  ;;  %v4187_v44 = vadd.f32 1.0, %v7917_v63 }
 0x835   :  { %v4186_v7 = vadd.f32 1.0, %v7919_v19 }
 0x836   :  { %7920 = vrcp.f32 %v4187_v44 }
 0x837   :  { %7922 = vpow2.f32 %v5865_v34 }
 0x838   :  { %7924 = vrcp.f32 %v4186_v7 }
 0x839   :  { %7926 = vrcp.f32 %v4185_v32 }
 0x840   :  { %v7921_v22 = vpop.eup %7920 }
 0x841   :  { %v7923_v58 = vpop.eup %7922  ;;  %v4197_v48 = vmul.f32 2.0, %v7921_v22 }
 0x842   :  { %v7925_v12 = vpop.eup %7924  ;;  %v4188_v39 = vadd.f32 1.0, %v7923_v58 }
 0x843   :  { %v5866_v16 = vadd.f32 -1.0, %v4197_v48  ;;  %v7927_v36 = vpop.eup %7926  ;;  %v4199_v59 = vmul.f32 %v7925_v12, %v9313_v10 }
 0x844   :  { %7928 = vrcp.f32 %v4188_v39 }
 0x845   :  { %v4200_v57 = vmul.f32 %v7927_v36, %v5866_v16 }
 0x847   :  { %v9450_v60 = vadd.f32 %v4200_v57, %v4199_v59 }
 0x849   :  { %7930 = vtanh.f32 %v9450_v60 }
 0x84b   :  { %v4417_v19 = vpop.f32.mrb[24].mxu0  ;;  %v4488_v44 = vpop.f32.mrb[26].mxu1 }
 0x84c   :  { %v4493_v34 = vadd.f32 %v4417_v19, %v8592_v38  ;;  %v4495_v46 = vadd.f32 %v4488_v44, %v10122_v40  ;;  %v4419_v63 = vpop.f32.mrb[25].mxu0  ;;  %v4490_v32 = vpop.f32.mrb[27].mxu1 }
 0x84d   :  { %v4494_v28 = vadd.f32 %v4419_v63, %v10123_v21  ;;  %v4496_v16 = vadd.f32 %v4490_v32, %v10124_v35 }
 0x84e   :  { %v5874_v7 = vmul.f32 -1.442695, %v4493_v34  ;;  %v5876_v22 = vmul.f32 -1.442695, %v4495_v46  ;;  %v7929_v10 = vpop.eup %7928 }
 0x84f   :  { %v5875_v58 = vmul.f32 -1.442695, %v4494_v28  ;;  %v5877_v57 = vmul.f32 -1.442695, %v4496_v16 }
 0x850   :  { %7932 = vpow2.f32 %v5874_v7 }
 0x851   :  { %7934 = vpow2.f32 %v5876_v22 }
 0x852   :  { %7936 = vpow2.f32 %v5875_v58 }
 0x853   :  { %v7931_v48 = vpop.eup %7930 }
 0x854   :  { %v4203_v12 = vmul.f32 %v7931_v48, %v7929_v10 }
 0x856   :  { %4593 = vmatmul.mubr.f32.vlgmr.msra.gmra.mrb[26].mxu0 %v4203_v12  ;;  %4664 = vmatmul.mubr.f32.vlgmr.msra.gmra.mrb[28].mxu1 %v4203_v12 }
 0x857   :  { %7341 = vmatpush1.bf16.msra.mxu0 %v10191_v1  ;;  %7373 = vmatpush1.bf16.msra.mxu1 %v10192_v43 }
 0x858   :  { %7343 = vmatprep.subr.bf16.mxu0 %v10193_v53  ;;  %7375 = vmatprep.subr.bf16.mxu1 %v10194_v41 }
 0x859   :  { %4734 = vmatprep.mubr.f32.mxu0 %v10053_v55  ;;  %4805 = vmatprep.mubr.f32.mxu1 %v10053_v55 }
 0x85a   :  { %v7933_v36 = vpop.eup %7932 }
 0x85b   :  { %v7935_v39 = vpop.eup %7934  ;;  %7345 = vmatpush1.bf16.msra.mxu0 %v10260_v45  ;;  %7377 = vmatpush1.bf16.msra.mxu1 %v10261_v25  ;;  %v4509_v34 = vadd.f32 1.0, %v7933_v36 }
 0x85c   :  { %v7937_v59 = vpop.eup %7936  ;;  %v4511_v19 = vadd.f32 1.0, %v7935_v39  ;;  %7347 = vmatprep.subr.bf16.mxu0 %v10262_v27  ;;  %7379 = vmatprep.subr.bf16.mxu1 %v10198_v50  ;;  %v10469_v39 = vld [vmem:[#allocation12_spill] sm:$0xff] }
 0x85d   :  { %v4510_v44 = vadd.f32 1.0, %v7937_v59  ;;  %v10475_v59 = vld [vmem:[#allocation17_spill] sm:$0xff] }
 0x85e   :  { %7938 = vrcp.f32 %v4511_v19  ;;  %v10476_v19 = vld [vmem:[#allocation22_spill] sm:$0xff] }
 0x85f   :  { %7940 = vpow2.f32 %v5877_v57  ;;  %7349 = vmatpush1.bf16.msra.mxu0 %v10263_v2  ;;  %7381 = vmatpush1.bf16.msra.mxu1 %v10264_v3  ;;  %v10470_v57 = vld [vmem:[#allocation16_spill] sm:$0xff] }
 0x860   :  { %7942 = vrcp.f32 %v4510_v44  ;;  %7351 = vmatprep.subr.bf16.mxu0 %v10265_v42  ;;  %7383 = vmatprep.subr.bf16.mxu1 %v10329_v29  ;;  %v10478_v44 = vld [vmem:[#allocation24_spill] sm:$0xff] }
 0x861   :  { %7944 = vrcp.f32 %v4509_v34  ;;  %v10479_v34 = vld [vmem:[#allocation21_spill] sm:$0xff] }
 0x863   :  { %7353 = vmatpush1.bf16.msra.mxu0 %v10267_v0  ;;  %7385 = vmatpush1.bf16.msra.mxu1 %v10330_v23 }
 0x864   :  { %7355 = vmatprep.subr.bf16.mxu0 %v10331_v61  ;;  %7387 = vmatprep.subr.bf16.mxu1 %v10270_v15 }
 0x867   :  { %7357 = vmatpush1.bf16.msra.mxu0 %v10332_v56  ;;  %7389 = vmatpush1.bf16.msra.mxu1 %v10333_v6 }
 0x868   :  { %v7939_v46 = vpop.eup %7938  ;;  %7359 = vmatprep.subr.bf16.mxu0 %v10334_v5  ;;  %7391 = vmatprep.subr.bf16.mxu1 %v10210_v20 }
 0x869   :  { %v7941_v63 = vpop.eup %7940  ;;  %v4521_v32 = vmul.f32 2.0, %v7939_v46  ;;  %v10480_v46 = vld [vmem:[#allocation26_spill] sm:$0xff] }
 0x86a   :  { %v7943_v28 = vpop.eup %7942  ;;  %v4512_v58 = vadd.f32 1.0, %v7941_v63  ;;  %v10481_v63 = vld [vmem:[#allocation23_spill] sm:$0xff] }
 0x86b   :  { %v5878_v7 = vadd.f32 -1.0, %v4521_v32  ;;  %7361 = vmatpush1.bf16.msra.mxu0 %v10211_v62  ;;  %7393 = vmatpush1.bf16.msra.mxu1 %v10146_v24  ;;  %v7945_v22 = vpop.eup %7944  ;;  %v4523_v48 = vmul.f32 %v7943_v28, %v9347_v51  ;;  %v10482_v32 = vld [vmem:[#allocation28_spill] sm:$0xff]  ;;  %v10483_v28 = vld [vmem:[#allocation25_spill] sm:$0xff] }
 0x86c   :  { %7363 = vmatprep.subr.bf16.mxu0 %v10212_v33  ;;  %7395 = vmatprep.subr.bf16.mxu1 %v10148_v14  ;;  %7946 = vrcp.f32 %v4512_v58  ;;  %v10486_v58 = vld [vmem:[#allocation32_spill] sm:$0xff] }
 0x86d   :  { %v4524_v10 = vmul.f32 %v7945_v22, %v5878_v7  ;;  %v10484_v7 = vld [vmem:[#allocation30_spill] sm:$0xff]  ;;  %v10485_v22 = vld [vmem:[#allocation27_spill] sm:$0xff] }
 0x86f   :  { %v9484_v12 = vadd.f32 %v4524_v10, %v4523_v48  ;;  %7365 = vmatpush1.bf16.msra.mxu0 %v10149_v11  ;;  %7397 = vmatpush1.bf16.msra.mxu1 %v10150_v13  ;;  %v10487_v10 = vld [vmem:[#allocation29_spill] sm:$0xff]  ;;  %v10488_v48 = vld [vmem:[#allocation34_spill] sm:$0xff] }
 0x870   :  { %7367 = vmatprep.subr.bf16.mxu0 %v10151_v31  ;;  %7399 = vmatprep.subr.bf16.mxu1 %v10152_v4 }
 0x871   :  { %7948 = vtanh.f32 %v9484_v12 }
 0x873   :  { %7369 = vmatpush1.bf16.msra.mxu0 %v10153_v49  ;;  %7401 = vmatpush1.bf16.msra.mxu1 %v10154_v52 }
 0x874   :  { %7403 = vmatprep.subr.bf16.mxu0 %v10155_v47  ;;  %7435 = vmatprep.subr.bf16.mxu1 %v10156_v17  ;;  %v10467_v47 = vld [vmem:[#allocation10_spill] sm:$0xff]  ;;  %v10468_v17 = vld [vmem:[#allocation15_spill] sm:$0xff] }
 0x876   :  { %v7947_v51 = vpop.eup %7946 }
 0x87b   :  { %v7949_v16 = vpop.eup %7948 }
 0x87c   :  { %v4527_v36 = vmul.f32 %v7949_v16, %v7947_v51  ;;  %v10489_v51 = vld [vmem:[#allocation31_spill] sm:$0xff]  ;;  %v10490_v16 = vld [vmem:[#allocation36_spill] sm:$0xff] }
 0x87e   :  { %4735 = vmatmul.mubr.f32.vlgmr.msra.gmra.mrb[26].mxu0 %v4527_v36  ;;  %4806 = vmatmul.mubr.f32.vlgmr.msra.gmra.mrb[28].mxu1 %v4527_v36 }
 0x87f   :  { %7405 = vmatpush1.bf16.msra.mxu0 %v8226_v18  ;;  %7437 = vmatpush1.bf16.msra.mxu1 %v8216_v8  ;;  %v10471_v18 = vld [vmem:[#allocation13_spill] sm:$0xff]  ;;  %v10472_v8 = vld [vmem:[#allocation18_spill] sm:$0xff] }
 0x880   :  { %7407 = vmatprep.subr.bf16.mxu0 %v8232_v26  ;;  %7439 = vmatprep.subr.bf16.mxu1 %v8218_v9  ;;  %v10473_v26 = vld [vmem:[#allocation14_spill] sm:$0xff]  ;;  %v10474_v9 = vld [vmem:[#allocation20_spill] sm:$0xff] }
 0x881   :  { %4913 = vmatprep.mubr.f32.mxu0 %v10053_v55  ;;  %4984 = vmatprep.mubr.f32.mxu1 %v10053_v55 }
 0x883   :  { %7409 = vmatpush1.bf16.msra.mxu0 %v8235_v30  ;;  %7441 = vmatpush1.bf16.msra.mxu1 %v10467_v47  ;;  %v10477_v30 = vld [vmem:[#allocation19_spill] sm:$0xff]  ;;  %v10491_v47 = vld [vmem:[#allocation33_spill] sm:$0xff] }
 0x884   :  { %7411 = vmatprep.subr.bf16.mxu0 %v10468_v17  ;;  %7443 = vmatprep.subr.bf16.mxu1 %v10469_v39  ;;  %v10492_v17 = vld [vmem:[#allocation41_spill] sm:$0xff]  ;;  %v10493_v39 = vld [vmem:[#allocation35_spill] sm:$0xff] }
 0x887   :  { %7413 = vmatpush1.bf16.msra.mxu0 %v10470_v57  ;;  %7445 = vmatpush1.bf16.msra.mxu1 %v10471_v18  ;;  %v10494_v57 = vld [vmem:[#allocation42_spill] sm:$0xff]  ;;  %v10495_v18 = vld [vmem:[#allocation37_spill] sm:$0xff] }
 0x888   :  { %7415 = vmatprep.subr.bf16.mxu0 %v10472_v8  ;;  %7447 = vmatprep.subr.bf16.mxu1 %v10473_v26  ;;  %v10496_v8 = vld [vmem:[#allocation97_spill] sm:$0xff]  ;;  %v10497_v26 = vld [vmem:[#allocation98_spill] sm:$0xff] }
 0x88b   :  { %7417 = vmatpush1.bf16.msra.mxu0 %v10474_v9  ;;  %7449 = vmatpush1.bf16.msra.mxu1 %v10475_v59  ;;  %v10498_v9 = vld [vmem:[#allocation99_spill] sm:$0xff]  ;;  %v10499_v59 = vld [vmem:[#allocation100_spill] sm:$0xff] }
 0x88c   :  { %7419 = vmatprep.subr.bf16.mxu0 %v10476_v19  ;;  %7451 = vmatprep.subr.bf16.mxu1 %v10477_v30  ;;  %v10500_v19 = vld [vmem:[#allocation38_spill] sm:$0xff]  ;;  %v10501_v30 = vld [vmem:[#allocation45_spill] sm:$0xff] }
 0x88f   :  { %7421 = vmatpush1.bf16.msra.mxu0 %v10478_v44  ;;  %7453 = vmatpush1.bf16.msra.mxu1 %v10479_v34  ;;  %v10502_v44 = vld [vmem:[#allocation39_spill] sm:$0xff]  ;;  %v10503_v34 = vld [vmem:[#allocation46_spill] sm:$0xff] }
 0x890   :  { %7423 = vmatprep.subr.bf16.mxu0 %v10480_v46  ;;  %7455 = vmatprep.subr.bf16.mxu1 %v10481_v63  ;;  %v10504_v46 = vld [vmem:[#allocation40_spill] sm:$0xff]  ;;  %v10505_v63 = vld [vmem:[#allocation47_spill] sm:$0xff] }
 0x893   :  { %7425 = vmatpush1.bf16.msra.mxu0 %v10482_v32  ;;  %7457 = vmatpush1.bf16.msra.mxu1 %v10483_v28  ;;  %v10506_v32 = vld [vmem:[#allocation43_spill] sm:$0xff]  ;;  %v10507_v28 = vld [vmem:[#allocation48_spill] sm:$0xff] }
 0x894   :  { %7427 = vmatprep.subr.bf16.mxu0 %v10484_v7  ;;  %7459 = vmatprep.subr.bf16.mxu1 %v10485_v22  ;;  %v10508_v7 = vld [vmem:[#allocation44_spill] sm:$0xff]  ;;  %v10509_v22 = vld [vmem:[#allocation49_spill] sm:$0xff] }
 0x897   :  { %7429 = vmatpush1.bf16.msra.mxu0 %v10486_v58  ;;  %7461 = vmatpush1.bf16.msra.mxu1 %v10487_v10  ;;  %v10510_v58 = vld [vmem:[#allocation50_spill] sm:$0xff]  ;;  %v10511_v10 = vld [vmem:[#allocation51_spill] sm:$0xff] }
 0x898   :  { %7431 = vmatprep.subr.bf16.mxu0 %v10488_v48  ;;  %7463 = vmatprep.subr.bf16.mxu1 %v10489_v51  ;;  %v10512_v48 = vld [vmem:[#allocation52_spill] sm:$0xff]  ;;  %v10513_v51 = vld [vmem:[#allocation53_spill] sm:$0xff] }
 0x89b   :  { %7433 = vmatpush1.bf16.msra.mxu0 %v10490_v16  ;;  %7465 = vmatpush1.bf16.msra.mxu1 %v10491_v47  ;;  %v10514_v16 = vld [vmem:[#allocation54_spill] sm:$0xff]  ;;  %v10515_v47 = vld [vmem:[#allocation55_spill] sm:$0xff] }
 0x89c   :  { %7471 = vmatprep.subr.bf16.mxu1 %v10492_v17  ;;  %7467 = vmatprep.subr.bf16.mxu0 %v10493_v39  ;;  %v10516_v17 = vld [vmem:[#allocation56_spill] sm:$0xff]  ;;  %v10517_v39 = vld [vmem:[#allocation57_spill] sm:$0xff] }
 0x89e   :  { %4914 = vmatmul.mubr.f32.vlgmr.msra.gmra.mrb[28].mxu0 %v4527_v36  ;;  %4985 = vmatmul.mubr.f32.vlgmr.msra.gmra.mrb[30].mxu1 %v4527_v36  ;;  %v5884_v36 = vld [vmem:[%s9748_s0 + $0xe] sm:$0x3] }
 0x89f   :  { %7473 = vmatpush1.bf16.msra.mxu1 %v10494_v57  ;;  %7469 = vmatpush1.bf16.msra.mxu0 %v10495_v18  ;;  %v10518_v57 = vld [vmem:[#allocation58_spill] sm:$0xff]  ;;  %v10519_v18 = vld [vmem:[#allocation59_spill] sm:$0xff] }
 0x8a0   :  { %5888 = vmatprep.subr.msk.mxu1 %vm438_vm0, %v10496_v8  ;;  %5885 = vmatprep.subr.msk.mxu0 %vm438_vm0, %v10497_v26  ;;  %v10520_v8 = vld [vmem:[#allocation60_spill] sm:$0xff]  ;;  %v10521_v26 = vld [vmem:[#allocation61_spill] sm:$0xff] }
 0x8a1   :  { %5058 = vmatprep.mubr.f32.mxu0 %v10053_v55  ;;  %5129 = vmatprep.mubr.f32.mxu1 %v10053_v55 }
 0x8a3   :  { %5889 = vmatpush1.msk.msra.mxu1 %vm438_vm0, %v10498_v9  ;;  %5886 = vmatpush1.msk.msra.mxu0 %vm438_vm0, %v10499_v59  ;;  %v10522_v9 = vld [vmem:[#allocation62_spill] sm:$0xff]  ;;  %v10523_v59 = vld [vmem:[#allocation63_spill] sm:$0xff] }
 0x8a4   :  { %7475 = vmatprep.subr.bf16.mxu0 %v10500_v19  ;;  %7507 = vmatprep.subr.bf16.mxu1 %v10501_v30  ;;  %v10525_v19 = vld [vmem:[#allocation65_spill] sm:$0xff]  ;;  %v10526_v30 = vld [vmem:[#allocation66_spill] sm:$0xff] }
 0x8a6   :  { %5887 = vmatmul.mubr.msk.f32.vlgmr.msra.gmra.mrb[28].mxu0 %vm434_vm1, %v5884_v36  ;;  %5890 = vmatmul.mubr.msk.f32.vlgmr.msra.gmra.mrb[30].mxu1 %vm434_vm1, %v5884_v36  ;;  %v10524_v36 = vld [vmem:[#allocation64_spill] sm:$0xff] }
 0x8a7   :  { %7477 = vmatpush1.bf16.msra.mxu0 %v10502_v44  ;;  %7509 = vmatpush1.bf16.msra.mxu1 %v10503_v34  ;;  %v10527_v44 = vld [vmem:[#allocation67_spill] sm:$0xff]  ;;  %v10528_v34 = vld [vmem:[#allocation68_spill] sm:$0xff] }
 0x8a8   :  { %7479 = vmatprep.subr.bf16.mxu0 %v10504_v46  ;;  %7511 = vmatprep.subr.bf16.mxu1 %v10505_v63  ;;  %v10529_v46 = vld [vmem:[#allocation69_spill] sm:$0xff]  ;;  %v10530_v63 = vld [vmem:[#allocation70_spill] sm:$0xff] }
 0x8a9   :  { %5235 = vmatprep.mubr.f32.mxu0 %v10053_v55  ;;  %5306 = vmatprep.mubr.f32.mxu1 %v10053_v55 }
 0x8ab   :  { %7481 = vmatpush1.bf16.msra.mxu0 %v10506_v32  ;;  %7513 = vmatpush1.bf16.msra.mxu1 %v10507_v28  ;;  %v10531_v32 = vld [vmem:[#allocation71_spill] sm:$0xff]  ;;  %v10532_v28 = vld [vmem:[#allocation72_spill] sm:$0xff] }
 0x8ac   :  { %7483 = vmatprep.subr.bf16.mxu0 %v10508_v7  ;;  %7515 = vmatprep.subr.bf16.mxu1 %v10509_v22  ;;  %v10533_v7 = vld [vmem:[#allocation73_spill] sm:$0xff] }
 0x8af   :  { %7485 = vmatpush1.bf16.msra.mxu0 %v10510_v58  ;;  %7517 = vmatpush1.bf16.msra.mxu1 %v10511_v10  ;;  %v10534_v10 = vld [vmem:[#allocation107_spill] sm:$0xff] }
 0x8b0   :  { %7487 = vmatprep.subr.bf16.mxu0 %v10512_v48  ;;  %7519 = vmatprep.subr.bf16.mxu1 %v10513_v51 }
 0x8b3   :  { %7489 = vmatpush1.bf16.msra.mxu0 %v10514_v16  ;;  %7521 = vmatpush1.bf16.msra.mxu1 %v10515_v47 }
 0x8b4   :  { %7491 = vmatprep.subr.bf16.mxu0 %v10516_v17  ;;  %7523 = vmatprep.subr.bf16.mxu1 %v10517_v39 }
 0x8b7   :  { %7493 = vmatpush1.bf16.msra.mxu0 %v10518_v57  ;;  %7525 = vmatpush1.bf16.msra.mxu1 %v10519_v18 }
 0x8b8   :  { %7495 = vmatprep.subr.bf16.mxu0 %v10520_v8  ;;  %7527 = vmatprep.subr.bf16.mxu1 %v10521_v26  ;;  %v10535_v8 = vld [vmem:[#allocation109_spill] sm:$0xff] }
 0x8bb   :  { %7497 = vmatpush1.bf16.msra.mxu0 %v10522_v9  ;;  %7529 = vmatpush1.bf16.msra.mxu1 %v10523_v59 }
 0x8bc   :  { %7499 = vmatprep.subr.bf16.mxu0 %v10524_v36  ;;  %7531 = vmatprep.subr.bf16.mxu1 %v10525_v19 }
 0x8bf   :  { %7501 = vmatpush1.bf16.msra.mxu0 %v10526_v30  ;;  %7533 = vmatpush1.bf16.msra.mxu1 %v10527_v44 }
 0x8c0   :  { %7503 = vmatprep.subr.bf16.mxu0 %v10528_v34  ;;  %7535 = vmatprep.subr.bf16.mxu1 %v10529_v46 }
 0x8c3   :  { %7505 = vmatpush1.bf16.msra.mxu0 %v10530_v63  ;;  %7537 = vmatpush1.bf16.msra.mxu1 %v10531_v32 }
 0x8c4   :  { %7539 = vmatprep.subr.bf16.mxu0 %v10532_v28  ;;  %7571 = vmatprep.subr.bf16.mxu1 %v10533_v7 }
 0x951   :  { %v4736_v22 = vpop.f32.mrb[26].mxu0  ;;  %v4807_v58 = vpop.f32.mrb[28].mxu1 }
 0x952   :  { %v4812_v48 = vadd.f32 %v4736_v22, %v10534_v10  ;;  %v4814_v51 = vadd.f32 %v4807_v58, %v10190_v37  ;;  %v4738_v16 = vpop.f32.mrb[27].mxu0  ;;  %v4809_v47 = vpop.f32.mrb[29].mxu1 }
 0x953   :  { %v4813_v17 = vadd.f32 %v4738_v16, %v8715_v54  ;;  %v4815_v26 = vadd.f32 %v4809_v47, %v10535_v8 }
 0x954   :  { %v5879_v39 = vmul.f32 -1.442695, %v4812_v48  ;;  %v5881_v57 = vmul.f32 -1.442695, %v4814_v51 }
 0x955   :  { %v5880_v18 = vmul.f32 -1.442695, %v4813_v17  ;;  %v5882_v36 = vmul.f32 -1.442695, %v4815_v26 }
 0x956   :  { %7950 = vpow2.f32 %v5879_v39 }
 0x957   :  { %7952 = vpow2.f32 %v5881_v57 }
 0x958   :  { %7954 = vpow2.f32 %v5880_v18 }
 0x960   :  { %v7951_v9 = vpop.eup %7950 }
 0x961   :  { %v7953_v59 = vpop.eup %7952  ;;  %v4828_v34 = vadd.f32 1.0, %v7951_v9 }
 0x962   :  { %v7955_v19 = vpop.eup %7954  ;;  %v4830_v30 = vadd.f32 1.0, %v7953_v59 }
 0x963   :  { %v4829_v44 = vadd.f32 1.0, %v7955_v19 }
 0x964   :  { %7956 = vrcp.f32 %v4830_v30 }
 0x965   :  { %7958 = vpow2.f32 %v5882_v36 }
 0x966   :  { %7960 = vrcp.f32 %v4829_v44 }
 0x967   :  { %7962 = vrcp.f32 %v4828_v34 }
 0x96e   :  { %v7957_v46 = vpop.eup %7956 }
 0x96f   :  { %v7959_v63 = vpop.eup %7958  ;;  %v4840_v32 = vmul.f32 2.0, %v7957_v46 }
 0x970   :  { %v7961_v28 = vpop.eup %7960  ;;  %v4831_v58 = vadd.f32 1.0, %v7959_v63  ;;  %v5500_v63 = vld [vmem:[%s9755_s7 + $0x50] sm:$0xff] }
 0x971   :  { %v5883_v7 = vadd.f32 -1.0, %v4840_v32  ;;  %v7963_v22 = vpop.eup %7962  ;;  %v4842_v51 = vmul.f32 %v7961_v28, %v9450_v60  ;;  %v5501_v32 = vld [vmem:[%s9755_s7 + $0x58] sm:$0xff]  ;;  %v5502_v28 = vld [vmem:[%s9755_s7 + $0x60] sm:$0xff] }
 0x972   :  { %7964 = vrcp.f32 %v4831_v58 }
 0x973   :  { %v4843_v48 = vmul.f32 %v7963_v22, %v5883_v7  ;;  %v7618_v7 = vpack.c.bf16 %v5501_v32, %v5500_v63  ;;  %v5503_v22 = vld [vmem:[%s9755_s7 + $0x68] sm:$0xff]  ;;  %v5902_v32 = vld [vmem:[%s9758_s10] ss:$0 sm:$0xff] }
 0x974   :  { %v7621_v58 = vpack.c.bf16 %v5503_v22, %v5502_v28 }
 0x975   :  { %v9587_v16 = vadd.f32 %v4843_v48, %v4842_v51  ;;  %v5504_v48 = vld [vmem:[%s9755_s7 + $0x70] sm:$0xff]  ;;  %v5505_v51 = vld [vmem:[%s9755_s7 + $0x78] sm:$0xff] }
 0x977   :  { %7966 = vtanh.f32 %v9587_v16 }
 0x979   :  { %v5060_v47 = vpop.f32.mrb[28].mxu0  ;;  %v5131_v17 = vpop.f32.mrb[30].mxu1 }
 0x97a   :  { %v5136_v39 = vadd.f32 %v5060_v47, %v8592_v38  ;;  %v5138_v57 = vadd.f32 %v5131_v17, %v10122_v40  ;;  %v5062_v18 = vpop.f32.mrb[29].mxu0  ;;  %v5133_v26 = vpop.f32.mrb[31].mxu1  ;;  %v7624_v47 = vpack.c.bf16 %v5505_v51, %v5504_v48  ;;  %v5584_v17 = vld [vmem:[%s9757_s9] sm:$0xff] }
 0x97b   :  { %v5137_v9 = vadd.f32 %v5062_v18, %v10123_v21  ;;  %v5139_v34 = vadd.f32 %v5133_v26, %v10124_v35  ;;  %v5587_v26 = vld [vmem:[%s9757_s9 + $0x18] sm:$0xff] }
 0x97c   :  { %v5891_v59 = vmul.f32 -1.442695, %v5136_v39  ;;  %v5893_v36 = vmul.f32 -1.442695, %v5138_v57  ;;  %v7965_v60 = vpop.eup %7964  ;;  %v5585_v39 = vld [vmem:[%s9757_s9 + $0x8] sm:$0xff]  ;;  %v5586_v57 = vld [vmem:[%s9757_s9 + $0x10] sm:$0xff] }
 0x97d   :  { %v5892_v19 = vmul.f32 -1.442695, %v5137_v9  ;;  %v5894_v21 = vmul.f32 -1.442695, %v5139_v34  ;;  %v7627_v18 = vpack.c.bf16 %v5585_v39, %v5584_v17  ;;  %v7630_v9 = vpack.c.bf16 %v5587_v26, %v5586_v57 }
 0x97e   :  { %7968 = vpow2.f32 %v5891_v59  ;;  %v5588_v59 = vld [vmem:[%s9757_s9 + $0x20] sm:$0xff] }
 0x97f   :  { %7970 = vpow2.f32 %v5893_v36  ;;  %v5589_v36 = vld [vmem:[%s9757_s9 + $0x28] sm:$0xff] }
 0x980   :  { %7972 = vpow2.f32 %v5892_v19  ;;  %v7633_v19 = vpack.c.bf16 %v5589_v36, %v5588_v59 }
 0x981   :  { %v7967_v30 = vpop.eup %7966 }
 0x982   :  { %v4846_v44 = vmul.f32 %v7967_v30, %v7965_v60 }
 0x984   :  { %5236 = vmatmul.mubr.f32.vlgmr.msra.gmra.mrb[30].mxu0 %v4846_v44  ;;  %5307 = vmatmul.mubr.f32.vlgmr.msra.gmra.mrb[32].mxu1 %v4846_v44 }
 0x985   :  { %7541 = vmatpush1.bf16.msra.mxu0 %v10191_v1  ;;  %7573 = vmatpush1.bf16.msra.mxu1 %v10192_v43 }
 0x986   :  { %7543 = vmatprep.subr.bf16.mxu0 %v10193_v53  ;;  %7575 = vmatprep.subr.bf16.mxu1 %v10194_v41 }
 0x987   :  { %5377 = vmatprep.mubr.f32.mxu0 %v10053_v55  ;;  %5448 = vmatprep.mubr.f32.mxu1 %v10053_v55 }
 0x988   :  { %v7969_v38 = vpop.eup %7968 }
 0x989   :  { %v7971_v40 = vpop.eup %7970  ;;  %7545 = vmatpush1.bf16.msra.mxu0 %v10260_v45  ;;  %7577 = vmatpush1.bf16.msra.mxu1 %v10261_v25  ;;  %v5152_v43 = vadd.f32 1.0, %v7969_v38 }
 0x98a   :  { %v7973_v35 = vpop.eup %7972  ;;  %v5154_v46 = vadd.f32 1.0, %v7971_v40  ;;  %7547 = vmatprep.subr.bf16.mxu0 %v10262_v27  ;;  %7579 = vmatprep.subr.bf16.mxu1 %v10198_v50 }
 0x98b   :  { %v5153_v1 = vadd.f32 1.0, %v7973_v35 }
 0x98c   :  { %7974 = vrcp.f32 %v5154_v46 }
 0x98d   :  { %7976 = vpow2.f32 %v5894_v21  ;;  %7549 = vmatpush1.bf16.msra.mxu0 %v10263_v2  ;;  %7581 = vmatpush1.bf16.msra.mxu1 %v10264_v3 }
 0x98e   :  { %7978 = vrcp.f32 %v5153_v1  ;;  %7551 = vmatprep.subr.bf16.mxu0 %v10265_v42  ;;  %7583 = vmatprep.subr.bf16.mxu1 %v10329_v29 }
 0x98f   :  { %7980 = vrcp.f32 %v5152_v43 }
 0x991   :  { %7553 = vmatpush1.bf16.msra.mxu0 %v10267_v0  ;;  %7585 = vmatpush1.bf16.msra.mxu1 %v10330_v23  ;;  %v5496_v23 = vld [vmem:[%s9755_s7 + $0x30] sm:$0xff] }
 0x992   :  { %7555 = vmatprep.subr.bf16.mxu0 %v10331_v61  ;;  %7587 = vmatprep.subr.bf16.mxu1 %v10270_v15  ;;  %v5495_v15 = vld [vmem:[%s9755_s7 + $0x28] sm:$0xff]  ;;  %v5497_v61 = vld [vmem:[%s9755_s7 + $0x38] sm:$0xff] }
 0x995   :  { %7557 = vmatpush1.bf16.msra.mxu0 %v10332_v56  ;;  %7589 = vmatpush1.bf16.msra.mxu1 %v10333_v6  ;;  %v7612_v56 = vpack.c.bf16 %v5497_v61, %v5496_v23  ;;  %v5498_v6 = vld [vmem:[%s9755_s7 + $0x40] sm:$0xff] }
 0x996   :  { %v7975_v53 = vpop.eup %7974  ;;  %7559 = vmatprep.subr.bf16.mxu0 %v10334_v5  ;;  %7591 = vmatprep.subr.bf16.mxu1 %v10210_v20  ;;  %v5494_v20 = vld [vmem:[%s9755_s7 + $0x20] sm:$0xff]  ;;  %v5499_v5 = vld [vmem:[%s9755_s7 + $0x48] sm:$0xff] }
 0x997   :  { %v7977_v41 = vpop.eup %7976  ;;  %v5164_v50 = vmul.f32 2.0, %v7975_v53  ;;  %v7609_v29 = vpack.c.bf16 %v5495_v15, %v5494_v20  ;;  %v5674_v20 = vld [vmem:[%s9759_s11] sm:$0xff]  ;;  %v5675_v15 = vld [vmem:[%s9759_s11 + $0x8] sm:$0xff] }
 0x998   :  { %v7979_v45 = vpop.eup %7978  ;;  %v5155_v2 = vadd.f32 1.0, %v7977_v41 }
 0x999   :  { %v5895_v25 = vadd.f32 -1.0, %v5164_v50  ;;  %7561 = vmatpush1.bf16.msra.mxu0 %v10211_v62  ;;  %7593 = vmatpush1.bf16.msra.mxu1 %v10146_v24  ;;  %v7981_v27 = vpop.eup %7980  ;;  %v5166_v42 = vmul.f32 %v7979_v45, %v9484_v12  ;;  %v7615_v12 = vpack.c.bf16 %v5499_v5, %v5498_v6  ;;  %v5676_v5 = vld [vmem:[%s9759_s11 + $0x10] sm:$0xff] }
 0x99a   :  { %7563 = vmatprep.subr.bf16.mxu0 %v10212_v33  ;;  %7595 = vmatprep.subr.bf16.mxu1 %v10148_v14  ;;  %7982 = vrcp.f32 %v5155_v2 }
 0x99b   :  { %v5167_v3 = vmul.f32 %v7981_v27, %v5895_v25 }
 0x99d   :  { %v5168_v0 = vadd.f32 %v5167_v3, %v5166_v42  ;;  %7565 = vmatpush1.bf16.msra.mxu0 %v10149_v11  ;;  %7597 = vmatpush1.bf16.msra.mxu1 %v10150_v13  ;;  %v5490_v11 = vld [vmem:[%s9755_s7] sm:$0xff]  ;;  %v5491_v13 = vld [vmem:[%s9755_s7 + $0x8] sm:$0xff] }
 0x99e   :  { %7567 = vmatprep.subr.bf16.mxu0 %v10151_v31  ;;  %7599 = vmatprep.subr.bf16.mxu1 %v10152_v4  ;;  %v7603_v31 = vpack.c.bf16 %v5491_v13, %v5490_v11  ;;  %v8088_v4 = vmov 0.0|0.0  }
 0x99f   :  { %7984 = vtanh.f32 %v5168_v0 }
 0x9a1   :  { %7569 = vmatpush1.bf16.msra.mxu0 %v10153_v49  ;;  %7601 = vmatpush1.bf16.msra.mxu1 %v10154_v52  ;;  %v5492_v52 = vld [vmem:[%s9755_s7 + $0x10] sm:$0xff]  ;;  %v5493_v49 = vld [vmem:[%s9755_s7 + $0x18] sm:$0xff] }
 0x9a2   :  { %7602 = vmatprep.subr.bf16.mxu0 %v8088_v4  ;;  %7626 = vmatprep.subr.bf16.mxu1 %v8088_v4  ;;  %v7606_v33 = vpack.c.bf16 %v5493_v49, %v5492_v52  ;;  %v5590_v52 = vld [vmem:[%s9757_s9 + $0x30] sm:$0xff]  ;;  %v5591_v49 = vld [vmem:[%s9757_s9 + $0x38] sm:$0xff] }
 0x9a4   :  { %v7983_v24 = vpop.eup %7982 }
 0x9a9   :  { %v7985_v14 = vpop.eup %7984 }
 0x9aa   :  { %v5170_v62 = vmul.f32 %v7985_v14, %v7983_v24 }
 0x9ac   :  { %5378 = vmatmul.mubr.f32.vlgmr.msra.gmra.mrb[30].mxu0 %v5170_v62  ;;  %5449 = vmatmul.mubr.f32.vlgmr.msra.gmra.mrb[32].mxu1 %v5170_v62 }
 0x9ad   :  { %7604 = vmatpush3.bf16.msra.mxu0 %v7603_v31  ;;  %5969 = vmatprep.mubr.msk.f32.mxu0 %vm8089_vm2, %v10053_v55 }
 0x9ae   :  { %7605 = vmatprep.subr.bf16.mxu0 %v8088_v4  ;;  %5988 = vmatprep.mubr.msk.f32.mxu1 %vm8089_vm2, %v10053_v55 }
 0x9af   :  { %7628 = vmatpush3.bf16.msra.mxu1 %v7627_v18 }
 0x9b0   :  { %7629 = vmatprep.subr.bf16.mxu1 %v8088_v4 }
 0x9b1   :  { %7607 = vmatpush3.bf16.msra.mxu0 %v7606_v33  ;;  %v7636_v33 = vpack.c.bf16 %v5591_v49, %v5590_v52 }
 0x9b2   :  { %7608 = vmatprep.subr.bf16.mxu0 %v8088_v4 }
 0x9b3   :  { %7631 = vmatpush3.bf16.msra.mxu1 %v7630_v9 }
 0x9b4   :  { %7632 = vmatprep.subr.bf16.mxu1 %v8088_v4 }
 0x9b5   :  { %7610 = vmatpush3.bf16.msra.mxu0 %v7609_v29 }
 0x9b6   :  { %7611 = vmatprep.subr.bf16.mxu0 %v8088_v4 }
 0x9b7   :  { %7634 = vmatpush3.bf16.msra.mxu1 %v7633_v19 }
 0x9b8   :  { %7635 = vmatprep.subr.bf16.mxu1 %v8088_v4 }
 0x9b9   :  { %7613 = vmatpush3.bf16.msra.mxu0 %v7612_v56  ;;  %v7639_v56 = vpack.c.bf16 %v5675_v15, %v5674_v20 }
 0x9ba   :  { %7614 = vmatprep.subr.bf16.mxu0 %v8088_v4 }
 0x9bb   :  { %7637 = vmatpush3.bf16.msra.mxu1 %v7636_v33 }
 0x9bc   :  { %7638 = vmatprep.subr.bf16.mxu1 %v8088_v4 }
 0x9bd   :  { %7616 = vmatpush3.bf16.msra.mxu0 %v7615_v12  ;;  %v5677_v12 = vld [vmem:[%s9759_s11 + $0x18] sm:$0xff] }
 0x9be   :  { %7617 = vmatprep.subr.bf16.mxu0 %v8088_v4  ;;  %v7642_v63 = vpack.c.bf16 %v5677_v12, %v5676_v5 }
 0x9c1   :  { %7619 = vmatpush3.bf16.msra.mxu0 %v7618_v7 }
 0x9c2   :  { %7620 = vmatprep.subr.bf16.mxu0 %v8088_v4 }
 0x9c5   :  { %7622 = vmatpush3.bf16.msra.mxu0 %v7621_v58 }
 0x9c6   :  { %7623 = vmatprep.subr.bf16.mxu0 %v8088_v4 }
 0x9c9   :  { %7625 = vmatpush3.bf16.msra.mxu0 %v7624_v47 }
 0xa7f   :  { %v5379_v60 = vpop.f32.mrb[30].mxu0  ;;  %v5450_v30 = vpop.f32.mrb[32].mxu1 }
 0xa80   :  { %v5455_v44 = vadd.f32 %v5379_v60, %v10534_v10  ;;  %v5457_v34 = vadd.f32 %v5450_v30, %v10190_v37  ;;  %v5381_v38 = vpop.f32.mrb[31].mxu0  ;;  %v5452_v40 = vpop.f32.mrb[33].mxu1 }
 0xa81   :  { %v5456_v21 = vadd.f32 %v5381_v38, %v8715_v54  ;;  %v5458_v43 = vadd.f32 %v5452_v40, %v10535_v8 }
 0xa82   :  { %v5896_v35 = vmul.f32 -1.442695, %v5455_v44  ;;  %v5898_v46 = vmul.f32 -1.442695, %v5457_v34 }
 0xa83   :  { %v5897_v1 = vmul.f32 -1.442695, %v5456_v21  ;;  %v5899_v50 = vmul.f32 -1.442695, %v5458_v43 }
 0xa84   :  { %7986 = vpow2.f32 %v5896_v35 }
 0xa85   :  { %7988 = vpow2.f32 %v5898_v46 }
 0xa86   :  { %7990 = vpow2.f32 %v5897_v1 }
 0xa8e   :  { %v7987_v53 = vpop.eup %7986 }
 0xa8f   :  { %v7989_v41 = vpop.eup %7988  ;;  %v5471_v27 = vadd.f32 1.0, %v7987_v53 }
 0xa90   :  { %v7991_v45 = vpop.eup %7990  ;;  %v5473_v25 = vadd.f32 1.0, %v7989_v41 }
 0xa91   :  { %v5472_v10 = vadd.f32 1.0, %v7991_v45 }
 0xa92   :  { %7992 = vrcp.f32 %v5473_v25 }
 0xa93   :  { %7994 = vpow2.f32 %v5899_v50 }
 0xa94   :  { %7996 = vrcp.f32 %v5472_v10 }
 0xa95   :  { %7998 = vrcp.f32 %v5471_v27 }
 0xa9c   :  { %v7993_v37 = vpop.eup %7992 }
 0xa9d   :  { %v7995_v54 = vpop.eup %7994  ;;  %v5483_v2 = vmul.f32 2.0, %v7993_v37 }
 0xa9e   :  { %v7997_v3 = vpop.eup %7996  ;;  %v5474_v24 = vadd.f32 1.0, %v7995_v54 }
 0xa9f   :  { %v5900_v42 = vadd.f32 -1.0, %v5483_v2  ;;  %v7999_v0 = vpop.eup %7998  ;;  %v5485_v8 = vmul.f32 %v7997_v3, %v9587_v16  ;;  %v5901_v16 = vld [vmem:[%s9756_s8] ss:$0 sm:$0xff] }
 0xaa0   :  { %8000 = vrcp.f32 %v5474_v24 }
 0xaa1   :  { %v5486_v14 = vmul.f32 %v7999_v0, %v5900_v42 }
 0xaa3   :  { %v5487_v62 = vadd.f32 %v5486_v14, %v5485_v8 }
 0xaa5   :  { %8002 = vtanh.f32 %v5487_v62 }
 0xaaa   :  { %v8001_v11 = vpop.eup %8000 }
 0xaaf   :  { %v8003_v13 = vpop.eup %8002 }
 0xab0   :  { %v5489_v31 = vmul.f32 %v8003_v13, %v8001_v11 }
 0xab2   :  { %5970 = vmatmul.mubr.f32.vlgmr.msra.gmra.mrb[32].mxu0 %v5489_v31 }
 0xb85   :  { %v5579_v29 = vpop.f32.mrb[32].mxu0 }
 0xb86   :  { %v5580_v23 = vadd.f32 %v5901_v16, %v5579_v29  ;;  %v5971_v61 = vpop.f32.mrb[33].mxu0 }
 0xb88   :  { %v5583_v6 = vmax.f32 %v5580_v23, 0.0 }
 0xb8a   :  { %5989 = vmatmul.mubr.msk.f32.vlgmr.msra.gmra.mrb[34].mxu1 %vm5599_vm3, %v5583_v6 }
 0xb8b   :  { %7640 = vmatpush3.bf16.msra.mxu1 %v7639_v56  ;;  %5999 = vmatprep.mubr.msk.f32.mxu1 %vm8089_vm2, %v10053_v55 }
 0xb8c   :  { %7641 = vmatprep.subr.bf16.mxu1 %v8088_v4  ;;  %v5904_v4 = vld [vmem:[%s9760_s12] ss:$0 sm:$0xff] }
 0xb8f   :  { %7643 = vmatpush3.bf16.msra.mxu1 %v7642_v63 }
 0xc5d   :  { %v5669_v28 = vpop.f32.mrb[34].mxu1 }
 0xc5e   :  { %v5670_v7 = vadd.f32 %v5902_v32, %v5669_v28  ;;  %v5990_v22 = vpop.f32.mrb[35].mxu1 }
 0xc60   :  { %v5673_v55 = vmax.f32 %v5670_v7, 0.0 }
 0xc62   :  { %6000 = vmatmul.mubr.msk.f32.vlgmr.msra.gmra.mrb[36].mxu1 %vm5685_vm4, %v5673_v55 }
 0xd35   :  { %v5755_v58 = vpop.f32.mrb[36].mxu1 }
 0xd36   :  { %v5756_v48 = vadd.f32 %v5904_v4, %v5755_v58  ;;  %v6001_v51 = vpop.f32.mrb[37].mxu1 }
 0xd38   :  { %5759 = vst [vmem:[%s9761_s13] sm:$0x3] %v5756_v48 }
 0xd39   :  { %5764 = vsyncpa [#allocation3], 1 }
 0xd3a   :  { %5765 = vsyncpa [#allocation5], 1 }

</bundles_post_ra>
